<compile_context>
chip_gen: v7x
topology: tpu7x:2x2x1
jax: 0.10.0
libtpu: 0.0.40
codegen_flags: <defaults>
</compile_context>

<pallas_src>
import jax
import jax.numpy as jnp
from jax.experimental import pallas as pl
from jax.experimental.pallas import tpu as pltpu

NUM_CLASSES = 10          # inferred from Conv2d(34, 24, 1): 34 = 24 + 10
CPAD = 128                # channel padding -> lane-dense GEMMs everywhere
MXU_DTYPE = jnp.bfloat16  # MXU operand dtype (accumulation stays f32)


# ----------------------------------------------------------------------------
# Pallas GEMM + bias kernel (the single hot path for every conv / deconv layer)
# ----------------------------------------------------------------------------
def _gemm_bias_kernel(a_ref, w_ref, b_ref, o_ref):
    acc = jnp.dot(a_ref[...], w_ref[...], preferred_element_type=jnp.float32)
    o_ref[...] = (acc + b_ref[...]).astype(o_ref.dtype)


def _pick_tm(m):
    """Row tile: as large as possible, but >=2 grid blocks (v7x has 2 TCs),
    and a multiple of 16 rows (bf16 sublane packing) or the full extent."""
    if m <= 16 or m % 16 != 0:
        return m
    tm = min(512, m // 2)
    tm = (tm // 16) * 16
    while m % tm:
        tm -= 16
    return tm


def gemm_bias(a, w, b, out_dtype):
    """out = a @ w + b on the MXU.

    a: (M, K) bf16, K a multiple of 128 (channel-padded patches)
    w: (K, N) bf16, N a multiple of 128 (lane-dense stores)
    b: (1, N) per-column bias or (M, N) per-row bias, f32
    """
    M, K = a.shape
    K2, N = w.shape
    assert K == K2
    b = b.astype(jnp.float32)
    if b.ndim == 1:
        b = b.reshape(1, N)
    per_row = b.shape[0] != 1

    tm = _pick_tm(M)
    grid = (M // tm,)
    b_spec = (pl.BlockSpec((tm, N), lambda i: (i, 0)) if per_row
              else pl.BlockSpec((1, N), lambda i: (0, 0)))

    cost = pl.CostEstimate(
        flops=2 * M * K * N,
        transcendentals=0,
        bytes_accessed=(a.size * a.dtype.itemsize + w.size * w.dtype.itemsize
                        + b.size * 4 + M * N * jnp.dtype(out_dtype).itemsize))

    return pl.pallas_call(
        _gemm_bias_kernel,
        out_shape=jax.ShapeDtypeStruct((M, N), out_dtype),
        grid=grid,
        in_specs=[pl.BlockSpec((tm, K), lambda i: (i, 0)),
                  pl.BlockSpec((K, N), lambda i: (0, 0)),
                  b_spec],
        out_specs=pl.BlockSpec((tm, N), lambda i: (i, 0)),
        compiler_params=pltpu.CompilerParams(
            dimension_semantics=("parallel",)),
        cost_estimate=cost,
    )(a.astype(MXU_DTYPE), w.astype(MXU_DTYPE), b)


# ----------------------------------------------------------------------------
# layers (NHWC channel-padded activations; all heavy math inside gemm_bias)
# ----------------------------------------------------------------------------
def conv2d_s2(x, w2, b2, out_dtype):
    """Conv2d(k=4, stride=2, pad=1) on NHWC channel-padded input."""
    B, H, W, C = x.shape
    Ho, Wo = H // 2, W // 2
    xp = jnp.pad(x, ((0, 0), (1, 1), (1, 1), (0, 0)))
    cols = [xp[:, i:i + 2 * Ho:2, j:j + 2 * Wo:2, :]
            for i in range(4) for j in range(4)]
    a = jnp.concatenate(cols, axis=-1).reshape(B * Ho * Wo, 16 * C)
    out = gemm_bias(a, w2, b2, out_dtype)
    return out.reshape(B, Ho, Wo, w2.shape[1])


def conv_transpose2d_s2(x, w2, b2, out_dtype):
    """ConvTranspose2d(k=4, stride=2, pad=1) via sub-pixel decomposition:
    3x3 stride-1 patches -> one GEMM with 2x2 output phases -> pixel shuffle."""
    B, H, W, C = x.shape
    xp = jnp.pad(x, ((0, 0), (1, 1), (1, 1), (0, 0)))
    cols = [xp[:, dh:dh + H, dw:dw + W, :]
            for dh in range(3) for dw in range(3)]
    a = jnp.concatenate(cols, axis=-1).reshape(B * H * W, 9 * C)
    out = gemm_bias(a, w2, b2, out_dtype)                    # (B*H*W, 4*CPAD)
    out = out.reshape(B, H, W, 2, 2, CPAD)                   # (b,h,w,p,q,c)
    out = out.transpose(0, 1, 3, 2, 4, 5).reshape(B, 2 * H, 2 * W, CPAD)
    return out


# ----------------------------------------------------------------------------
# trace-time weight packing (PyTorch layouts -> padded bf16 GEMM matrices)
# ----------------------------------------------------------------------------
def pack_conv_w(w, cin_pad, cout_pad=CPAD):
    """Conv2d weight (Cout, Cin, kh, kw) -> (kh*kw*cin_pad, cout_pad),
    row ordering (tap_i, tap_j, cin), column ordering (cout)."""
    cout, cin, kh, kw = w.shape
    w2 = jnp.zeros((kh, kw, cin_pad, cout_pad), jnp.float32)
    w2 = w2.at[:, :, :cin, :cout].set(jnp.transpose(w, (2, 3, 1, 0)))
    return w2.reshape(kh * kw * cin_pad, cout_pad).astype(MXU_DTYPE)


def pack_bias(b, n=CPAD):
    return jnp.zeros((1, n), jnp.float32).at[0, :b.shape[0]].set(b)


# (output phase p, 3x3 patch offset d) -> ConvTranspose kernel tap index
#   out[2h]   = x[h]*w[1] + x[h-1]*w[3]
#   out[2h+1] = x[h+1]*w[0] + x[h]*w[2]
_TCONV_TAPS = {(0, 0): 3, (0, 1): 1, (1, 1): 2, (1, 2): 0}


def pack_convT_w(w, scale=1.0, cin_pad=CPAD, cout_pad=CPAD):
    """ConvTranspose2d weight (Cin, Cout, 4, 4), stride 2, pad 1 ->
    sub-pixel GEMM matrix (3*3*cin_pad, 2*2*cout_pad)."""
    cin, cout, _, _ = w.shape
    w2 = jnp.zeros((3, 3, cin_pad, 2, 2, cout_pad), jnp.float32)
    for (p, dh), i in _TCONV_TAPS.items():
        for (q, dw), j in _TCONV_TAPS.items():
            w2 = w2.at[dh, dw, :cin, p, q, :cout].set(scale * w[:, :, i, j])
    return w2.reshape(9 * cin_pad, 4 * cout_pad).astype(MXU_DTYPE)


def pack_convT_b(b, cout_pad=CPAD):
    b2 = jnp.zeros((2, 2, cout_pad), jnp.float32).at[:, :, :b.shape[0]].set(b)
    return b2.reshape(1, 4 * cout_pad)


# ----------------------------------------------------------------------------
# label map (torch expand + raw reshape semantics) and per-row lefi bias
# ----------------------------------------------------------------------------
def label_map(H, W, t):
    # torch: T.expand(B, H, W, C).reshape(B, C, H, W) is a raw reshape, NOT a
    # permute -> element (c, h, w) is 1 iff (c*H*W + h*W + w) % C == t.
    idx = jnp.arange(NUM_CLASSES * H * W).reshape(NUM_CLASSES, H, W)
    return (idx % NUM_CLASSES == t).astype(jnp.float32)


def lefi_row_bias(packed, B, H, W, t):
    """Fold the one-hot label branch of the 1x1 conv into a per-row bias:
    conv(cat([M, T])) = W_img @ M + (W_lab @ T + b); T is batch-independent."""
    T = label_map(H, W, t)                                        # (10, H, W)
    lab = jnp.einsum('ck,khw->hwc', packed["lefi_w_lab"], T,
                     precision=jax.lax.Precision.HIGHEST)         # (H, W, 24)
    bias = jnp.zeros((H, W, CPAD), jnp.float32)
    bias = bias.at[:, :, :lab.shape[-1]].set(lab + packed["lefi_b"])
    bias = jnp.broadcast_to(bias[None], (B, H, W, CPAD))
    return bias.reshape(B * H * W, CPAD)


# ----------------------------------------------------------------------------
# parameters (deterministic synthetic init, PyTorch layouts) and packing
# ----------------------------------------------------------------------------
def init_params(key):
    ks = jax.random.split(key, 10)
    s = 0.05
    return {
        "enc1_w": jax.random.normal(ks[0], (12, 3, 4, 4), jnp.float32) * s,
        "enc1_b": jax.random.normal(ks[1], (12,), jnp.float32) * s,
        "enc2_w": jax.random.normal(ks[2], (24, 12, 4, 4), jnp.float32) * s,
        "enc2_b": jax.random.normal(ks[3], (24,), jnp.float32) * s,
        "lefi_w": jax.random.normal(ks[4], (24, 34, 1, 1), jnp.float32) * s,
        "lefi_b": jax.random.normal(ks[5], (24,), jnp.float32) * s,
        "dec1_w": jax.random.normal(ks[6], (24, 12, 4, 4), jnp.float32) * s,  # ConvT(24->12)
        "dec1_b": jax.random.normal(ks[7], (12,), jnp.float32) * s,
        "dec2_w": jax.random.normal(ks[8], (12, 3, 4, 4), jnp.float32) * s,   # ConvT(12->3)
        "dec2_b": jax.random.normal(ks[9], (3,), jnp.float32) * s,
    }


def prepare_params(p):
    """One-time packing into padded bf16 GEMM operands (biases stay f32)."""
    return {
        "enc1_w": pack_conv_w(p["enc1_w"], cin_pad=8),      # K = 16*8 = 128
        "enc1_b": pack_bias(p["enc1_b"]),
        "enc2_w": pack_conv_w(p["enc2_w"], cin_pad=CPAD),   # K = 16*128
        "enc2_b": pack_bias(p["enc2_b"]),
        "lefi_w": (jnp.zeros((CPAD, CPAD), jnp.float32)
                   .at[:24, :24].set(p["lefi_w"][:, :24, 0, 0].T)
                   .astype(MXU_DTYPE)),
        "lefi_w_lab": p["lefi_w"][:, 24:, 0, 0].astype(jnp.float32),  # (24, 10)
        "lefi_b": p["lefi_b"].astype(jnp.float32),
        # decoder "x = 6 * x" folded into the dec1 weight matrix at pack time
        "dec1_w": pack_convT_w(p["dec1_w"], scale=6.0),
        "dec1_b": pack_convT_b(p["dec1_b"]),
        "dec2_w": pack_convT_w(p["dec2_w"]),
        "dec2_b": pack_convT_b(p["dec2_b"]),
    }


# ----------------------------------------------------------------------------
# full forward (matches Multi_target_Adversarial_Network.forward)
# ----------------------------------------------------------------------------
def multi_target_adversarial_network(packed, x, t):
    """x: (B, 3, H, W) f32 NCHW, t: target class -> (B, 3, H, W) f32 NCHW."""
    # NCHW -> channel-padded NHWC bf16, once.
    xh = jnp.transpose(x, (0, 2, 3, 1))
    xh = jnp.pad(xh, ((0, 0), (0, 0), (0, 0), (0, 8 - xh.shape[-1])))
    xh = xh.astype(MXU_DTYPE)

    # img_encoder
    h = conv2d_s2(xh, packed["enc1_w"], packed["enc1_b"], MXU_DTYPE)  # (B,H/2,W/2,128)
    h = conv2d_s2(h, packed["enc2_w"], packed["enc2_b"], MXU_DTYPE)   # (B,H/4,W/4,128)

    # label_encoder_feature_integration (1x1 conv; label branch -> per-row bias)
    B2, H2, W2 = h.shape[0], h.shape[1], h.shape[2]
    rb = lefi_row_bias(packed, B2, H2, W2, t)
    m = gemm_bias(h.reshape(B2 * H2 * W2, CPAD), packed["lefi_w"], rb, MXU_DTYPE)
    m = m.reshape(B2, H2, W2, CPAD)

    # img_decoder (6x scale already folded into dec1 weights)
    d = conv_transpose2d_s2(m, packed["dec1_w"], packed["dec1_b"], MXU_DTYPE)
    d = conv_transpose2d_s2(d, packed["dec2_w"], packed["dec2_b"], jnp.float32)

    # channel-padded NHWC -> NCHW, once.
    return jnp.transpose(d[..., :3], (0, 3, 1, 2))


# ----------------------------------------------------------------------------
# pure-JAX f32 reference (correctness check for the Pallas path)
# ----------------------------------------------------------------------------
def _conv_ref(x, w, b, stride, pad):
    out = jax.lax.conv_general_dilated(
        x, w, window_strides=(stride, stride),
        padding=[(pad, pad), (pad, pad)],
        dimension_numbers=("NCHW", "OIHW", "NCHW"),
        precision=jax.lax.Precision.HIGHEST)
    return out + b.reshape(1, -1, 1, 1)


def _convT_ref(x, w, b, stride, pad):
    kh = w.shape[2]
    w_conv = jnp.flip(w, (2, 3)).transpose(1, 0, 2, 3)
    out = jax.lax.conv_general_dilated(
        x, w_conv, window_strides=(1, 1),
        padding=[(kh - 1 - pad,) * 2, (kh - 1 - pad,) * 2],
        lhs_dilation=(stride, stride),
        dimension_numbers=("NCHW", "OIHW", "NCHW"),
        precision=jax.lax.Precision.HIGHEST)
    return out + b.reshape(1, -1, 1, 1)


def reference_forward(params, x, t):
    M = _conv_ref(x, params["enc1_w"], params["enc1_b"], 2, 1)
    M = _conv_ref(M, params["enc2_w"], params["enc2_b"], 2, 1)
    B, _, H, W = M.shape
    T = jnp.broadcast_to(label_map(H, W, t)[None], (B, NUM_CLASSES, H, W))
    Mcat = jnp.concatenate([M, T], axis=1)
    M_dot = _conv_ref(Mcat, params["lefi_w"], params["lefi_b"], 1, 0)
    y = _convT_ref(6.0 * M_dot, params["dec1_w"], params["dec1_b"], 2, 1)
    return _convT_ref(y, params["dec2_w"], params["dec2_b"], 2, 1)


if __name__ == "__main__":
    key = jax.random.PRNGKey(0)
    kp, kx = jax.random.split(key)
    params = init_params(kp)
    packed = prepare_params(params)

    B, H, W = 2, 16, 16
    x = jax.random.normal(kx, (B, 3, H, W), jnp.float32)
    t = 3  # target class
    # NOTE: the PyTorch module mutates a persistent numpy one-hot across calls
    # (self.target_label[t] = 1); a single forward with a fresh one-hot is
    # modeled here, matching the previous version.

    fwd = jax.jit(multi_target_adversarial_network)
    out = jax.block_until_ready(fwd(packed, x, t))
    assert out.shape == (B, 3, H, W), out.shape

    ref = jax.block_until_ready(reference_forward(params, x, t))
    # bf16 MXU operands / bf16 inter-layer activations give ~1e-3 absolute
    # deviation from the f32 HIGHEST reference at these magnitudes; 2e-2 gives
    # ample margin while still catching any structural/indexing bug.
    err = float(jnp.max(jnp.abs(out - ref)))
    assert jnp.allclose(out, ref, rtol=2e-2, atol=2e-2), err

    print("KERNEL_OK")
</pallas_src>

<mosaic_0001>
module attributes {stable_mosaic.version = 11 : i64} {
  func.func @_gemm_bias_kernel(%arg0: i32, %arg1: memref<64x128xbf16, #tpu.memory_space<vmem>>, %arg2: memref<128x128xbf16, #tpu.memory_space<vmem>>, %arg3: memref<1x128xf32, #tpu.memory_space<vmem>>, %arg4: memref<64x128xbf16, #tpu.memory_space<vmem>>) attributes {dimension_semantics = [#tpu.dimension_semantics<parallel>], iteration_bounds = array<i64: 2>, scalar_prefetch = 0 : i64, scratch_operands = 0 : i64, tpu.core_type = #tpu.core_type<tc>, window_params = [{transform_indices = @transform_0, window_bounds = array<i64: 64, 128>}, {pipeline_mode = #tpu.pipeline_mode<synchronous>, transform_indices = @transform_1, window_bounds = array<i64: 128, 128>}, {pipeline_mode = #tpu.pipeline_mode<synchronous>, transform_indices = @transform_2, window_bounds = array<i64: 1, 128>}, {transform_indices = @transform_3, window_bounds = array<i64: 64, 128>}]} {
    %c0 = arith.constant 0 : index
    %c0_0 = arith.constant 0 : index
    %0 = vector.load %arg1[%c0, %c0_0] : memref<64x128xbf16, #tpu.memory_space<vmem>>, vector<64x128xbf16>
    %c0_1 = arith.constant 0 : index
    %c0_2 = arith.constant 0 : index
    %1 = vector.load %arg2[%c0_1, %c0_2] : memref<128x128xbf16, #tpu.memory_space<vmem>>, vector<128x128xbf16>
    %cst = arith.constant dense<0.000000e+00> : vector<64x128xf32>
    %2 = tpu.matmul %0, %1, %cst {dimension_numbers = #tpu.dot_dimension_numbers<[1], [0], [0], [1], [0, 0, 1, 1], [], []>} : vector<64x128xbf16>, vector<128x128xbf16>, vector<64x128xf32> -> vector<64x128xf32>
    %c0_3 = arith.constant 0 : index
    %c0_4 = arith.constant 0 : index
    %3 = vector.load %arg3[%c0_3, %c0_4] : memref<1x128xf32, #tpu.memory_space<vmem>>, vector<1x128xf32>
    %4 = vector.broadcast %3 : vector<1x128xf32> to vector<64x128xf32>
    %5 = arith.addf %2, %4 : vector<64x128xf32>
    %6 = arith.truncf %5 : vector<64x128xf32> to vector<64x128xbf16>
    %c0_5 = arith.constant 0 : index
    %c0_6 = arith.constant 0 : index
    %7 = vector.load %arg4[%c0_5, %c0_6] : memref<64x128xbf16, #tpu.memory_space<vmem>>, vector<64x128xbf16>
    tpu.vector_store %arg4[%c0_5, %c0_6], %6 {strides = array<i32>} : memref<64x128xbf16, #tpu.memory_space<vmem>>, vector<64x128xbf16>,
    return
  }
  func.func @transform_0(%arg0: i32) -> (i32, i32) {
    %c0_i32 = arith.constant 0 : i32
    %c0_i32_0 = arith.constant 0 : i32
    return %arg0, %c0_i32 : i32, i32
  }
  func.func @transform_1(%arg0: i32) -> (i32, i32) {
    %c0_i32 = arith.constant 0 : i32
    %c0_i32_0 = arith.constant 0 : i32
    %c0_i32_1 = arith.constant 0 : i32
    return %c0_i32, %c0_i32_0 : i32, i32
  }
  func.func @transform_2(%arg0: i32) -> (i32, i32) {
    %c0_i32 = arith.constant 0 : i32
    %c0_i32_0 = arith.constant 0 : i32
    %c0_i32_1 = arith.constant 0 : i32
    return %c0_i32, %c0_i32_0 : i32, i32
  }
  func.func @transform_3(%arg0: i32) -> (i32, i32) {
    %c0_i32 = arith.constant 0 : i32
    %c0_i32_0 = arith.constant 0 : i32
    return %arg0, %c0_i32 : i32, i32
  }
}

module attributes {stable_mosaic.version = 11 : i64} {
  func.func @_gemm_bias_kernel(%arg0: i32, %arg1: memref<16x128xbf16, #tpu.memory_space<vmem>>, %arg2: memref<128x128xbf16, #tpu.memory_space<vmem>>, %arg3: memref<16x128xf32, #tpu.memory_space<vmem>>, %arg4: memref<16x128xbf16, #tpu.memory_space<vmem>>) attributes {dimension_semantics = [#tpu.dimension_semantics<parallel>], iteration_bounds = array<i64: 2>, scalar_prefetch = 0 : i64, scratch_operands = 0 : i64, tpu.core_type = #tpu.core_type<tc>, window_params = [{transform_indices = @transform_0, window_bounds = array<i64: 16, 128>}, {pipeline_mode = #tpu.pipeline_mode<synchronous>, transform_indices = @transform_1, window_bounds = array<i64: 128, 128>}, {transform_indices = @transform_2, window_bounds = array<i64: 16, 128>}, {transform_indices = @transform_3, window_bounds = array<i64: 16, 128>}]} {
    %c0 = arith.constant 0 : index
    %c0_0 = arith.constant 0 : index
    %0 = vector.load %arg1[%c0, %c0_0] : memref<16x128xbf16, #tpu.memory_space<vmem>>, vector<16x128xbf16>
    %c0_1 = arith.constant 0 : index
    %c0_2 = arith.constant 0 : index
    %1 = vector.load %arg2[%c0_1, %c0_2] : memref<128x128xbf16, #tpu.memory_space<vmem>>, vector<128x128xbf16>
    %cst = arith.constant dense<0.000000e+00> : vector<16x128xf32>
    %2 = tpu.matmul %0, %1, %cst {dimension_numbers = #tpu.dot_dimension_numbers<[1], [0], [0], [1], [0, 0, 1, 1], [], []>} : vector<16x128xbf16>, vector<128x128xbf16>, vector<16x128xf32> -> vector<16x128xf32>
    %c0_3 = arith.constant 0 : index
    %c0_4 = arith.constant 0 : index
    %3 = vector.load %arg3[%c0_3, %c0_4] : memref<16x128xf32, #tpu.memory_space<vmem>>, vector<16x128xf32>
    %4 = arith.addf %2, %3 : vector<16x128xf32>
    %5 = arith.truncf %4 : vector<16x128xf32> to vector<16x128xbf16>
    %c0_5 = arith.constant 0 : index
    %c0_6 = arith.constant 0 : index
    %6 = vector.load %arg4[%c0_5, %c0_6] : memref<16x128xbf16, #tpu.memory_space<vmem>>, vector<16x128xbf16>
    tpu.vector_store %arg4[%c0_5, %c0_6], %5 {strides = array<i32>} : memref<16x128xbf16, #tpu.memory_space<vmem>>, vector<16x128xbf16>,
    return
  }
  func.func @transform_0(%arg0: i32) -> (i32, i32) {
    %c0_i32 = arith.constant 0 : i32
    %c0_i32_0 = arith.constant 0 : i32
    return %arg0, %c0_i32 : i32, i32
  }
  func.func @transform_1(%arg0: i32) -> (i32, i32) {
    %c0_i32 = arith.constant 0 : i32
    %c0_i32_0 = arith.constant 0 : i32
    %c0_i32_1 = arith.constant 0 : i32
    return %c0_i32, %c0_i32_0 : i32, i32
  }
  func.func @transform_2(%arg0: i32) -> (i32, i32) {
    %c0_i32 = arith.constant 0 : i32
    %c0_i32_0 = arith.constant 0 : i32
    return %arg0, %c0_i32 : i32, i32
  }
  func.func @transform_3(%arg0: i32) -> (i32, i32) {
    %c0_i32 = arith.constant 0 : i32
    %c0_i32_0 = arith.constant 0 : i32
    return %arg0, %c0_i32 : i32, i32
  }
}

module attributes {stable_mosaic.version = 11 : i64} {
  func.func @_gemm_bias_kernel(%arg0: i32, %arg1: memref<16x2048xbf16, #tpu.memory_space<vmem>>, %arg2: memref<2048x128xbf16, #tpu.memory_space<vmem>>, %arg3: memref<1x128xf32, #tpu.memory_space<vmem>>, %arg4: memref<16x128xbf16, #tpu.memory_space<vmem>>) attributes {dimension_semantics = [#tpu.dimension_semantics<parallel>], iteration_bounds = array<i64: 2>, scalar_prefetch = 0 : i64, scratch_operands = 0 : i64, tpu.core_type = #tpu.core_type<tc>, window_params = [{transform_indices = @transform_0, window_bounds = array<i64: 16, 2048>}, {pipeline_mode = #tpu.pipeline_mode<synchronous>, transform_indices = @transform_1, window_bounds = array<i64: 2048, 128>}, {pipeline_mode = #tpu.pipeline_mode<synchronous>, transform_indices = @transform_2, window_bounds = array<i64: 1, 128>}, {transform_indices = @transform_3, window_bounds = array<i64: 16, 128>}]} {
    %c0 = arith.constant 0 : index
    %c0_0 = arith.constant 0 : index
    %0 = vector.load %arg1[%c0, %c0_0] : memref<16x2048xbf16, #tpu.memory_space<vmem>>, vector<16x2048xbf16>
    %c0_1 = arith.constant 0 : index
    %c0_2 = arith.constant 0 : index
    %1 = vector.load %arg2[%c0_1, %c0_2] : memref<2048x128xbf16, #tpu.memory_space<vmem>>, vector<2048x128xbf16>
    %cst = arith.constant dense<0.000000e+00> : vector<16x128xf32>
    %2 = tpu.matmul %0, %1, %cst {dimension_numbers = #tpu.dot_dimension_numbers<[1], [0], [0], [1], [0, 0, 1, 1], [], []>} : vector<16x2048xbf16>, vector<2048x128xbf16>, vector<16x128xf32> -> vector<16x128xf32>
    %c0_3 = arith.constant 0 : index
    %c0_4 = arith.constant 0 : index
    %3 = vector.load %arg3[%c0_3, %c0_4] : memref<1x128xf32, #tpu.memory_space<vmem>>, vector<1x128xf32>
    %4 = vector.broadcast %3 : vector<1x128xf32> to vector<16x128xf32>
    %5 = arith.addf %2, %4 : vector<16x128xf32>
    %6 = arith.truncf %5 : vector<16x128xf32> to vector<16x128xbf16>
    %c0_5 = arith.constant 0 : index
    %c0_6 = arith.constant 0 : index
    %7 = vector.load %arg4[%c0_5, %c0_6] : memref<16x128xbf16, #tpu.memory_space<vmem>>, vector<16x128xbf16>
    tpu.vector_store %arg4[%c0_5, %c0_6], %6 {strides = array<i32>} : memref<16x128xbf16, #tpu.memory_space<vmem>>, vector<16x128xbf16>,
    return
  }
  func.func @transform_0(%arg0: i32) -> (i32, i32) {
    %c0_i32 = arith.constant 0 : i32
    %c0_i32_0 = arith.constant 0 : i32
    return %arg0, %c0_i32 : i32, i32
  }
  func.func @transform_1(%arg0: i32) -> (i32, i32) {
    %c0_i32 = arith.constant 0 : i32
    %c0_i32_0 = arith.constant 0 : i32
    %c0_i32_1 = arith.constant 0 : i32
    return %c0_i32, %c0_i32_0 : i32, i32
  }
  func.func @transform_2(%arg0: i32) -> (i32, i32) {
    %c0_i32 = arith.constant 0 : i32
    %c0_i32_0 = arith.constant 0 : i32
    %c0_i32_1 = arith.constant 0 : i32
    return %c0_i32, %c0_i32_0 : i32, i32
  }
  func.func @transform_3(%arg0: i32) -> (i32, i32) {
    %c0_i32 = arith.constant 0 : i32
    %c0_i32_0 = arith.constant 0 : i32
    return %arg0, %c0_i32 : i32, i32
  }
}

module attributes {stable_mosaic.version = 11 : i64} {
  func.func @_gemm_bias_kernel(%arg0: i32, %arg1: memref<16x1152xbf16, #tpu.memory_space<vmem>>, %arg2: memref<1152x512xbf16, #tpu.memory_space<vmem>>, %arg3: memref<1x512xf32, #tpu.memory_space<vmem>>, %arg4: memref<16x512xbf16, #tpu.memory_space<vmem>>) attributes {dimension_semantics = [#tpu.dimension_semantics<parallel>], iteration_bounds = array<i64: 2>, scalar_prefetch = 0 : i64, scratch_operands = 0 : i64, tpu.core_type = #tpu.core_type<tc>, window_params = [{transform_indices = @transform_0, window_bounds = array<i64: 16, 1152>}, {pipeline_mode = #tpu.pipeline_mode<synchronous>, transform_indices = @transform_1, window_bounds = array<i64: 1152, 512>}, {pipeline_mode = #tpu.pipeline_mode<synchronous>, transform_indices = @transform_2, window_bounds = array<i64: 1, 512>}, {transform_indices = @transform_3, window_bounds = array<i64: 16, 512>}]} {
    %c0 = arith.constant 0 : index
    %c0_0 = arith.constant 0 : index
    %0 = vector.load %arg1[%c0, %c0_0] : memref<16x1152xbf16, #tpu.memory_space<vmem>>, vector<16x1152xbf16>
    %c0_1 = arith.constant 0 : index
    %c0_2 = arith.constant 0 : index
    %1 = vector.load %arg2[%c0_1, %c0_2] : memref<1152x512xbf16, #tpu.memory_space<vmem>>, vector<1152x512xbf16>
    %cst = arith.constant dense<0.000000e+00> : vector<16x512xf32>
    %2 = tpu.matmul %0, %1, %cst {dimension_numbers = #tpu.dot_dimension_numbers<[1], [0], [0], [1], [0, 0, 1, 1], [], []>} : vector<16x1152xbf16>, vector<1152x512xbf16>, vector<16x512xf32> -> vector<16x512xf32>
    %c0_3 = arith.constant 0 : index
    %c0_4 = arith.constant 0 : index
    %3 = vector.load %arg3[%c0_3, %c0_4] : memref<1x512xf32, #tpu.memory_space<vmem>>, vector<1x512xf32>
    %4 = vector.broadcast %3 : vector<1x512xf32> to vector<16x512xf32>
    %5 = arith.addf %2, %4 : vector<16x512xf32>
    %6 = arith.truncf %5 : vector<16x512xf32> to vector<16x512xbf16>
    %c0_5 = arith.constant 0 : index
    %c0_6 = arith.constant 0 : index
    %7 = vector.load %arg4[%c0_5, %c0_6] : memref<16x512xbf16, #tpu.memory_space<vmem>>, vector<16x512xbf16>
    tpu.vector_store %arg4[%c0_5, %c0_6], %6 {strides = array<i32>} : memref<16x512xbf16, #tpu.memory_space<vmem>>, vector<16x512xbf16>,
    return
  }
  func.func @transform_0(%arg0: i32) -> (i32, i32) {
    %c0_i32 = arith.constant 0 : i32
    %c0_i32_0 = arith.constant 0 : i32
    return %arg0, %c0_i32 : i32, i32
  }
  func.func @transform_1(%arg0: i32) -> (i32, i32) {
    %c0_i32 = arith.constant 0 : i32
    %c0_i32_0 = arith.constant 0 : i32
    %c0_i32_1 = arith.constant 0 : i32
    return %c0_i32, %c0_i32_0 : i32, i32
  }
  func.func @transform_2(%arg0: i32) -> (i32, i32) {
    %c0_i32 = arith.constant 0 : i32
    %c0_i32_0 = arith.constant 0 : i32
    %c0_i32_1 = arith.constant 0 : i32
    return %c0_i32, %c0_i32_0 : i32, i32
  }
  func.func @transform_3(%arg0: i32) -> (i32, i32) {
    %c0_i32 = arith.constant 0 : i32
    %c0_i32_0 = arith.constant 0 : i32
    return %arg0, %c0_i32 : i32, i32
  }
}

module attributes {stable_mosaic.version = 11 : i64} {
  func.func @_gemm_bias_kernel(%arg0: i32, %arg1: memref<64x1152xbf16, #tpu.memory_space<vmem>>, %arg2: memref<1152x512xbf16, #tpu.memory_space<vmem>>, %arg3: memref<1x512xf32, #tpu.memory_space<vmem>>, %arg4: memref<64x512xf32, #tpu.memory_space<vmem>>) attributes {dimension_semantics = [#tpu.dimension_semantics<parallel>], iteration_bounds = array<i64: 2>, scalar_prefetch = 0 : i64, scratch_operands = 0 : i64, tpu.core_type = #tpu.core_type<tc>, window_params = [{transform_indices = @transform_0, window_bounds = array<i64: 64, 1152>}, {pipeline_mode = #tpu.pipeline_mode<synchronous>, transform_indices = @transform_1, window_bounds = array<i64: 1152, 512>}, {pipeline_mode = #tpu.pipeline_mode<synchronous>, transform_indices = @transform_2, window_bounds = array<i64: 1, 512>}, {transform_indices = @transform_3, window_bounds = array<i64: 64, 512>}]} {
    %c0 = arith.constant 0 : index
    %c0_0 = arith.constant 0 : index
    %0 = vector.load %arg1[%c0, %c0_0] : memref<64x1152xbf16, #tpu.memory_space<vmem>>, vector<64x1152xbf16>
    %c0_1 = arith.constant 0 : index
    %c0_2 = arith.constant 0 : index
    %1 = vector.load %arg2[%c0_1, %c0_2] : memref<1152x512xbf16, #tpu.memory_space<vmem>>, vector<1152x512xbf16>
    %cst = arith.constant dense<0.000000e+00> : vector<64x512xf32>
    %2 = tpu.matmul %0, %1, %cst {dimension_numbers = #tpu.dot_dimension_numbers<[1], [0], [0], [1], [0, 0, 1, 1], [], []>} : vector<64x1152xbf16>, vector<1152x512xbf16>, vector<64x512xf32> -> vector<64x512xf32>
    %c0_3 = arith.constant 0 : index
    %c0_4 = arith.constant 0 : index
    %3 = vector.load %arg3[%c0_3, %c0_4] : memref<1x512xf32, #tpu.memory_space<vmem>>, vector<1x512xf32>
    %4 = vector.broadcast %3 : vector<1x512xf32> to vector<64x512xf32>
    %5 = arith.addf %2, %4 : vector<64x512xf32>
    %c0_5 = arith.constant 0 : index
    %c0_6 = arith.constant 0 : index
    %6 = vector.load %arg4[%c0_5, %c0_6] : memref<64x512xf32, #tpu.memory_space<vmem>>, vector<64x512xf32>
    tpu.vector_store %arg4[%c0_5, %c0_6], %5 {strides = array<i32>} : memref<64x512xf32, #tpu.memory_space<vmem>>, vector<64x512xf32>,
    return
  }
  func.func @transform_0(%arg0: i32) -> (i32, i32) {
    %c0_i32 = arith.constant 0 : i32
    %c0_i32_0 = arith.constant 0 : i32
    return %arg0, %c0_i32 : i32, i32
  }
  func.func @transform_1(%arg0: i32) -> (i32, i32) {
    %c0_i32 = arith.constant 0 : i32
    %c0_i32_0 = arith.constant 0 : i32
    %c0_i32_1 = arith.constant 0 : i32
    return %c0_i32, %c0_i32_0 : i32, i32
  }
  func.func @transform_2(%arg0: i32) -> (i32, i32) {
    %c0_i32 = arith.constant 0 : i32
    %c0_i32_0 = arith.constant 0 : i32
    %c0_i32_1 = arith.constant 0 : i32
    return %c0_i32, %c0_i32_0 : i32, i32
  }
  func.func @transform_3(%arg0: i32) -> (i32, i32) {
    %c0_i32 = arith.constant 0 : i32
    %c0_i32_0 = arith.constant 0 : i32
    return %arg0, %c0_i32 : i32, i32
  }
}

</mosaic_0001>

<bundles_post_ra>
// kernel: multi_target_adversarial_network.5
= control target key start
LH: loop header
LB: loop body
LE: loop exit
PB: predicated region body
PF: predicated region fallthrough
CT: control target
= control target key end

     0   :  { %s602_s12 = smov 0   ;;  %s659_s0 = inlined_call_operand.vmem [shape: bf16[128,128], index: 0, kind: input, shape index: {}]   ;;  %s660_s1 = inlined_call_operand.vmem [shape: bf16[128,128], index: 1, kind: input, shape index: {}]   ;;  %s661_s2 = inlined_call_operand.vmem [shape: f32[1,128], index: 2, kind: input, shape index: {}]   ;;  %s662_s3 = inlined_call_operand.vmem [shape: bf16[128,128], index: 3, kind: output, shape index: {}]  }
   0x1 LB: > { %s439_s13 = sadd.s32 4294967295, %s580_s12   ;;  %p443_p0 = scmp.ge.s32.totalorder %s580_s12, 1  ;;  %s580_s12 = sphi %s602_s12, %s13_s12  }
   0x2   : > { %p138_p1 = scmp.lt.s32.totalorder %s580_s12, 3 }
   0x4   : > { %p139_p2 = pnand %p443_p0, %p138_p1 }
   0x5   : > { %v562_v0 = vld [vmem:[%s660_s1] sm:$0xff] (!%p139_p2)   ;;  %s444_s16 = sshll.u32 (!%p139_p2), %s439_s13, 3  ;;  %v563_v1 = vld [vmem:[%s660_s1 + $0x8] sm:$0xff] (!%p139_p2)   ;;  %v564_v2 = vld [vmem:[%s660_s1 + $0x10] sm:$0xff] (!%p139_p2)  }
   0x6   : > { %142 = sbr.rel (%p139_p2) target bundleno = 258 (0x102), region = 32  ;;  %p163_p3 = scmp.lt.s32.totalorder (!%p139_p2), %s444_s16, 15  ;;  %514 = vmatprep.subr.bf16.mxu0 (!%p139_p2), %v562_v0  ;;  %538 = vmatprep.subr.bf16.mxu1 (!%p139_p2), %v562_v0  ;;  %v565_v3 = vld [vmem:[%s660_s1 + $0x18] sm:$0xff] (!%p139_p2)   ;;  %v566_v6 = vld [vmem:[%s660_s1 + $0x20] sm:$0xff] (!%p139_p2)   ;;  %v567_v7 = vld [vmem:[%s660_s1 + $0x28] sm:$0xff] (!%p139_p2)  }
   0x7   : > { %515 = vmatpush3.bf16.msra.mxu0 (!%p139_p2), %v562_v0  ;;  %546 = vmatpush3.bf16.msra.mxu1 (!%p139_p2), %v562_v0  ;;  %v568_v8 = vld [vmem:[%s660_s1 + $0x30] sm:$0xff] (!%p139_p2)   ;;  %v569_v9 = vld [vmem:[%s660_s1 + $0x38] sm:$0xff] (!%p139_p2)   ;;  %v448_v13 = vld [vmem:[%s661_s2] ss:$0 sm:$0xff] (!%p139_p2) }
   0x8   : > { %516 = vmatprep.subr.bf16.mxu0 (!%p139_p2), %v563_v1  ;;  %539 = vmatprep.subr.bf16.mxu1 (!%p139_p2), %v563_v1 }
   0xb   : > { %517 = vmatpush3.bf16.msra.mxu0 (!%p139_p2), %v563_v1  ;;  %547 = vmatpush3.bf16.msra.mxu1 (!%p139_p2), %v563_v1 }
   0xc   : > { %518 = vmatprep.subr.bf16.mxu0 (!%p139_p2), %v564_v2  ;;  %540 = vmatprep.subr.bf16.mxu1 (!%p139_p2), %v564_v2 }
   0xd   : > { %s664_s16 = smov (!%p163_p3, %s444_s16), 15 }
   0xe   : > { %s445_s21 = sshll.u32 %s664_s16, 2 }
   0xf   : > { %s627_s24 = scalar_lea.vmem %s659_s0, %s445_s21  ;;  %519 = vmatpush3.bf16.msra.mxu0 %v564_v2  ;;  %548 = vmatpush3.bf16.msra.mxu1 %v564_v2  ;;  %s172_s13 = scalar_lea.vmem %s662_s3, %s445_s21 }
  0x10   : > { %v570_v4 = vld [vmem:[%s627_s24] sm:$0xff]   ;;  %v571_v5 = vld [vmem:[%s627_s24 + $0x10] sm:$0xff]   ;;  %520 = vmatprep.subr.bf16.mxu0 %v565_v3  ;;  %541 = vmatprep.subr.bf16.mxu1 %v565_v3  ;;  %v572_v10 = vld [vmem:[%s627_s24 + $0x8] sm:$0xff]  }
  0x11   : > { %530 = vmatprep.mubr.bf16.mxu0 %v570_v4  ;;  %534 = vmatprep.mubr.bf16.mxu1 %v571_v5  ;;  %v573_v11 = vld [vmem:[%s627_s24 + $0x18] sm:$0xff]  }
  0x13   : > { %521 = vmatpush3.bf16.msra.mxu0 %v565_v3  ;;  %549 = vmatpush3.bf16.msra.mxu1 %v565_v3 }
  0x14   : > { %522 = vmatprep.subr.bf16.mxu0 %v566_v6  ;;  %542 = vmatprep.subr.bf16.mxu1 %v566_v6 }
  0x17   : > { %523 = vmatpush3.bf16.msra.mxu0 %v566_v6  ;;  %550 = vmatpush3.bf16.msra.mxu1 %v566_v6 }
  0x18   : > { %524 = vmatprep.subr.bf16.mxu0 %v567_v7  ;;  %543 = vmatprep.subr.bf16.mxu1 %v567_v7 }
  0x1b   : > { %525 = vmatpush3.bf16.msra.mxu0 %v567_v7  ;;  %551 = vmatpush3.bf16.msra.mxu1 %v567_v7 }
  0x1c   : > { %526 = vmatprep.subr.bf16.mxu0 %v568_v8  ;;  %544 = vmatprep.subr.bf16.mxu1 %v568_v8 }
  0x1f   : > { %527 = vmatpush3.bf16.msra.mxu0 %v568_v8  ;;  %552 = vmatpush3.bf16.msra.mxu1 %v568_v8 }
  0x20   : > { %528 = vmatprep.subr.bf16.mxu0 %v569_v9  ;;  %545 = vmatprep.subr.bf16.mxu1 %v569_v9 }
  0x23   : > { %529 = vmatpush3.bf16.msra.mxu0 %v569_v9  ;;  %553 = vmatpush3.bf16.msra.mxu1 %v569_v9 }
  0x26   : > { %531 = vmatmul.mubr.bf16.vlgmr.msra.gmra.mrb[0].mxu0 %v572_v10  ;;  %535 = vmatmul.mubr.bf16.vlgmr.msra.gmra.mrb[0].mxu1 %v573_v11 }
  0xf9   : > { %v532_v12 = vpop.f32.mrb[0].mxu0  ;;  %v536_v14 = vpop.f32.mrb[0].mxu1 }
  0xfa   : > { %v312_v15 = vpop.f32.mrb[1].mxu0  ;;  %v328_v16 = vpop.f32.mrb[1].mxu1  ;;  %v321_v19 = vadd.f32 %v532_v12, %v448_v13  ;;  %v337_v20 = vadd.f32 %v536_v14, %v448_v13 }
  0xfb   : > { %v533_v17 = vpop.f32.mrb[2].mxu0  ;;  %v537_v18 = vpop.f32.mrb[2].mxu1  ;;  %v313_v25 = vadd.f32 %v448_v13, %v312_v15  ;;  %v329_v26 = vadd.f32 %v448_v13, %v328_v16 }
  0xfc   : > { %v324_v21 = vadd.f32 %v533_v17, %v448_v13  ;;  %v340_v22 = vadd.f32 %v537_v18, %v448_v13  ;;  %v315_v23 = vpop.f32.mrb[3].mxu0  ;;  %v331_v24 = vpop.f32.mrb[3].mxu1 }
  0xfd   : > { %v316_v27 = vadd.f32 %v448_v13, %v315_v23  ;;  %v332_v28 = vadd.f32 %v448_v13, %v331_v24 }
  0xfe   : > { %v487_v29 = vpack.c.bf16 %v324_v21, %v321_v19  ;;  %v497_v30 = vpack.c.bf16 %v340_v22, %v337_v20 }
  0xff   : > { %v482_v31 = vpack.c.bf16 %v316_v27, %v313_v25  ;;  %v492_v32 = vpack.c.bf16 %v332_v28, %v329_v26 }
 0x100   : > { %499 = vst [vmem:[%s172_s13 + $0x8] sm:$0xff] %v487_v29   ;;  %501 = vst [vmem:[%s172_s13 + $0x18] sm:$0xff] %v497_v30  }
 0x101   : > { %483 = vst [vmem:[%s172_s13] sm:$0xff] %v482_v31   ;;  %500 = vst [vmem:[%s172_s13 + $0x10] sm:$0xff] %v492_v32  }
 0x102 PF: > { %s13_s12 = sadd.s32 1, %s580_s12  }
 0x103   : > { %p10_p4 = scmp.ge.s32.totalorder %s13_s12, 4  }
 0x105   :  { %12 = sbr.rel (!%p10_p4) target bundleno = 1 (0x1), region = 62 }

// kernel: multi_target_adversarial_network.7
= control target key start
LH: loop header
LB: loop body
LE: loop exit
PB: predicated region body
PF: predicated region fallthrough
CT: control target
= control target key end

     0   :  { %s499_s12 = smov 0   ;;  %s551_s0 = inlined_call_operand.vmem [shape: bf16[32,128], index: 0, kind: input, shape index: {}]   ;;  %s552_s1 = inlined_call_operand.vmem [shape: bf16[128,128], index: 1, kind: input, shape index: {}]   ;;  %s553_s2 = inlined_call_operand.vmem [shape: f32[32,128], index: 2, kind: input, shape index: {}]   ;;  %s554_s3 = inlined_call_operand.vmem [shape: bf16[32,128], index: 3, kind: output, shape index: {}]  }
   0x1 LB: > { %s390_s13 = sadd.s32 4294967295, %s475_s12   ;;  %p394_p0 = scmp.ge.s32.totalorder %s475_s12, 1  ;;  %s475_s12 = sphi %s499_s12, %s13_s12  }
   0x2   : > { %p149_p1 = scmp.lt.s32.totalorder %s475_s12, 3 }
   0x4   : > { %p150_p2 = pnand %p394_p0, %p149_p1 }
   0x5   : > { %v460_v0 = vld [vmem:[%s552_s1] sm:$0xff] (!%p150_p2)   ;;  %v477_v1 = vmov (!%p150_p2), 0.0   ;;  %v461_v2 = vld [vmem:[%s552_s1 + $0x8] sm:$0xff] (!%p150_p2)   ;;  %vm478_vm0 = vmmov (!%p150_p2), 0   ;;  %s395_s18 = sshll.u32 (!%p150_p2), %s390_s13, 1  ;;  %v462_v3 = vld [vmem:[%s552_s1 + $0x10] sm:$0xff] (!%p150_p2)  }
   0x6   : > { %153 = sbr.rel (%p150_p2) target bundleno = 257 (0x101), region = 32  ;;  %430 = vmatprep.subr.bf16.mxu0 (!%p150_p2), %v477_v1  ;;  %446 = vmatprep.mubr.msk.bf16.mxu0 (!%p150_p2), %vm478_vm0, %v477_v1  ;;  %p179_p3 = scmp.lt.s32.totalorder (!%p150_p2), %s395_s18, 3  ;;  %v463_v4 = vld [vmem:[%s552_s1 + $0x18] sm:$0xff] (!%p150_p2)   ;;  %v464_v5 = vld [vmem:[%s552_s1 + $0x20] sm:$0xff] (!%p150_p2)   ;;  %v465_v6 = vld [vmem:[%s552_s1 + $0x28] sm:$0xff] (!%p150_p2)  }
   0x7   : > { %431 = vmatpush3.bf16.msra.mxu0 (!%p150_p2), %v460_v0  ;;  %v466_v7 = vld [vmem:[%s552_s1 + $0x30] sm:$0xff] (!%p150_p2)   ;;  %v467_v8 = vld [vmem:[%s552_s1 + $0x38] sm:$0xff] (!%p150_p2)  }
   0x8   : > { %432 = vmatprep.subr.bf16.mxu0 (!%p150_p2), %v477_v1 }
   0xb   : > { %433 = vmatpush3.bf16.msra.mxu0 (!%p150_p2), %v461_v2 }
   0xc   : > { %434 = vmatprep.subr.bf16.mxu0 (!%p150_p2), %v477_v1 }
   0xd   : > { %s556_s18 = smov (!%p179_p3, %s395_s18), 3 }
   0xe   : > { %s396_s21 = sshll.u32 %s556_s18, 2  ;;  %s398_s8 = sshll.u32 %s556_s18, 3 }
   0xf   : > { %s182_s24 = scalar_lea.vmem %s551_s0, %s396_s21  ;;  %435 = vmatpush3.bf16.msra.mxu0 %v462_v3  ;;  %s188_s11 = scalar_lea.vmem %s553_s2, %s398_s8 }
  0x10   : > { %436 = vmatprep.subr.bf16.mxu0 %v477_v1  ;;  %v468_v9 = vld [vmem:[%s182_s24] sm:$0xff]   ;;  %v216_v12 = vld [vmem:[%s188_s11 + $0x8] sm:$0xff]  ;;  %s194_s15 = scalar_lea.vmem %s554_s3, %s396_s21 }
  0x11   : > { %v215_v10 = vld [vmem:[%s188_s11] sm:$0xff] }
  0x13   : > { %437 = vmatpush3.bf16.msra.mxu0 %v463_v4 }
  0x14   : > { %438 = vmatprep.subr.bf16.mxu0 %v477_v1 }
  0x17   : > { %439 = vmatpush3.bf16.msra.mxu0 %v464_v5 }
  0x18   : > { %440 = vmatprep.subr.bf16.mxu0 %v477_v1 }
  0x1b   : > { %441 = vmatpush3.bf16.msra.mxu0 %v465_v6 }
  0x1c   : > { %442 = vmatprep.subr.bf16.mxu0 %v477_v1 }
  0x1f   : > { %443 = vmatpush3.bf16.msra.mxu0 %v466_v7 }
  0x20   : > { %444 = vmatprep.subr.bf16.mxu0 %v477_v1 }
  0x23   : > { %445 = vmatpush3.bf16.msra.mxu0 %v467_v8 }
  0x26   : > { %447 = vmatmul.mubr.bf16.vlgmr.msra.gmra.mrb[0].mxu0 %v468_v9 }
  0xf9   : > { %v305_v11 = vpop.f32.mrb[0].mxu0 }
  0xfa   : > { %v306_v13 = vadd.f32 %v305_v11, %v215_v10  ;;  %v448_v14 = vpop.f32.mrb[1].mxu0 }
  0xfb   : > { %v308_v15 = vpop.f32.mrb[2].mxu0 }
  0xfc   : > { %v309_v16 = vadd.f32 %v308_v15, %v216_v12  ;;  %v449_v17 = vpop.f32.mrb[3].mxu0 }
  0xfe   : > { %v419_v18 = vpack.c.bf16 %v309_v16, %v306_v13 }
 0x100   : > { %420 = vst [vmem:[%s194_s15] sm:$0xff] %v419_v18  }
 0x101 PF: > { %s13_s12 = sadd.s32 1, %s475_s12  }
 0x102   : > { %p10_p4 = scmp.ge.s32.totalorder %s13_s12, 4  }
 0x104   :  { %12 = sbr.rel (!%p10_p4) target bundleno = 1 (0x1), region = 65 }

// kernel: multi_target_adversarial_network.6
= control target key start
LH: loop header
LB: loop body
LE: loop exit
PB: predicated region body
PF: predicated region fallthrough
CT: control target
= control target key end

     0   :  { %s2206_s12 = smov 0   ;;  %s2634_s0 = inlined_call_operand.vmem [shape: bf16[32,2048], index: 0, kind: input, shape index: {}]   ;;  %s2635_s1 = inlined_call_operand.vmem [shape: bf16[2048,128], index: 1, kind: input, shape index: {}]   ;;  %s2636_s2 = inlined_call_operand.vmem [shape: f32[1,128], index: 2, kind: input, shape index: {}]   ;;  %s2637_s3 = inlined_call_operand.vmem [shape: bf16[32,128], index: 3, kind: output, shape index: {}]  }
   0x1 LB: > { %s1699_s13 = sadd.s32 4294967295, %s2184_s12   ;;  %p1703_p0 = scmp.ge.s32.totalorder %s2184_s12, 1  ;;  %s2184_s12 = sphi %s2206_s12, %s13_s12  }
   0x2   : > { %p139_p1 = scmp.lt.s32.totalorder %s2184_s12, 3 }
   0x4   : > { %p140_p2 = pnand %p1703_p0, %p139_p1 }
   0x5   : > { %v2050_v0 = vld [vmem:[%s2635_s1 + $0x40] sm:$0xff] (!%p140_p2)   ;;  %v2054_v4 = vld [vmem:[%s2635_s1 + $0x48] sm:$0xff] (!%p140_p2)   ;;  %v2058_v8 = vld [vmem:[%s2635_s1 + $0x50] sm:$0xff] (!%p140_p2)   ;;  %s1704_s21 = sshll.u32 (!%p140_p2), %s1699_s13, 1 }
   0x6   : > { %143 = sbr.rel (%p140_p2) target bundleno = 359 (0x167), region = 32  ;;  %v2051_v1 = vld [vmem:[%s2635_s1 + $0xc0] sm:$0xff] (!%p140_p2)   ;;  %1866 = vmatprep.subr.bf16.mxu0 (!%p140_p2), %v2050_v0  ;;  %v2055_v5 = vld [vmem:[%s2635_s1 + $0xc8] sm:$0xff] (!%p140_p2)   ;;  %v2059_v9 = vld [vmem:[%s2635_s1 + $0xd0] sm:$0xff] (!%p140_p2)   ;;  %p165_p3 = scmp.lt.s32.totalorder (!%p140_p2), %s1704_s21, 3 }
   0x7   : > { %v2052_v2 = vld [vmem:[%s2635_s1] sm:$0xff] (!%p140_p2)   ;;  %1888 = vmatprep.subr.bf16.mxu1 (!%p140_p2), %v2051_v1  ;;  %v2056_v6 = vld [vmem:[%s2635_s1 + $0x8] sm:$0xff] (!%p140_p2)   ;;  %v2060_v10 = vld [vmem:[%s2635_s1 + $0x10] sm:$0xff] (!%p140_p2)  }
   0x8   : > { %v2053_v3 = vld [vmem:[%s2635_s1 + $0x80] sm:$0xff] (!%p140_p2)   ;;  %1867 = vmatpush3.bf16.msra.mxu0 (!%p140_p2), %v2052_v2  ;;  %v2057_v7 = vld [vmem:[%s2635_s1 + $0x88] sm:$0xff] (!%p140_p2)   ;;  %v2061_v11 = vld [vmem:[%s2635_s1 + $0x90] sm:$0xff] (!%p140_p2)  }
   0x9   : > { %1889 = vmatpush3.bf16.msra.mxu1 (!%p140_p2), %v2053_v3  ;;  %1868 = vmatprep.subr.bf16.mxu0 (!%p140_p2), %v2054_v4  ;;  %v2062_v12 = vld [vmem:[%s2635_s1 + $0x58] sm:$0xff] (!%p140_p2)   ;;  %v2066_v16 = vld [vmem:[%s2635_s1 + $0x60] sm:$0xff] (!%p140_p2)   ;;  %v2070_v20 = vld [vmem:[%s2635_s1 + $0x68] sm:$0xff] (!%p140_p2)  }
   0xa   : > { %1890 = vmatprep.subr.bf16.mxu1 (!%p140_p2), %v2055_v5  ;;  %v2063_v13 = vld [vmem:[%s2635_s1 + $0xd8] sm:$0xff] (!%p140_p2)   ;;  %v2067_v17 = vld [vmem:[%s2635_s1 + $0xe0] sm:$0xff] (!%p140_p2)   ;;  %v2071_v21 = vld [vmem:[%s2635_s1 + $0xe8] sm:$0xff] (!%p140_p2)  }
   0xb   : > { %v2064_v14 = vld [vmem:[%s2635_s1 + $0x18] sm:$0xff] (!%p140_p2)   ;;  %v2068_v18 = vld [vmem:[%s2635_s1 + $0x20] sm:$0xff] (!%p140_p2)   ;;  %v2072_v22 = vld [vmem:[%s2635_s1 + $0x28] sm:$0xff] (!%p140_p2)  }
   0xc   : > { %1869 = vmatpush3.bf16.msra.mxu0 (!%p140_p2), %v2056_v6  ;;  %v2065_v15 = vld [vmem:[%s2635_s1 + $0x98] sm:$0xff] (!%p140_p2)   ;;  %v2069_v19 = vld [vmem:[%s2635_s1 + $0xa0] sm:$0xff] (!%p140_p2)   ;;  %v2073_v23 = vld [vmem:[%s2635_s1 + $0xa8] sm:$0xff] (!%p140_p2)  }
   0xd   : > { %1891 = vmatpush3.bf16.msra.mxu1 %v2057_v7  ;;  %1870 = vmatprep.subr.bf16.mxu0 %v2058_v8  ;;  %s2639_s21 = smov (!%p165_p3, %s1704_s21), 3  ;;  %v2074_v24 = vld [vmem:[%s2635_s1 + $0x70] sm:$0xff]   ;;  %v2078_v28 = vld [vmem:[%s2635_s1 + $0x78] sm:$0xff]   ;;  %v2082_v40 = vld [vmem:[%s2635_s1 + $0x140] sm:$0xff]  }
   0xe   : > { %1892 = vmatprep.subr.bf16.mxu1 %v2059_v9  ;;  %v2075_v25 = vld [vmem:[%s2635_s1 + $0xf0] sm:$0xff]   ;;  %s1858_s18 = sshll.u32 %s2639_s21, 6  ;;  %v2079_v29 = vld [vmem:[%s2635_s1 + $0xf8] sm:$0xff]   ;;  %v2083_v41 = vld [vmem:[%s2635_s1 + $0x1c0] sm:$0xff]  }
   0xf   : > { %v2076_v26 = vld [vmem:[%s2635_s1 + $0x30] sm:$0xff]   ;;  %s2312_s28 = scalar_lea.vmem %s2634_s0, %s1858_s18  ;;  %v2080_v30 = vld [vmem:[%s2635_s1 + $0x38] sm:$0xff]   ;;  %v2084_v42 = vld [vmem:[%s2635_s1 + $0x100] sm:$0xff]  }
  0x10   : > { %1871 = vmatpush3.bf16.msra.mxu0 %v2060_v10  ;;  %v2077_v27 = vld [vmem:[%s2635_s1 + $0xb0] sm:$0xff]   ;;  %v2081_v31 = vld [vmem:[%s2635_s1 + $0xb8] sm:$0xff]   ;;  %v178_v32 = vld [vmem:[%s2312_s28] sm:$0xff] }
  0x11   : > { %1893 = vmatpush3.bf16.msra.mxu1 %v2061_v11  ;;  %1872 = vmatprep.subr.bf16.mxu0 %v2062_v12  ;;  %v186_v33 = vld [vmem:[%s2312_s28 + $0x40] sm:$0xff]  ;;  %v179_v34 = vld [vmem:[%s2312_s28 + $0x8] sm:$0xff]  ;;  %v2090_v48 = vld [vmem:[%s2635_s1 + $0x150] sm:$0xff]  }
  0x12   : > { %1894 = vmatprep.subr.bf16.mxu1 %v2063_v13  ;;  %v1710_v35 = vcombine.low %v178_v32, %v186_v33  ;;  %v1711_v36 = vcombine.high %v178_v32, %v186_v33  ;;  %v187_v37 = vld [vmem:[%s2312_s28 + $0x48] sm:$0xff]  ;;  %v2085_v43 = vld [vmem:[%s2635_s1 + $0x180] sm:$0xff]   ;;  %v2091_v49 = vld [vmem:[%s2635_s1 + $0x1d0] sm:$0xff]  }
  0x13   : > { %v1712_v38 = vcombine.low %v179_v34, %v187_v37  ;;  %v1713_v39 = vcombine.high %v179_v34, %v187_v37  ;;  %v2086_v44 = vld [vmem:[%s2635_s1 + $0x148] sm:$0xff]   ;;  %v2092_v50 = vld [vmem:[%s2635_s1 + $0x110] sm:$0xff]   ;;  %v2094_v52 = vld [vmem:[%s2635_s1 + $0x158] sm:$0xff]  }
  0x14   : > { %1873 = vmatpush3.bf16.msra.mxu0 %v2064_v14  ;;  %1337 = vmatprep.mubr.bf16.mxu0 %v1711_v36  ;;  %v2087_v45 = vld [vmem:[%s2635_s1 + $0x1c8] sm:$0xff]   ;;  %v2093_v51 = vld [vmem:[%s2635_s1 + $0x190] sm:$0xff]   ;;  %v2095_v53 = vld [vmem:[%s2635_s1 + $0x1d8] sm:$0xff]  }
  0x15   : > { %1895 = vmatpush3.bf16.msra.mxu1 %v2065_v15  ;;  %1874 = vmatprep.subr.bf16.mxu0 %v2066_v16  ;;  %v2088_v46 = vld [vmem:[%s2635_s1 + $0x108] sm:$0xff]   ;;  %v2096_v54 = vld [vmem:[%s2635_s1 + $0x118] sm:$0xff]   ;;  %v2098_v56 = vld [vmem:[%s2635_s1 + $0x160] sm:$0xff]  }
  0x16   : > { %1896 = vmatprep.subr.bf16.mxu1 %v2067_v17  ;;  %1378 = vmatprep.mubr.bf16.mxu1 %v1713_v39  ;;  %v2089_v47 = vld [vmem:[%s2635_s1 + $0x188] sm:$0xff]   ;;  %v2097_v55 = vld [vmem:[%s2635_s1 + $0x198] sm:$0xff]   ;;  %v2099_v57 = vld [vmem:[%s2635_s1 + $0x1e0] sm:$0xff]  }
  0x17   : > { %v2100_v58 = vld [vmem:[%s2635_s1 + $0x120] sm:$0xff]   ;;  %v2102_v60 = vld [vmem:[%s2635_s1 + $0x168] sm:$0xff]   ;;  %v2106_v0 = vld [vmem:[%s2635_s1 + $0x170] sm:$0xff]  }
  0x18   : > { %1875 = vmatpush3.bf16.msra.mxu0 %v2068_v18  ;;  %v2101_v59 = vld [vmem:[%s2635_s1 + $0x1a0] sm:$0xff]   ;;  %v2103_v61 = vld [vmem:[%s2635_s1 + $0x1e8] sm:$0xff]   ;;  %v2107_v1 = vld [vmem:[%s2635_s1 + $0x1f0] sm:$0xff]  }
  0x19   : > { %1897 = vmatpush3.bf16.msra.mxu1 %v2069_v19  ;;  %1876 = vmatprep.subr.bf16.mxu0 %v2070_v20  ;;  %v2104_v62 = vld [vmem:[%s2635_s1 + $0x128] sm:$0xff]   ;;  %v2108_v2 = vld [vmem:[%s2635_s1 + $0x130] sm:$0xff]   ;;  %v2110_v4 = vld [vmem:[%s2635_s1 + $0x178] sm:$0xff]  }
  0x1a   : > { %1898 = vmatprep.subr.bf16.mxu1 %v2071_v21  ;;  %v2105_v63 = vld [vmem:[%s2635_s1 + $0x1a8] sm:$0xff]   ;;  %v2109_v3 = vld [vmem:[%s2635_s1 + $0x1b0] sm:$0xff]   ;;  %v2111_v5 = vld [vmem:[%s2635_s1 + $0x1f8] sm:$0xff]  }
  0x1b   : > { %v2112_v6 = vld [vmem:[%s2635_s1 + $0x138] sm:$0xff]   ;;  %v180_v8 = vld [vmem:[%s2312_s28 + $0x10] sm:$0xff]  ;;  %v2114_v16 = vld [vmem:[%s2635_s1 + $0x240] sm:$0xff]  }
  0x1c   : > { %1877 = vmatpush3.bf16.msra.mxu0 %v2072_v22  ;;  %v2113_v7 = vld [vmem:[%s2635_s1 + $0x1b8] sm:$0xff]   ;;  %v188_v9 = vld [vmem:[%s2312_s28 + $0x50] sm:$0xff]  ;;  %v2115_v17 = vld [vmem:[%s2635_s1 + $0x2c0] sm:$0xff]  }
  0x1d   : > { %1899 = vmatpush3.bf16.msra.mxu1 %v2073_v23  ;;  %1878 = vmatprep.subr.bf16.mxu0 %v2074_v24  ;;  %v1714_v10 = vcombine.low %v180_v8, %v188_v9  ;;  %v1715_v11 = vcombine.high %v180_v8, %v188_v9  ;;  %v181_v12 = vld [vmem:[%s2312_s28 + $0x18] sm:$0xff]  ;;  %v2116_v18 = vld [vmem:[%s2635_s1 + $0x200] sm:$0xff]   ;;  %v2118_v20 = vld [vmem:[%s2635_s1 + $0x248] sm:$0xff]  }
  0x1e   : > { %1900 = vmatprep.subr.bf16.mxu1 %v2075_v25  ;;  %v189_v13 = vld [vmem:[%s2312_s28 + $0x58] sm:$0xff]  ;;  %v2117_v19 = vld [vmem:[%s2635_s1 + $0x280] sm:$0xff]   ;;  %v2119_v21 = vld [vmem:[%s2635_s1 + $0x2c8] sm:$0xff]  }
  0x1f   : > { %v1716_v14 = vcombine.low %v181_v12, %v189_v13  ;;  %v1717_v15 = vcombine.high %v181_v12, %v189_v13  ;;  %v2120_v22 = vld [vmem:[%s2635_s1 + $0x208] sm:$0xff]   ;;  %v2122_v24 = vld [vmem:[%s2635_s1 + $0x250] sm:$0xff]   ;;  %v2130_v32 = vld [vmem:[%s2635_s1 + $0x260] sm:$0xff]  }
  0x20   : > { %1879 = vmatpush3.bf16.msra.mxu0 %v2076_v26  ;;  %v2121_v23 = vld [vmem:[%s2635_s1 + $0x288] sm:$0xff]   ;;  %v2123_v25 = vld [vmem:[%s2635_s1 + $0x2d0] sm:$0xff]   ;;  %v2131_v33 = vld [vmem:[%s2635_s1 + $0x2e0] sm:$0xff]  }
  0x21   : > { %1901 = vmatpush3.bf16.msra.mxu1 %v2077_v27  ;;  %1880 = vmatprep.subr.bf16.mxu0 %v2078_v28  ;;  %v2124_v26 = vld [vmem:[%s2635_s1 + $0x210] sm:$0xff]   ;;  %v2126_v28 = vld [vmem:[%s2635_s1 + $0x258] sm:$0xff]   ;;  %v2132_v34 = vld [vmem:[%s2635_s1 + $0x220] sm:$0xff]  }
  0x22   : > { %1902 = vmatprep.subr.bf16.mxu1 %v2079_v29  ;;  %v2125_v27 = vld [vmem:[%s2635_s1 + $0x290] sm:$0xff]   ;;  %v2127_v29 = vld [vmem:[%s2635_s1 + $0x2d8] sm:$0xff]   ;;  %v2134_v36 = vld [vmem:[%s2635_s1 + $0x268] sm:$0xff]  }
  0x23   : > { %v2135_v37 = vld [vmem:[%s2635_s1 + $0x2e8] sm:$0xff]   ;;  %v2162_v8 = vld [vmem:[%s2635_s1 + $0x360] sm:$0xff]  }
  0x24   : > { %1881 = vmatpush3.bf16.msra.mxu0 %v2080_v30  ;;  %v2128_v30 = vld [vmem:[%s2635_s1 + $0x218] sm:$0xff]   ;;  %v2137_v39 = vld [vmem:[%s2635_s1 + $0x2a8] sm:$0xff]   ;;  %v2163_v9 = vld [vmem:[%s2635_s1 + $0x3e0] sm:$0xff]  }
  0x25   : > { %1903 = vmatpush3.bf16.msra.mxu1 %v2081_v31  ;;  %1910 = vmatprep.subr.bf16.mxu0 %v2082_v40  ;;  %v2129_v31 = vld [vmem:[%s2635_s1 + $0x298] sm:$0xff]   ;;  %v2138_v40 = vld [vmem:[%s2635_s1 + $0x270] sm:$0xff]   ;;  %v2166_v12 = vld [vmem:[%s2635_s1 + $0x368] sm:$0xff]  }
  0x26   : > { %1932 = vmatprep.subr.bf16.mxu1 %v2083_v41  ;;  %v2139_v41 = vld [vmem:[%s2635_s1 + $0x2f0] sm:$0xff]   ;;  %v2167_v13 = vld [vmem:[%s2635_s1 + $0x3e8] sm:$0xff]  }
  0x27   : > { %1338 = vmatmul.mubr.bf16.vlgmr.msra.gmra.mrb[0].mxu0 %v1710_v35  ;;  %v2133_v35 = vld [vmem:[%s2635_s1 + $0x2a0] sm:$0xff]  }
  0x28   : > { %1379 = vmatmul.mubr.bf16.vlgmr.msra.gmra.mrb[0].mxu1 %v1712_v38  ;;  %1911 = vmatpush3.bf16.msra.mxu0 %v2084_v42  ;;  %v2136_v38 = vld [vmem:[%s2635_s1 + $0x228] sm:$0xff]   ;;  %v2140_v42 = vld [vmem:[%s2635_s1 + $0x230] sm:$0xff]  }
  0x29   : > { %1933 = vmatpush3.bf16.msra.mxu1 %v2085_v43  ;;  %1912 = vmatprep.subr.bf16.mxu0 %v2086_v44  ;;  %v2141_v43 = vld [vmem:[%s2635_s1 + $0x2b0] sm:$0xff]   ;;  %v2142_v44 = vld [vmem:[%s2635_s1 + $0x278] sm:$0xff]  }
  0x2a   : > { %1934 = vmatprep.subr.bf16.mxu1 %v2087_v45  ;;  %1419 = vmatprep.mubr.bf16.mxu0 %v1715_v11  ;;  %v2143_v45 = vld [vmem:[%s2635_s1 + $0x2f8] sm:$0xff]   ;;  %v2165_v11 = vld [vmem:[%s2635_s1 + $0x3a0] sm:$0xff]  }
  0x2b   : > { %1460 = vmatprep.mubr.bf16.mxu1 %v1717_v15  ;;  %v2169_v15 = vld [vmem:[%s2635_s1 + $0x3a8] sm:$0xff]  }
  0x2c   : > { %1913 = vmatpush3.bf16.msra.mxu0 %v2088_v46  ;;  %v2144_v46 = vld [vmem:[%s2635_s1 + $0x238] sm:$0xff]  }
  0x2d   : > { %1935 = vmatpush3.bf16.msra.mxu1 %v2089_v47  ;;  %1914 = vmatprep.subr.bf16.mxu0 %v2090_v48  ;;  %v2145_v47 = vld [vmem:[%s2635_s1 + $0x2b8] sm:$0xff]   ;;  %v182_v48 = vld [vmem:[%s2312_s28 + $0x20] sm:$0xff] }
  0x2e   : > { %1936 = vmatprep.subr.bf16.mxu1 %v2091_v49  ;;  %v190_v49 = vld [vmem:[%s2312_s28 + $0x60] sm:$0xff] }
  0x30   : > { %1915 = vmatpush3.bf16.msra.mxu0 %v2092_v50  ;;  %v183_v50 = vld [vmem:[%s2312_s28 + $0x28] sm:$0xff] }
  0x31   : > { %1937 = vmatpush3.bf16.msra.mxu1 %v2093_v51  ;;  %1916 = vmatprep.subr.bf16.mxu0 %v2094_v52  ;;  %v191_v51 = vld [vmem:[%s2312_s28 + $0x68] sm:$0xff]  ;;  %v1718_v52 = vcombine.low %v182_v48, %v190_v49 }
  0x32   : > { %1938 = vmatprep.subr.bf16.mxu1 %v2095_v53  ;;  %v1719_v53 = vcombine.high %v182_v48, %v190_v49 }
  0x34   : > { %1917 = vmatpush3.bf16.msra.mxu0 %v2096_v54  ;;  %v1720_v54 = vcombine.low %v183_v50, %v191_v51 }
  0x35   : > { %1939 = vmatpush3.bf16.msra.mxu1 %v2097_v55  ;;  %1918 = vmatprep.subr.bf16.mxu0 %v2098_v56  ;;  %v1721_v55 = vcombine.high %v183_v50, %v191_v51  ;;  %v2146_v56 = vld [vmem:[%s2635_s1 + $0x340] sm:$0xff]  }
  0x36   : > { %1940 = vmatprep.subr.bf16.mxu1 %v2099_v57  ;;  %v2147_v57 = vld [vmem:[%s2635_s1 + $0x3c0] sm:$0xff]  }
  0x38   : > { %1919 = vmatpush3.bf16.msra.mxu0 %v2100_v58  ;;  %v2148_v58 = vld [vmem:[%s2635_s1 + $0x300] sm:$0xff]  }
  0x39   : > { %1941 = vmatpush3.bf16.msra.mxu1 %v2101_v59  ;;  %1920 = vmatprep.subr.bf16.mxu0 %v2102_v60  ;;  %v2149_v59 = vld [vmem:[%s2635_s1 + $0x380] sm:$0xff]   ;;  %v2150_v60 = vld [vmem:[%s2635_s1 + $0x348] sm:$0xff]  }
  0x3a   : > { %1942 = vmatprep.subr.bf16.mxu1 %v2103_v61  ;;  %v2151_v61 = vld [vmem:[%s2635_s1 + $0x3c8] sm:$0xff]  }
  0x3c   : > { %1921 = vmatpush3.bf16.msra.mxu0 %v2104_v62  ;;  %v2152_v62 = vld [vmem:[%s2635_s1 + $0x308] sm:$0xff]  }
  0x3d   : > { %1943 = vmatpush3.bf16.msra.mxu1 %v2105_v63  ;;  %1922 = vmatprep.subr.bf16.mxu0 %v2106_v0  ;;  %v2153_v63 = vld [vmem:[%s2635_s1 + $0x388] sm:$0xff]   ;;  %v2154_v0 = vld [vmem:[%s2635_s1 + $0x350] sm:$0xff]  }
  0x3e   : > { %1944 = vmatprep.subr.bf16.mxu1 %v2107_v1  ;;  %v2155_v1 = vld [vmem:[%s2635_s1 + $0x3d0] sm:$0xff]  }
  0x40   : > { %1923 = vmatpush3.bf16.msra.mxu0 %v2108_v2  ;;  %v2156_v2 = vld [vmem:[%s2635_s1 + $0x310] sm:$0xff]  }
  0x41   : > { %1945 = vmatpush3.bf16.msra.mxu1 %v2109_v3  ;;  %1924 = vmatprep.subr.bf16.mxu0 %v2110_v4  ;;  %v2157_v3 = vld [vmem:[%s2635_s1 + $0x390] sm:$0xff]   ;;  %v2158_v4 = vld [vmem:[%s2635_s1 + $0x358] sm:$0xff]  }
  0x42   : > { %1946 = vmatprep.subr.bf16.mxu1 %v2111_v5  ;;  %v2159_v5 = vld [vmem:[%s2635_s1 + $0x3d8] sm:$0xff]  }
  0x44   : > { %1925 = vmatpush3.bf16.msra.mxu0 %v2112_v6  ;;  %v2160_v6 = vld [vmem:[%s2635_s1 + $0x318] sm:$0xff]  }
  0x45   : > { %1947 = vmatpush3.bf16.msra.mxu1 %v2113_v7  ;;  %1954 = vmatprep.subr.bf16.mxu0 %v2114_v16  ;;  %v2161_v7 = vld [vmem:[%s2635_s1 + $0x398] sm:$0xff]   ;;  %v2170_v16 = vld [vmem:[%s2635_s1 + $0x370] sm:$0xff]  }
  0x46   : > { %1976 = vmatprep.subr.bf16.mxu1 %v2115_v17  ;;  %v2171_v17 = vld [vmem:[%s2635_s1 + $0x3f0] sm:$0xff]  }
  0x47   : > { %1420 = vmatmul.mubr.bf16.vlgmr.msra.gmra.mrb[4].mxu0 %v1714_v10  ;;  %v2164_v10 = vld [vmem:[%s2635_s1 + $0x320] sm:$0xff]  }
  0x48   : > { %1461 = vmatmul.mubr.bf16.vlgmr.msra.gmra.mrb[4].mxu1 %v1716_v14  ;;  %1955 = vmatpush3.bf16.msra.mxu0 %v2116_v18  ;;  %v2168_v14 = vld [vmem:[%s2635_s1 + $0x328] sm:$0xff]   ;;  %v2172_v18 = vld [vmem:[%s2635_s1 + $0x330] sm:$0xff]  }
  0x49   : > { %1977 = vmatpush3.bf16.msra.mxu1 %v2117_v19  ;;  %1956 = vmatprep.subr.bf16.mxu0 %v2118_v20  ;;  %v2173_v19 = vld [vmem:[%s2635_s1 + $0x3b0] sm:$0xff]   ;;  %v2174_v20 = vld [vmem:[%s2635_s1 + $0x378] sm:$0xff]  }
  0x4a   : > { %1978 = vmatprep.subr.bf16.mxu1 %v2119_v21  ;;  %1501 = vmatprep.mubr.bf16.mxu0 %v1719_v53  ;;  %v2175_v21 = vld [vmem:[%s2635_s1 + $0x3f8] sm:$0xff]  }
  0x4b   : > { %1542 = vmatprep.mubr.bf16.mxu1 %v1721_v55 }
  0x4c   : > { %1957 = vmatpush3.bf16.msra.mxu0 %v2120_v22  ;;  %v2176_v22 = vld [vmem:[%s2635_s1 + $0x338] sm:$0xff]  }
  0x4d   : > { %1979 = vmatpush3.bf16.msra.mxu1 %v2121_v23  ;;  %1958 = vmatprep.subr.bf16.mxu0 %v2122_v24  ;;  %v2177_v23 = vld [vmem:[%s2635_s1 + $0x3b8] sm:$0xff]   ;;  %v184_v24 = vld [vmem:[%s2312_s28 + $0x30] sm:$0xff] }
  0x4e   : > { %1980 = vmatprep.subr.bf16.mxu1 %v2123_v25  ;;  %v192_v25 = vld [vmem:[%s2312_s28 + $0x70] sm:$0xff] }
  0x50   : > { %1959 = vmatpush3.bf16.msra.mxu0 %v2124_v26  ;;  %v185_v26 = vld [vmem:[%s2312_s28 + $0x38] sm:$0xff] }
  0x51   : > { %1981 = vmatpush3.bf16.msra.mxu1 %v2125_v27  ;;  %1960 = vmatprep.subr.bf16.mxu0 %v2126_v28  ;;  %v1722_v27 = vcombine.low %v184_v24, %v192_v25  ;;  %v1723_v28 = vcombine.high %v184_v24, %v192_v25 }
  0x52   : > { %1982 = vmatprep.subr.bf16.mxu1 %v2127_v29  ;;  %v193_v29 = vld [vmem:[%s2312_s28 + $0x78] sm:$0xff]  ;;  %s1708_s28 = sshll.u32 %s2639_s21, 2 }
  0x53   : > { %s175_s9 = scalar_lea.vmem %s2637_s3, %s1708_s28 }
  0x54   : > { %1961 = vmatpush3.bf16.msra.mxu0 %v2128_v30  ;;  %v1724_v30 = vcombine.low %v185_v26, %v193_v29 }
  0x55   : > { %1983 = vmatpush3.bf16.msra.mxu1 %v2129_v31  ;;  %1962 = vmatprep.subr.bf16.mxu0 %v2130_v32  ;;  %v1725_v31 = vcombine.high %v185_v26, %v193_v29 }
  0x56   : > { %1984 = vmatprep.subr.bf16.mxu1 %v2131_v33 }
  0x58   : > { %1963 = vmatpush3.bf16.msra.mxu0 %v2132_v34  ;;  %v1709_v34 = vld [vmem:[%s2636_s2] ss:$0 sm:$0xff] }
  0x59   : > { %1985 = vmatpush3.bf16.msra.mxu1 %v2133_v35  ;;  %1964 = vmatprep.subr.bf16.mxu0 %v2134_v36 }
  0x5a   : > { %1986 = vmatprep.subr.bf16.mxu1 %v2135_v37 }
  0x5c   : > { %1965 = vmatpush3.bf16.msra.mxu0 %v2136_v38 }
  0x5d   : > { %1987 = vmatpush3.bf16.msra.mxu1 %v2137_v39  ;;  %1966 = vmatprep.subr.bf16.mxu0 %v2138_v40 }
  0x5e   : > { %1988 = vmatprep.subr.bf16.mxu1 %v2139_v41 }
  0x60   : > { %1967 = vmatpush3.bf16.msra.mxu0 %v2140_v42 }
  0x61   : > { %1989 = vmatpush3.bf16.msra.mxu1 %v2141_v43  ;;  %1968 = vmatprep.subr.bf16.mxu0 %v2142_v44 }
  0x62   : > { %1990 = vmatprep.subr.bf16.mxu1 %v2143_v45 }
  0x64   : > { %1969 = vmatpush3.bf16.msra.mxu0 %v2144_v46 }
  0x65   : > { %1991 = vmatpush3.bf16.msra.mxu1 %v2145_v47  ;;  %1998 = vmatprep.subr.bf16.mxu0 %v2146_v56 }
  0x66   : > { %2020 = vmatprep.subr.bf16.mxu1 %v2147_v57 }
  0x67   : > { %1502 = vmatmul.mubr.bf16.vlgmr.msra.gmra.mrb[8].mxu0 %v1718_v52 }
  0x68   : > { %1543 = vmatmul.mubr.bf16.vlgmr.msra.gmra.mrb[8].mxu1 %v1720_v54  ;;  %1999 = vmatpush3.bf16.msra.mxu0 %v2148_v58 }
  0x69   : > { %2021 = vmatpush3.bf16.msra.mxu1 %v2149_v59  ;;  %2000 = vmatprep.subr.bf16.mxu0 %v2150_v60 }
  0x6a   : > { %2022 = vmatprep.subr.bf16.mxu1 %v2151_v61  ;;  %1583 = vmatprep.mubr.bf16.mxu0 %v1723_v28 }
  0x6b   : > { %1624 = vmatprep.mubr.bf16.mxu1 %v1725_v31 }
  0x6c   : > { %2001 = vmatpush3.bf16.msra.mxu0 %v2152_v62 }
  0x6d   : > { %2023 = vmatpush3.bf16.msra.mxu1 %v2153_v63  ;;  %2002 = vmatprep.subr.bf16.mxu0 %v2154_v0 }
  0x6e   : > { %2024 = vmatprep.subr.bf16.mxu1 %v2155_v1 }
  0x70   : > { %2003 = vmatpush3.bf16.msra.mxu0 %v2156_v2 }
  0x71   : > { %2025 = vmatpush3.bf16.msra.mxu1 %v2157_v3  ;;  %2004 = vmatprep.subr.bf16.mxu0 %v2158_v4 }
  0x72   : > { %2026 = vmatprep.subr.bf16.mxu1 %v2159_v5 }
  0x74   : > { %2005 = vmatpush3.bf16.msra.mxu0 %v2160_v6 }
  0x75   : > { %2027 = vmatpush3.bf16.msra.mxu1 %v2161_v7  ;;  %2006 = vmatprep.subr.bf16.mxu0 %v2162_v8 }
  0x76   : > { %2028 = vmatprep.subr.bf16.mxu1 %v2163_v9 }
  0x78   : > { %2007 = vmatpush3.bf16.msra.mxu0 %v2164_v10 }
  0x79   : > { %2029 = vmatpush3.bf16.msra.mxu1 %v2165_v11  ;;  %2008 = vmatprep.subr.bf16.mxu0 %v2166_v12 }
  0x7a   : > { %2030 = vmatprep.subr.bf16.mxu1 %v2167_v13 }
  0x7c   : > { %2009 = vmatpush3.bf16.msra.mxu0 %v2168_v14 }
  0x7d   : > { %2031 = vmatpush3.bf16.msra.mxu1 %v2169_v15  ;;  %2010 = vmatprep.subr.bf16.mxu0 %v2170_v16 }
  0x7e   : > { %2032 = vmatprep.subr.bf16.mxu1 %v2171_v17 }
  0x80   : > { %2011 = vmatpush3.bf16.msra.mxu0 %v2172_v18 }
  0x81   : > { %2033 = vmatpush3.bf16.msra.mxu1 %v2173_v19  ;;  %2012 = vmatprep.subr.bf16.mxu0 %v2174_v20 }
  0x82   : > { %2034 = vmatprep.subr.bf16.mxu1 %v2175_v21 }
  0x84   : > { %2013 = vmatpush3.bf16.msra.mxu0 %v2176_v22 }
  0x85   : > { %2035 = vmatpush3.bf16.msra.mxu1 %v2177_v23 }
  0x87   : > { %1584 = vmatmul.mubr.bf16.vlgmr.msra.gmra.mrb[12].mxu0 %v1722_v27 }
  0x88   : > { %1625 = vmatmul.mubr.bf16.vlgmr.msra.gmra.mrb[12].mxu1 %v1724_v30 }
  0xfa   : > { %v1882_v32 = vpop.f32.mrb[0].mxu0 }
  0xfb   : > { %v1904_v33 = vpop.f32.mrb[0].mxu1  ;;  %v1883_v35 = vpop.f32.mrb[1].mxu0 }
  0xfc   : > { %v1884_v36 = vadd.f32 %v1883_v35, %v1882_v32  ;;  %v1905_v37 = vpop.f32.mrb[1].mxu1  ;;  %v1885_v38 = vpop.f32.mrb[2].mxu0 }
  0xfd   : > { %v1906_v39 = vadd.f32 %v1905_v37, %v1904_v33  ;;  %v1907_v40 = vpop.f32.mrb[2].mxu1  ;;  %v1886_v41 = vpop.f32.mrb[3].mxu0 }
  0xfe   : > { %v1340_v42 = vadd.f32 %v1884_v36, %v1709_v34  ;;  %v1887_v43 = vadd.f32 %v1886_v41, %v1885_v38  ;;  %v1908_v44 = vpop.f32.mrb[3].mxu1 }
  0xff   : > { %v1909_v45 = vadd.f32 %v1908_v44, %v1907_v40 }
 0x100   : > { %v1381_v46 = vadd.f32 %v1906_v39, %v1340_v42  ;;  %v1343_v47 = vadd.f32 %v1887_v43, %v1709_v34 }
 0x102   : > { %v1384_v48 = vadd.f32 %v1909_v45, %v1343_v47 }
 0x11a   : > { %v1926_v49 = vpop.f32.mrb[4].mxu0 }
 0x11b   : > { %v1948_v50 = vpop.f32.mrb[4].mxu1  ;;  %v1927_v51 = vpop.f32.mrb[5].mxu0 }
 0x11c   : > { %v1928_v52 = vadd.f32 %v1927_v51, %v1926_v49  ;;  %v1949_v53 = vpop.f32.mrb[5].mxu1  ;;  %v1929_v54 = vpop.f32.mrb[6].mxu0 }
 0x11d   : > { %v1950_v55 = vadd.f32 %v1949_v53, %v1948_v50  ;;  %v1951_v56 = vpop.f32.mrb[6].mxu1  ;;  %v1930_v57 = vpop.f32.mrb[7].mxu0 }
 0x11e   : > { %v1422_v58 = vadd.f32 %v1928_v52, %v1381_v46  ;;  %v1931_v59 = vadd.f32 %v1930_v57, %v1929_v54  ;;  %v1952_v60 = vpop.f32.mrb[7].mxu1 }
 0x11f   : > { %v1953_v61 = vadd.f32 %v1952_v60, %v1951_v56 }
 0x120   : > { %v1463_v62 = vadd.f32 %v1950_v55, %v1422_v58  ;;  %v1425_v63 = vadd.f32 %v1931_v59, %v1384_v48 }
 0x122   : > { %v1466_v0 = vadd.f32 %v1953_v61, %v1425_v63 }
 0x13a   : > { %v1970_v1 = vpop.f32.mrb[8].mxu0 }
 0x13b   : > { %v1992_v2 = vpop.f32.mrb[8].mxu1  ;;  %v1971_v3 = vpop.f32.mrb[9].mxu0 }
 0x13c   : > { %v1993_v4 = vpop.f32.mrb[9].mxu1  ;;  %v1972_v5 = vadd.f32 %v1971_v3, %v1970_v1  ;;  %v1973_v7 = vpop.f32.mrb[10].mxu0 }
 0x13d   : > { %v1994_v6 = vadd.f32 %v1993_v4, %v1992_v2  ;;  %v1995_v8 = vpop.f32.mrb[10].mxu1  ;;  %v1974_v9 = vpop.f32.mrb[11].mxu0 }
 0x13e   : > { %v1996_v10 = vpop.f32.mrb[11].mxu1  ;;  %v1504_v11 = vadd.f32 %v1972_v5, %v1463_v62  ;;  %v1975_v12 = vadd.f32 %v1974_v9, %v1973_v7 }
 0x13f   : > { %v1997_v13 = vadd.f32 %v1996_v10, %v1995_v8 }
 0x140   : > { %v1545_v14 = vadd.f32 %v1994_v6, %v1504_v11  ;;  %v1507_v15 = vadd.f32 %v1975_v12, %v1466_v0 }
 0x142   : > { %v1548_v16 = vadd.f32 %v1997_v13, %v1507_v15 }
 0x15a   : > { %v2014_v17 = vpop.f32.mrb[12].mxu0 }
 0x15b   : > { %v2036_v18 = vpop.f32.mrb[12].mxu1  ;;  %v2015_v19 = vpop.f32.mrb[13].mxu0 }
 0x15c   : > { %v2016_v20 = vadd.f32 %v2015_v19, %v2014_v17  ;;  %v2037_v21 = vpop.f32.mrb[13].mxu1  ;;  %v2017_v22 = vpop.f32.mrb[14].mxu0 }
 0x15d   : > { %v2038_v23 = vadd.f32 %v2037_v21, %v2036_v18  ;;  %v2039_v24 = vpop.f32.mrb[14].mxu1  ;;  %v2018_v25 = vpop.f32.mrb[15].mxu0 }
 0x15e   : > { %v1586_v26 = vadd.f32 %v2016_v20, %v1545_v14  ;;  %v2019_v27 = vadd.f32 %v2018_v25, %v2017_v22  ;;  %v2040_v28 = vpop.f32.mrb[15].mxu1 }
 0x15f   : > { %v2041_v29 = vadd.f32 %v2040_v28, %v2039_v24 }
 0x160   : > { %v1627_v30 = vadd.f32 %v2038_v23, %v1586_v26  ;;  %v1589_v31 = vadd.f32 %v2019_v27, %v1548_v16 }
 0x162   : > { %v1630_v32 = vadd.f32 %v2041_v29, %v1589_v31 }
 0x164   : > { %v1864_v33 = vpack.c.bf16 %v1630_v32, %v1627_v30 }
 0x166   : > { %1865 = vst [vmem:[%s175_s9] sm:$0xff] %v1864_v33  }
 0x167 PF: > { %s13_s12 = sadd.s32 1, %s2184_s12  }
 0x168   : > { %p10_p4 = scmp.ge.s32.totalorder %s13_s12, 4  }
 0x16a   :  { %12 = sbr.rel (!%p10_p4) target bundleno = 1 (0x1), region = 62 }

// kernel: multi_target_adversarial_network.8
= control target key start
LH: loop header
LB: loop body
LE: loop exit
PB: predicated region body
PF: predicated region fallthrough
CT: control target
= control target key end

     0   :  { %s3344_s12 = smov 0   ;;  %s4245_s0 = inlined_call_operand.vmem [shape: bf16[32,1152], index: 0, kind: input, shape index: {}]   ;;  %s4246_s1 = inlined_call_operand.vmem [shape: bf16[1152,512], index: 1, kind: input, shape index: {}]   ;;  %s4247_s2 = inlined_call_operand.vmem [shape: f32[1,512], index: 2, kind: input, shape index: {}]   ;;  %s4248_s3 = inlined_call_operand.vmem [shape: bf16[32,512], index: 3, kind: output, shape index: {}]  }
   0x1 LB: > { %s2502_s13 = sadd.s32 4294967295, %s3321_s12   ;;  %p2506_p0 = scmp.ge.s32.totalorder %s3321_s12, 1  ;;  %s3321_s12 = sphi %s3344_s12, %s13_s12  }
   0x2   : > { %p139_p1 = scmp.lt.s32.totalorder %s3321_s12, 3 }
   0x4   : > { %p140_p2 = pnand %p2506_p0, %p139_p1 }
   0x5   : > { %v2870_v0 = vld [vmem:[%s4246_s1 + $0x4] ss:$16 sps:$4 sm:$0xff] (!%p140_p2)   ;;  %v2872_v1 = vld [vmem:[%s4246_s1 + $0xc] ss:$16 sps:$4 sm:$0xff] (!%p140_p2)   ;;  %v2874_v2 = vld [vmem:[%s4246_s1] ss:$16 sps:$4 sm:$0xff] (!%p140_p2)  }
   0x6   : > { %143 = sbr.rel (%p140_p2) target bundleno = 514 (0x202), region = 32  ;;  %1986 = vmatprep.subr.bf16.mxu0 (!%p140_p2), %v2870_v0  ;;  %v2875_v3 = vld [vmem:[%s4246_s1 + $0x8] ss:$16 sps:$4 sm:$0xff] (!%p140_p2)   ;;  %2201 = vmatprep.subr.bf16.mxu1 (!%p140_p2), %v2872_v1  ;;  %v2876_v4 = vld [vmem:[%s4246_s1 + $0x24] ss:$16 sps:$4 sm:$0xff] (!%p140_p2)   ;;  %s2507_s24 = sshll.u32 (!%p140_p2), %s2502_s13, 1 }
   0x7   : > { %1987 = vmatpush1.bf16.msra.mxu0 (!%p140_p2), %v2874_v2  ;;  %2202 = vmatpush1.bf16.msra.mxu1 (!%p140_p2), %v2875_v3  ;;  %v2878_v5 = vld [vmem:[%s4246_s1 + $0x2c] ss:$16 sps:$4 sm:$0xff] (!%p140_p2)   ;;  %v2880_v6 = vld [vmem:[%s4246_s1 + $0x20] ss:$16 sps:$4 sm:$0xff] (!%p140_p2)   ;;  %v2881_v7 = vld [vmem:[%s4246_s1 + $0x28] ss:$16 sps:$4 sm:$0xff] (!%p140_p2)  }
   0x8   : > { %1988 = vmatprep.subr.bf16.mxu0 (!%p140_p2), %v2876_v4  ;;  %2203 = vmatprep.subr.bf16.mxu1 (!%p140_p2), %v2878_v5  ;;  %v2882_v8 = vld [vmem:[%s4246_s1 + $0x44] ss:$16 sps:$4 sm:$0xff] (!%p140_p2)   ;;  %v2884_v9 = vld [vmem:[%s4246_s1 + $0x4c] ss:$16 sps:$4 sm:$0xff] (!%p140_p2)   ;;  %v2886_v10 = vld [vmem:[%s4246_s1 + $0x40] ss:$16 sps:$4 sm:$0xff] (!%p140_p2)  }
   0x9   : > { %v2887_v11 = vld [vmem:[%s4246_s1 + $0x48] ss:$16 sps:$4 sm:$0xff] (!%p140_p2)   ;;  %v2888_v12 = vld [vmem:[%s4246_s1 + $0x64] ss:$16 sps:$4 sm:$0xff] (!%p140_p2)   ;;  %v2890_v13 = vld [vmem:[%s4246_s1 + $0x6c] ss:$16 sps:$4 sm:$0xff] (!%p140_p2)  }
   0xa   : > { %v2892_v14 = vld [vmem:[%s4246_s1 + $0x60] ss:$16 sps:$4 sm:$0xff] (!%p140_p2)   ;;  %v2893_v15 = vld [vmem:[%s4246_s1 + $0x68] ss:$16 sps:$4 sm:$0xff] (!%p140_p2)   ;;  %v2894_v16 = vld [vmem:[%s4246_s1 + $0x84] ss:$16 sps:$4 sm:$0xff] (!%p140_p2)  }
   0xb   : > { %1989 = vmatpush1.bf16.msra.mxu0 (!%p140_p2), %v2880_v6  ;;  %2204 = vmatpush1.bf16.msra.mxu1 (!%p140_p2), %v2881_v7  ;;  %v2896_v17 = vld [vmem:[%s4246_s1 + $0x8c] ss:$16 sps:$4 sm:$0xff] (!%p140_p2)   ;;  %v2898_v18 = vld [vmem:[%s4246_s1 + $0x80] ss:$16 sps:$4 sm:$0xff] (!%p140_p2)   ;;  %v2899_v19 = vld [vmem:[%s4246_s1 + $0x88] ss:$16 sps:$4 sm:$0xff] (!%p140_p2)  }
   0xc   : > { %1990 = vmatprep.subr.bf16.mxu0 (!%p140_p2), %v2882_v8  ;;  %2205 = vmatprep.subr.bf16.mxu1 (!%p140_p2), %v2884_v9  ;;  %v2900_v20 = vld [vmem:[%s4246_s1 + $0xa4] ss:$16 sps:$4 sm:$0xff] (!%p140_p2)   ;;  %v2902_v21 = vld [vmem:[%s4246_s1 + $0xac] ss:$16 sps:$4 sm:$0xff] (!%p140_p2)   ;;  %v2904_v22 = vld [vmem:[%s4246_s1 + $0xa0] ss:$16 sps:$4 sm:$0xff] (!%p140_p2)  }
   0xd   : > { %v2905_v23 = vld [vmem:[%s4246_s1 + $0xa8] ss:$16 sps:$4 sm:$0xff]   ;;  %v2906_v24 = vld [vmem:[%s4246_s1 + $0xc4] ss:$16 sps:$4 sm:$0xff]   ;;  %v2908_v25 = vld [vmem:[%s4246_s1 + $0xcc] ss:$16 sps:$4 sm:$0xff]  }
   0xe   : > { %v2910_v26 = vld [vmem:[%s4246_s1 + $0xc0] ss:$16 sps:$4 sm:$0xff]   ;;  %v2911_v27 = vld [vmem:[%s4246_s1 + $0xc8] ss:$16 sps:$4 sm:$0xff]   ;;  %v2912_v28 = vld [vmem:[%s4246_s1 + $0xe4] ss:$16 sps:$4 sm:$0xff]  }
   0xf   : > { %1991 = vmatpush1.bf16.msra.mxu0 %v2886_v10  ;;  %2206 = vmatpush1.bf16.msra.mxu1 %v2887_v11  ;;  %v2914_v29 = vld [vmem:[%s4246_s1 + $0xec] ss:$16 sps:$4 sm:$0xff]   ;;  %v2916_v30 = vld [vmem:[%s4246_s1 + $0xe0] ss:$16 sps:$4 sm:$0xff]   ;;  %v2917_v31 = vld [vmem:[%s4246_s1 + $0xe8] ss:$16 sps:$4 sm:$0xff]  }
  0x10   : > { %1992 = vmatprep.subr.bf16.mxu0 %v2888_v12  ;;  %2207 = vmatprep.subr.bf16.mxu1 %v2890_v13  ;;  %v2918_v32 = vld [vmem:[%s4246_s1 + $0x104] ss:$16 sps:$4 sm:$0xff]   ;;  %p166_p3 = scmp.lt.s32.totalorder %s2507_s24, 3  ;;  %v2920_v33 = vld [vmem:[%s4246_s1 + $0x10c] ss:$16 sps:$4 sm:$0xff]  }
  0x11   : > { %v2922_v34 = vld [vmem:[%s4246_s1 + $0x100] ss:$16 sps:$4 sm:$0xff]   ;;  %v2923_v35 = vld [vmem:[%s4246_s1 + $0x108] ss:$16 sps:$4 sm:$0xff]   ;;  %v2924_v36 = vld [vmem:[%s4246_s1 + $0x124] ss:$16 sps:$4 sm:$0xff]  }
  0x12   : > { %s4250_s24 = smov (!%p166_p3, %s2507_s24), 3  ;;  %v2926_v37 = vld [vmem:[%s4246_s1 + $0x12c] ss:$16 sps:$4 sm:$0xff]   ;;  %v2928_v38 = vld [vmem:[%s4246_s1 + $0x120] ss:$16 sps:$4 sm:$0xff]  }
  0x13   : > { %1993 = vmatpush1.bf16.msra.mxu0 %v2892_v14  ;;  %2208 = vmatpush1.bf16.msra.mxu1 %v2893_v15  ;;  %v2929_v39 = vld [vmem:[%s4246_s1 + $0x128] ss:$16 sps:$4 sm:$0xff]   ;;  %v2930_v40 = vld [vmem:[%s4246_s1 + $0x144] ss:$16 sps:$4 sm:$0xff]   ;;  %s2860_s21 = smul.u32 36, %s4250_s24 }
  0x14   : > { %1994 = vmatprep.subr.bf16.mxu0 %v2894_v16  ;;  %2209 = vmatprep.subr.bf16.mxu1 %v2896_v17  ;;  %v2932_v41 = vld [vmem:[%s4246_s1 + $0x14c] ss:$16 sps:$4 sm:$0xff]   ;;  %v2934_v42 = vld [vmem:[%s4246_s1 + $0x140] ss:$16 sps:$4 sm:$0xff]   ;;  %v2935_v43 = vld [vmem:[%s4246_s1 + $0x148] ss:$16 sps:$4 sm:$0xff]  }
  0x15   : > { %v2936_v44 = vld [vmem:[%s4246_s1 + $0x164] ss:$16 sps:$4 sm:$0xff]   ;;  %s3495_s13 = scalar_lea.vmem %s4245_s0, %s2860_s21  ;;  %v2938_v45 = vld [vmem:[%s4246_s1 + $0x16c] ss:$16 sps:$4 sm:$0xff]   ;;  %v2940_v46 = vld [vmem:[%s4246_s1 + $0x160] ss:$16 sps:$4 sm:$0xff]  }
  0x16   : > { %v2941_v47 = vld [vmem:[%s4246_s1 + $0x168] ss:$16 sps:$4 sm:$0xff]   ;;  %v2942_v49 = vld [vmem:[%s4246_s1 + $0x184] ss:$16 sps:$4 sm:$0xff]   ;;  %v2944_v50 = vld [vmem:[%s4246_s1 + $0x18c] ss:$16 sps:$4 sm:$0xff]  }
  0x17   : > { %1995 = vmatpush1.bf16.msra.mxu0 %v2898_v18  ;;  %2210 = vmatpush1.bf16.msra.mxu1 %v2899_v19  ;;  %v2968_v48 = vld [vmem:[%s3495_s13 + $0x4] ss:$36 sps:$4 sm:$0xff]   ;;  %v2946_v51 = vld [vmem:[%s4246_s1 + $0x180] ss:$16 sps:$4 sm:$0xff]   ;;  %v2950_v54 = vld [vmem:[%s4246_s1 + $0x1ac] ss:$16 sps:$4 sm:$0xff]  }
  0x18   : > { %1996 = vmatprep.subr.bf16.mxu0 %v2900_v20  ;;  %2211 = vmatprep.subr.bf16.mxu1 %v2902_v21  ;;  %v2947_v52 = vld [vmem:[%s4246_s1 + $0x188] ss:$16 sps:$4 sm:$0xff]   ;;  %v2948_v53 = vld [vmem:[%s4246_s1 + $0x1a4] ss:$16 sps:$4 sm:$0xff]   ;;  %v2952_v55 = vld [vmem:[%s4246_s1 + $0x1a0] ss:$16 sps:$4 sm:$0xff]  }
  0x19   : > { %2018 = vmatprep.mubr.bf16.mxu0 %v2968_v48  ;;  %2233 = vmatprep.mubr.bf16.mxu1 %v2968_v48  ;;  %v2953_v56 = vld [vmem:[%s4246_s1 + $0x1a8] ss:$16 sps:$4 sm:$0xff]   ;;  %v2954_v57 = vld [vmem:[%s4246_s1 + $0x1c4] ss:$16 sps:$4 sm:$0xff]   ;;  %v2956_v58 = vld [vmem:[%s4246_s1 + $0x1cc] ss:$16 sps:$4 sm:$0xff]  }
  0x1a   : > { %v2958_v59 = vld [vmem:[%s4246_s1 + $0x1c0] ss:$16 sps:$4 sm:$0xff]   ;;  %v2959_v60 = vld [vmem:[%s4246_s1 + $0x1c8] ss:$16 sps:$4 sm:$0xff]   ;;  %v2960_v61 = vld [vmem:[%s4246_s1 + $0x1e4] ss:$16 sps:$4 sm:$0xff]  }
  0x1b   : > { %1997 = vmatpush1.bf16.msra.mxu0 %v2904_v22  ;;  %2212 = vmatpush1.bf16.msra.mxu1 %v2905_v23  ;;  %v2962_v62 = vld [vmem:[%s4246_s1 + $0x1ec] ss:$16 sps:$4 sm:$0xff]   ;;  %v2964_v63 = vld [vmem:[%s4246_s1 + $0x1e0] ss:$16 sps:$4 sm:$0xff]   ;;  %v2965_v0 = vld [vmem:[%s4246_s1 + $0x1e8] ss:$16 sps:$4 sm:$0xff]  }
  0x1c   : > { %1998 = vmatprep.subr.bf16.mxu0 %v2906_v24  ;;  %2213 = vmatprep.subr.bf16.mxu1 %v2908_v25  ;;  %v2971_v1 = vld [vmem:[%s4246_s1 + $0x204] ss:$16 sps:$4 sm:$0xff]   ;;  %v2974_v2 = vld [vmem:[%s4246_s1 + $0x20c] ss:$16 sps:$4 sm:$0xff]   ;;  %v2969_v4 = vld [vmem:[%s4246_s1 + $0x200] ss:$16 sps:$4 sm:$0xff]  }
  0x1d   : > { %v2966_v3 = vld [vmem:[%s3495_s13] ss:$36 sps:$4 sm:$0xff]   ;;  %v2972_v5 = vld [vmem:[%s4246_s1 + $0x208] ss:$16 sps:$4 sm:$0xff]   ;;  %v2980_v7 = vld [vmem:[%s4246_s1 + $0x22c] ss:$16 sps:$4 sm:$0xff]  }
  0x1e   : > { %v2977_v6 = vld [vmem:[%s4246_s1 + $0x224] ss:$16 sps:$4 sm:$0xff]   ;;  %v2975_v8 = vld [vmem:[%s4246_s1 + $0x220] ss:$16 sps:$4 sm:$0xff]   ;;  %v2978_v9 = vld [vmem:[%s4246_s1 + $0x228] ss:$16 sps:$4 sm:$0xff]  }
  0x1f   : > { %1999 = vmatpush1.bf16.msra.mxu0 %v2910_v26  ;;  %2214 = vmatpush1.bf16.msra.mxu1 %v2911_v27  ;;  %v2983_v10 = vld [vmem:[%s4246_s1 + $0x244] ss:$16 sps:$4 sm:$0xff]   ;;  %v2986_v11 = vld [vmem:[%s4246_s1 + $0x24c] ss:$16 sps:$4 sm:$0xff]   ;;  %v2981_v12 = vld [vmem:[%s4246_s1 + $0x240] ss:$16 sps:$4 sm:$0xff]  }
  0x20   : > { %2000 = vmatprep.subr.bf16.mxu0 %v2912_v28  ;;  %2215 = vmatprep.subr.bf16.mxu1 %v2914_v29  ;;  %v2984_v13 = vld [vmem:[%s4246_s1 + $0x248] ss:$16 sps:$4 sm:$0xff]   ;;  %v2989_v14 = vld [vmem:[%s4246_s1 + $0x264] ss:$16 sps:$4 sm:$0xff]   ;;  %v2992_v15 = vld [vmem:[%s4246_s1 + $0x26c] ss:$16 sps:$4 sm:$0xff]  }
  0x21   : > { %v2987_v16 = vld [vmem:[%s4246_s1 + $0x260] ss:$16 sps:$4 sm:$0xff]   ;;  %v2990_v17 = vld [vmem:[%s4246_s1 + $0x268] ss:$16 sps:$4 sm:$0xff]   ;;  %v2995_v18 = vld [vmem:[%s4246_s1 + $0x284] ss:$16 sps:$4 sm:$0xff]  }
  0x22   : > { %v2998_v19 = vld [vmem:[%s4246_s1 + $0x28c] ss:$16 sps:$4 sm:$0xff]   ;;  %v2993_v20 = vld [vmem:[%s4246_s1 + $0x280] ss:$16 sps:$4 sm:$0xff]   ;;  %v2996_v21 = vld [vmem:[%s4246_s1 + $0x288] ss:$16 sps:$4 sm:$0xff]  }
  0x23   : > { %2001 = vmatpush1.bf16.msra.mxu0 %v2916_v30  ;;  %2216 = vmatpush1.bf16.msra.mxu1 %v2917_v31  ;;  %v3001_v22 = vld [vmem:[%s4246_s1 + $0x2a4] ss:$16 sps:$4 sm:$0xff]   ;;  %v3004_v23 = vld [vmem:[%s4246_s1 + $0x2ac] ss:$16 sps:$4 sm:$0xff]   ;;  %v2999_v24 = vld [vmem:[%s4246_s1 + $0x2a0] ss:$16 sps:$4 sm:$0xff]  }
  0x24   : > { %2002 = vmatprep.subr.bf16.mxu0 %v2918_v32  ;;  %2217 = vmatprep.subr.bf16.mxu1 %v2920_v33  ;;  %v3002_v25 = vld [vmem:[%s4246_s1 + $0x2a8] ss:$16 sps:$4 sm:$0xff]   ;;  %v3007_v26 = vld [vmem:[%s4246_s1 + $0x2c4] ss:$16 sps:$4 sm:$0xff]   ;;  %v3010_v27 = vld [vmem:[%s4246_s1 + $0x2cc] ss:$16 sps:$4 sm:$0xff]  }
  0x25   : > { %v3005_v28 = vld [vmem:[%s4246_s1 + $0x2c0] ss:$16 sps:$4 sm:$0xff]   ;;  %v3008_v29 = vld [vmem:[%s4246_s1 + $0x2c8] ss:$16 sps:$4 sm:$0xff]   ;;  %v3013_v31 = vld [vmem:[%s4246_s1 + $0x2e4] ss:$16 sps:$4 sm:$0xff]  }
  0x26   : > { %v3067_v30 = vld [vmem:[%s3495_s13 + $0xc] ss:$36 sps:$4 sm:$0xff]  }
  0x27   : > { %2003 = vmatpush1.bf16.msra.mxu0 %v2922_v34  ;;  %2218 = vmatpush1.bf16.msra.mxu1 %v2923_v35  ;;  %v3016_v32 = vld [vmem:[%s4246_s1 + $0x2ec] ss:$16 sps:$4 sm:$0xff]   ;;  %v3011_v33 = vld [vmem:[%s4246_s1 + $0x2e0] ss:$16 sps:$4 sm:$0xff]   ;;  %v3014_v34 = vld [vmem:[%s4246_s1 + $0x2e8] ss:$16 sps:$4 sm:$0xff]  }
  0x28   : > { %2004 = vmatprep.subr.bf16.mxu0 %v2924_v36  ;;  %2219 = vmatprep.subr.bf16.mxu1 %v2926_v37  ;;  %v3019_v35 = vld [vmem:[%s4246_s1 + $0x304] ss:$16 sps:$4 sm:$0xff]   ;;  %v3022_v36 = vld [vmem:[%s4246_s1 + $0x30c] ss:$16 sps:$4 sm:$0xff]   ;;  %v3017_v37 = vld [vmem:[%s4246_s1 + $0x300] ss:$16 sps:$4 sm:$0xff]  }
  0x29   : > { %v3040_v48 = vld [vmem:[%s4246_s1 + $0x36c] ss:$16 sps:$4 sm:$0xff]  }
  0x2b   : > { %2005 = vmatpush1.bf16.msra.mxu0 %v2928_v38  ;;  %2220 = vmatpush1.bf16.msra.mxu1 %v2929_v39  ;;  %v3020_v38 = vld [vmem:[%s4246_s1 + $0x308] ss:$16 sps:$4 sm:$0xff]   ;;  %v3025_v39 = vld [vmem:[%s4246_s1 + $0x324] ss:$16 sps:$4 sm:$0xff]  }
  0x2c   : > { %2006 = vmatprep.subr.bf16.mxu0 %v2930_v40  ;;  %2221 = vmatprep.subr.bf16.mxu1 %v2932_v41  ;;  %v3028_v40 = vld [vmem:[%s4246_s1 + $0x32c] ss:$16 sps:$4 sm:$0xff]   ;;  %v3023_v41 = vld [vmem:[%s4246_s1 + $0x320] ss:$16 sps:$4 sm:$0xff]  }
  0x2f   : > { %2007 = vmatpush1.bf16.msra.mxu0 %v2934_v42  ;;  %2222 = vmatpush1.bf16.msra.mxu1 %v2935_v43  ;;  %v3026_v42 = vld [vmem:[%s4246_s1 + $0x328] ss:$16 sps:$4 sm:$0xff]   ;;  %v3031_v43 = vld [vmem:[%s4246_s1 + $0x344] ss:$16 sps:$4 sm:$0xff]  }
  0x30   : > { %2008 = vmatprep.subr.bf16.mxu0 %v2936_v44  ;;  %2223 = vmatprep.subr.bf16.mxu1 %v2938_v45  ;;  %v3034_v44 = vld [vmem:[%s4246_s1 + $0x34c] ss:$16 sps:$4 sm:$0xff]   ;;  %v3029_v45 = vld [vmem:[%s4246_s1 + $0x340] ss:$16 sps:$4 sm:$0xff]  }
  0x33   : > { %2009 = vmatpush1.bf16.msra.mxu0 %v2940_v46  ;;  %2224 = vmatpush1.bf16.msra.mxu1 %v2941_v47  ;;  %v3032_v46 = vld [vmem:[%s4246_s1 + $0x348] ss:$16 sps:$4 sm:$0xff]   ;;  %v3037_v47 = vld [vmem:[%s4246_s1 + $0x364] ss:$16 sps:$4 sm:$0xff]  }
  0x34   : > { %2010 = vmatprep.subr.bf16.mxu0 %v2942_v49  ;;  %2225 = vmatprep.subr.bf16.mxu1 %v2944_v50  ;;  %v3035_v49 = vld [vmem:[%s4246_s1 + $0x360] ss:$16 sps:$4 sm:$0xff]   ;;  %v3038_v50 = vld [vmem:[%s4246_s1 + $0x368] ss:$16 sps:$4 sm:$0xff]  }
  0x37   : > { %2011 = vmatpush1.bf16.msra.mxu0 %v2946_v51  ;;  %2226 = vmatpush1.bf16.msra.mxu1 %v2947_v52  ;;  %v3043_v51 = vld [vmem:[%s4246_s1 + $0x384] ss:$16 sps:$4 sm:$0xff]   ;;  %v3046_v52 = vld [vmem:[%s4246_s1 + $0x38c] ss:$16 sps:$4 sm:$0xff]  }
  0x38   : > { %2012 = vmatprep.subr.bf16.mxu0 %v2948_v53  ;;  %2227 = vmatprep.subr.bf16.mxu1 %v2950_v54  ;;  %v3041_v53 = vld [vmem:[%s4246_s1 + $0x380] ss:$16 sps:$4 sm:$0xff]   ;;  %v3044_v54 = vld [vmem:[%s4246_s1 + $0x388] ss:$16 sps:$4 sm:$0xff]  }
  0x3b   : > { %2013 = vmatpush1.bf16.msra.mxu0 %v2952_v55  ;;  %2228 = vmatpush1.bf16.msra.mxu1 %v2953_v56  ;;  %v3049_v55 = vld [vmem:[%s4246_s1 + $0x3a4] ss:$16 sps:$4 sm:$0xff]   ;;  %v3052_v56 = vld [vmem:[%s4246_s1 + $0x3ac] ss:$16 sps:$4 sm:$0xff]  }
  0x3c   : > { %2014 = vmatprep.subr.bf16.mxu0 %v2954_v57  ;;  %2229 = vmatprep.subr.bf16.mxu1 %v2956_v58  ;;  %v3047_v57 = vld [vmem:[%s4246_s1 + $0x3a0] ss:$16 sps:$4 sm:$0xff]   ;;  %v3050_v58 = vld [vmem:[%s4246_s1 + $0x3a8] ss:$16 sps:$4 sm:$0xff]  }
  0x3f   : > { %2015 = vmatpush1.bf16.msra.mxu0 %v2958_v59  ;;  %2230 = vmatpush1.bf16.msra.mxu1 %v2959_v60  ;;  %v3055_v59 = vld [vmem:[%s4246_s1 + $0x3c4] ss:$16 sps:$4 sm:$0xff]   ;;  %v3058_v60 = vld [vmem:[%s4246_s1 + $0x3cc] ss:$16 sps:$4 sm:$0xff]  }
  0x40   : > { %2016 = vmatprep.subr.bf16.mxu0 %v2960_v61  ;;  %2231 = vmatprep.subr.bf16.mxu1 %v2962_v62  ;;  %v3053_v61 = vld [vmem:[%s4246_s1 + $0x3c0] ss:$16 sps:$4 sm:$0xff]   ;;  %v3056_v62 = vld [vmem:[%s4246_s1 + $0x3c8] ss:$16 sps:$4 sm:$0xff]  }
  0x43   : > { %2017 = vmatpush1.bf16.msra.mxu0 %v2964_v63  ;;  %2232 = vmatpush1.bf16.msra.mxu1 %v2965_v0  ;;  %v3061_v63 = vld [vmem:[%s4246_s1 + $0x3e4] ss:$16 sps:$4 sm:$0xff]   ;;  %v3064_v0 = vld [vmem:[%s4246_s1 + $0x3ec] ss:$16 sps:$4 sm:$0xff]  }
  0x44   : > { %2029 = vmatprep.subr.bf16.mxu0 %v2971_v1  ;;  %2244 = vmatprep.subr.bf16.mxu1 %v2974_v2  ;;  %v3059_v1 = vld [vmem:[%s4246_s1 + $0x3e0] ss:$16 sps:$4 sm:$0xff]   ;;  %v3062_v2 = vld [vmem:[%s4246_s1 + $0x3e8] ss:$16 sps:$4 sm:$0xff]  }
  0x46   : > { %2019 = vmatmul.mubr.bf16.vlgmr.msra.gmra.mrb[0].mxu0 %v2966_v3  ;;  %2234 = vmatmul.mubr.bf16.vlgmr.msra.gmra.mrb[0].mxu1 %v2966_v3  ;;  %v3070_v3 = vld [vmem:[%s4246_s1 + $0x404] ss:$16 sps:$4 sm:$0xff]  }
  0x47   : > { %2030 = vmatpush1.bf16.msra.mxu0 %v2969_v4  ;;  %2245 = vmatpush1.bf16.msra.mxu1 %v2972_v5  ;;  %v3073_v4 = vld [vmem:[%s4246_s1 + $0x40c] ss:$16 sps:$4 sm:$0xff]  }
  0x48   : > { %2031 = vmatprep.subr.bf16.mxu0 %v2977_v6  ;;  %2246 = vmatprep.subr.bf16.mxu1 %v2980_v7  ;;  %v3065_v5 = vld [vmem:[%s3495_s13 + $0x8] ss:$36 sps:$4 sm:$0xff]   ;;  %v3068_v6 = vld [vmem:[%s4246_s1 + $0x400] ss:$16 sps:$4 sm:$0xff]  }
  0x49   : > { %2061 = vmatprep.mubr.bf16.mxu0 %v3067_v30  ;;  %2276 = vmatprep.mubr.bf16.mxu1 %v3067_v30  ;;  %v3071_v7 = vld [vmem:[%s4246_s1 + $0x408] ss:$16 sps:$4 sm:$0xff]   ;;  %v3109_v30 = vld [vmem:[%s4246_s1 + $0x4cc] ss:$16 sps:$4 sm:$0xff]  }
  0x4b   : > { %2032 = vmatpush1.bf16.msra.mxu0 %v2975_v8  ;;  %2247 = vmatpush1.bf16.msra.mxu1 %v2978_v9  ;;  %v3076_v8 = vld [vmem:[%s4246_s1 + $0x424] ss:$16 sps:$4 sm:$0xff]   ;;  %v3079_v9 = vld [vmem:[%s4246_s1 + $0x42c] ss:$16 sps:$4 sm:$0xff]  }
  0x4c   : > { %2033 = vmatprep.subr.bf16.mxu0 %v2983_v10  ;;  %2248 = vmatprep.subr.bf16.mxu1 %v2986_v11  ;;  %v3074_v10 = vld [vmem:[%s4246_s1 + $0x420] ss:$16 sps:$4 sm:$0xff]   ;;  %v3077_v11 = vld [vmem:[%s4246_s1 + $0x428] ss:$16 sps:$4 sm:$0xff]  }
  0x4f   : > { %2034 = vmatpush1.bf16.msra.mxu0 %v2981_v12  ;;  %2249 = vmatpush1.bf16.msra.mxu1 %v2984_v13  ;;  %v3166_v12 = vld [vmem:[%s3495_s13 + $0x14] ss:$36 sps:$4 sm:$0xff]  }
  0x50   : > { %2035 = vmatprep.subr.bf16.mxu0 %v2989_v14  ;;  %2250 = vmatprep.subr.bf16.mxu1 %v2992_v15  ;;  %v3082_v13 = vld [vmem:[%s4246_s1 + $0x444] ss:$16 sps:$4 sm:$0xff]   ;;  %v3085_v14 = vld [vmem:[%s4246_s1 + $0x44c] ss:$16 sps:$4 sm:$0xff]   ;;  %v3080_v15 = vld [vmem:[%s4246_s1 + $0x440] ss:$16 sps:$4 sm:$0xff]  }
  0x53   : > { %2036 = vmatpush1.bf16.msra.mxu0 %v2987_v16  ;;  %2251 = vmatpush1.bf16.msra.mxu1 %v2990_v17  ;;  %v3083_v16 = vld [vmem:[%s4246_s1 + $0x448] ss:$16 sps:$4 sm:$0xff]   ;;  %v3088_v17 = vld [vmem:[%s4246_s1 + $0x464] ss:$16 sps:$4 sm:$0xff]  }
  0x54   : > { %2037 = vmatprep.subr.bf16.mxu0 %v2995_v18  ;;  %2252 = vmatprep.subr.bf16.mxu1 %v2998_v19  ;;  %v3091_v18 = vld [vmem:[%s4246_s1 + $0x46c] ss:$16 sps:$4 sm:$0xff]   ;;  %v3086_v19 = vld [vmem:[%s4246_s1 + $0x460] ss:$16 sps:$4 sm:$0xff]  }
  0x57   : > { %2038 = vmatpush1.bf16.msra.mxu0 %v2993_v20  ;;  %2253 = vmatpush1.bf16.msra.mxu1 %v2996_v21  ;;  %v3089_v20 = vld [vmem:[%s4246_s1 + $0x468] ss:$16 sps:$4 sm:$0xff]   ;;  %v3094_v21 = vld [vmem:[%s4246_s1 + $0x484] ss:$16 sps:$4 sm:$0xff]  }
  0x58   : > { %2039 = vmatprep.subr.bf16.mxu0 %v3001_v22  ;;  %2254 = vmatprep.subr.bf16.mxu1 %v3004_v23  ;;  %v3097_v22 = vld [vmem:[%s4246_s1 + $0x48c] ss:$16 sps:$4 sm:$0xff]   ;;  %v3092_v23 = vld [vmem:[%s4246_s1 + $0x480] ss:$16 sps:$4 sm:$0xff]  }
  0x5b   : > { %2040 = vmatpush1.bf16.msra.mxu0 %v2999_v24  ;;  %2255 = vmatpush1.bf16.msra.mxu1 %v3002_v25  ;;  %v3095_v24 = vld [vmem:[%s4246_s1 + $0x488] ss:$16 sps:$4 sm:$0xff]   ;;  %v3100_v25 = vld [vmem:[%s4246_s1 + $0x4a4] ss:$16 sps:$4 sm:$0xff]  }
  0x5c   : > { %2041 = vmatprep.subr.bf16.mxu0 %v3007_v26  ;;  %2256 = vmatprep.subr.bf16.mxu1 %v3010_v27  ;;  %v3103_v26 = vld [vmem:[%s4246_s1 + $0x4ac] ss:$16 sps:$4 sm:$0xff]   ;;  %v3098_v27 = vld [vmem:[%s4246_s1 + $0x4a0] ss:$16 sps:$4 sm:$0xff]  }
  0x5f   : > { %2042 = vmatpush1.bf16.msra.mxu0 %v3005_v28  ;;  %2257 = vmatpush1.bf16.msra.mxu1 %v3008_v29  ;;  %v3101_v28 = vld [vmem:[%s4246_s1 + $0x4a8] ss:$16 sps:$4 sm:$0xff]   ;;  %v3106_v29 = vld [vmem:[%s4246_s1 + $0x4c4] ss:$16 sps:$4 sm:$0xff]  }
  0x60   : > { %2043 = vmatprep.subr.bf16.mxu0 %v3013_v31  ;;  %2258 = vmatprep.subr.bf16.mxu1 %v3016_v32  ;;  %v3104_v31 = vld [vmem:[%s4246_s1 + $0x4c0] ss:$16 sps:$4 sm:$0xff]   ;;  %v3107_v32 = vld [vmem:[%s4246_s1 + $0x4c8] ss:$16 sps:$4 sm:$0xff]  }
  0x63   : > { %2044 = vmatpush1.bf16.msra.mxu0 %v3011_v33  ;;  %2259 = vmatpush1.bf16.msra.mxu1 %v3014_v34  ;;  %v3112_v33 = vld [vmem:[%s4246_s1 + $0x4e4] ss:$16 sps:$4 sm:$0xff]   ;;  %v3115_v34 = vld [vmem:[%s4246_s1 + $0x4ec] ss:$16 sps:$4 sm:$0xff]  }
  0x64   : > { %2045 = vmatprep.subr.bf16.mxu0 %v3019_v35  ;;  %2260 = vmatprep.subr.bf16.mxu1 %v3022_v36  ;;  %v3110_v35 = vld [vmem:[%s4246_s1 + $0x4e0] ss:$16 sps:$4 sm:$0xff]   ;;  %v3113_v36 = vld [vmem:[%s4246_s1 + $0x4e8] ss:$16 sps:$4 sm:$0xff]  }
  0x67   : > { %2046 = vmatpush1.bf16.msra.mxu0 %v3017_v37  ;;  %2261 = vmatpush1.bf16.msra.mxu1 %v3020_v38  ;;  %v3118_v37 = vld [vmem:[%s4246_s1 + $0x504] ss:$16 sps:$4 sm:$0xff]   ;;  %v3121_v38 = vld [vmem:[%s4246_s1 + $0x50c] ss:$16 sps:$4 sm:$0xff]  }
  0x68   : > { %2047 = vmatprep.subr.bf16.mxu0 %v3025_v39  ;;  %2262 = vmatprep.subr.bf16.mxu1 %v3028_v40  ;;  %v3116_v39 = vld [vmem:[%s4246_s1 + $0x500] ss:$16 sps:$4 sm:$0xff]   ;;  %v3119_v40 = vld [vmem:[%s4246_s1 + $0x508] ss:$16 sps:$4 sm:$0xff]  }
  0x6b   : > { %2048 = vmatpush1.bf16.msra.mxu0 %v3023_v41  ;;  %2263 = vmatpush1.bf16.msra.mxu1 %v3026_v42  ;;  %v3124_v41 = vld [vmem:[%s4246_s1 + $0x524] ss:$16 sps:$4 sm:$0xff]   ;;  %v3127_v42 = vld [vmem:[%s4246_s1 + $0x52c] ss:$16 sps:$4 sm:$0xff]  }
  0x6c   : > { %2049 = vmatprep.subr.bf16.mxu0 %v3031_v43  ;;  %2264 = vmatprep.subr.bf16.mxu1 %v3034_v44  ;;  %v3122_v43 = vld [vmem:[%s4246_s1 + $0x520] ss:$16 sps:$4 sm:$0xff]   ;;  %v3125_v44 = vld [vmem:[%s4246_s1 + $0x528] ss:$16 sps:$4 sm:$0xff]  }
  0x6f   : > { %2050 = vmatpush1.bf16.msra.mxu0 %v3029_v45  ;;  %2265 = vmatpush1.bf16.msra.mxu1 %v3032_v46  ;;  %v3130_v45 = vld [vmem:[%s4246_s1 + $0x544] ss:$16 sps:$4 sm:$0xff]   ;;  %v3133_v46 = vld [vmem:[%s4246_s1 + $0x54c] ss:$16 sps:$4 sm:$0xff]  }
  0x70   : > { %2051 = vmatprep.subr.bf16.mxu0 %v3037_v47  ;;  %2266 = vmatprep.subr.bf16.mxu1 %v3040_v48  ;;  %v3128_v47 = vld [vmem:[%s4246_s1 + $0x540] ss:$16 sps:$4 sm:$0xff]   ;;  %v3131_v48 = vld [vmem:[%s4246_s1 + $0x548] ss:$16 sps:$4 sm:$0xff]  }
  0x73   : > { %2052 = vmatpush1.bf16.msra.mxu0 %v3035_v49  ;;  %2267 = vmatpush1.bf16.msra.mxu1 %v3038_v50  ;;  %v3136_v49 = vld [vmem:[%s4246_s1 + $0x564] ss:$16 sps:$4 sm:$0xff]   ;;  %v3139_v50 = vld [vmem:[%s4246_s1 + $0x56c] ss:$16 sps:$4 sm:$0xff]  }
  0x74   : > { %2053 = vmatprep.subr.bf16.mxu0 %v3043_v51  ;;  %2268 = vmatprep.subr.bf16.mxu1 %v3046_v52  ;;  %v3134_v51 = vld [vmem:[%s4246_s1 + $0x560] ss:$16 sps:$4 sm:$0xff]   ;;  %v3137_v52 = vld [vmem:[%s4246_s1 + $0x568] ss:$16 sps:$4 sm:$0xff]  }
  0x77   : > { %2054 = vmatpush1.bf16.msra.mxu0 %v3041_v53  ;;  %2269 = vmatpush1.bf16.msra.mxu1 %v3044_v54  ;;  %v3142_v53 = vld [vmem:[%s4246_s1 + $0x584] ss:$16 sps:$4 sm:$0xff]   ;;  %v3145_v54 = vld [vmem:[%s4246_s1 + $0x58c] ss:$16 sps:$4 sm:$0xff]  }
  0x78   : > { %2055 = vmatprep.subr.bf16.mxu0 %v3049_v55  ;;  %2270 = vmatprep.subr.bf16.mxu1 %v3052_v56  ;;  %v3140_v55 = vld [vmem:[%s4246_s1 + $0x580] ss:$16 sps:$4 sm:$0xff]   ;;  %v3143_v56 = vld [vmem:[%s4246_s1 + $0x588] ss:$16 sps:$4 sm:$0xff]  }
  0x7b   : > { %2056 = vmatpush1.bf16.msra.mxu0 %v3047_v57  ;;  %2271 = vmatpush1.bf16.msra.mxu1 %v3050_v58  ;;  %v3148_v57 = vld [vmem:[%s4246_s1 + $0x5a4] ss:$16 sps:$4 sm:$0xff]   ;;  %v3151_v58 = vld [vmem:[%s4246_s1 + $0x5ac] ss:$16 sps:$4 sm:$0xff]  }
  0x7c   : > { %2057 = vmatprep.subr.bf16.mxu0 %v3055_v59  ;;  %2272 = vmatprep.subr.bf16.mxu1 %v3058_v60  ;;  %v3146_v59 = vld [vmem:[%s4246_s1 + $0x5a0] ss:$16 sps:$4 sm:$0xff]   ;;  %v3149_v60 = vld [vmem:[%s4246_s1 + $0x5a8] ss:$16 sps:$4 sm:$0xff]  }
  0x7f   : > { %2058 = vmatpush1.bf16.msra.mxu0 %v3053_v61  ;;  %2273 = vmatpush1.bf16.msra.mxu1 %v3056_v62  ;;  %v3154_v61 = vld [vmem:[%s4246_s1 + $0x5c4] ss:$16 sps:$4 sm:$0xff]   ;;  %v3157_v62 = vld [vmem:[%s4246_s1 + $0x5cc] ss:$16 sps:$4 sm:$0xff]  }
  0x80   : > { %2059 = vmatprep.subr.bf16.mxu0 %v3061_v63  ;;  %2274 = vmatprep.subr.bf16.mxu1 %v3064_v0  ;;  %v3152_v63 = vld [vmem:[%s4246_s1 + $0x5c0] ss:$16 sps:$4 sm:$0xff]   ;;  %v3155_v0 = vld [vmem:[%s4246_s1 + $0x5c8] ss:$16 sps:$4 sm:$0xff]  }
  0x83   : > { %2060 = vmatpush1.bf16.msra.mxu0 %v3059_v1  ;;  %2275 = vmatpush1.bf16.msra.mxu1 %v3062_v2  ;;  %v3160_v1 = vld [vmem:[%s4246_s1 + $0x5e4] ss:$16 sps:$4 sm:$0xff]   ;;  %v3163_v2 = vld [vmem:[%s4246_s1 + $0x5ec] ss:$16 sps:$4 sm:$0xff]  }
  0x84   : > { %2072 = vmatprep.subr.bf16.mxu0 %v3070_v3  ;;  %2287 = vmatprep.subr.bf16.mxu1 %v3073_v4  ;;  %v3158_v3 = vld [vmem:[%s4246_s1 + $0x5e0] ss:$16 sps:$4 sm:$0xff]   ;;  %v3161_v4 = vld [vmem:[%s4246_s1 + $0x5e8] ss:$16 sps:$4 sm:$0xff]  }
  0x86   : > { %2062 = vmatmul.mubr.bf16.vlgmr.msra.gmra.mrb[0].mxu0 %v3065_v5  ;;  %2277 = vmatmul.mubr.bf16.vlgmr.msra.gmra.mrb[0].mxu1 %v3065_v5  ;;  %v3169_v5 = vld [vmem:[%s4246_s1 + $0x604] ss:$16 sps:$4 sm:$0xff]  }
  0x87   : > { %2073 = vmatpush1.bf16.msra.mxu0 %v3068_v6  ;;  %2288 = vmatpush1.bf16.msra.mxu1 %v3071_v7  ;;  %v3172_v6 = vld [vmem:[%s4246_s1 + $0x60c] ss:$16 sps:$4 sm:$0xff]   ;;  %v3164_v7 = vld [vmem:[%s3495_s13 + $0x10] ss:$36 sps:$4 sm:$0xff]  }
  0x88   : > { %2074 = vmatprep.subr.bf16.mxu0 %v3076_v8  ;;  %2289 = vmatprep.subr.bf16.mxu1 %v3079_v9  ;;  %v3167_v8 = vld [vmem:[%s4246_s1 + $0x600] ss:$16 sps:$4 sm:$0xff]   ;;  %v3170_v9 = vld [vmem:[%s4246_s1 + $0x608] ss:$16 sps:$4 sm:$0xff]  }
  0x89   : > { %2104 = vmatprep.mubr.bf16.mxu0 %v3166_v12  ;;  %2319 = vmatprep.mubr.bf16.mxu1 %v3166_v12  ;;  %v3265_v12 = vld [vmem:[%s3495_s13 + $0x1c] ss:$36 sps:$4 sm:$0xff]  }
  0x8b   : > { %2075 = vmatpush1.bf16.msra.mxu0 %v3074_v10  ;;  %2290 = vmatpush1.bf16.msra.mxu1 %v3077_v11  ;;  %v3175_v10 = vld [vmem:[%s4246_s1 + $0x624] ss:$16 sps:$4 sm:$0xff]   ;;  %v3178_v11 = vld [vmem:[%s4246_s1 + $0x62c] ss:$16 sps:$4 sm:$0xff]  }
  0x8c   : > { %2076 = vmatprep.subr.bf16.mxu0 %v3082_v13  ;;  %2291 = vmatprep.subr.bf16.mxu1 %v3085_v14  ;;  %v3173_v13 = vld [vmem:[%s4246_s1 + $0x620] ss:$16 sps:$4 sm:$0xff]   ;;  %v3176_v14 = vld [vmem:[%s4246_s1 + $0x628] ss:$16 sps:$4 sm:$0xff]  }
  0x8f   : > { %2077 = vmatpush1.bf16.msra.mxu0 %v3080_v15  ;;  %2292 = vmatpush1.bf16.msra.mxu1 %v3083_v16  ;;  %v3181_v15 = vld [vmem:[%s4246_s1 + $0x644] ss:$16 sps:$4 sm:$0xff]   ;;  %v3184_v16 = vld [vmem:[%s4246_s1 + $0x64c] ss:$16 sps:$4 sm:$0xff]  }
  0x90   : > { %2078 = vmatprep.subr.bf16.mxu0 %v3088_v17  ;;  %2293 = vmatprep.subr.bf16.mxu1 %v3091_v18  ;;  %v3179_v17 = vld [vmem:[%s4246_s1 + $0x640] ss:$16 sps:$4 sm:$0xff]   ;;  %v3182_v18 = vld [vmem:[%s4246_s1 + $0x648] ss:$16 sps:$4 sm:$0xff]  }
  0x93   : > { %2079 = vmatpush1.bf16.msra.mxu0 %v3086_v19  ;;  %2294 = vmatpush1.bf16.msra.mxu1 %v3089_v20  ;;  %v3187_v19 = vld [vmem:[%s4246_s1 + $0x664] ss:$16 sps:$4 sm:$0xff]   ;;  %v3190_v20 = vld [vmem:[%s4246_s1 + $0x66c] ss:$16 sps:$4 sm:$0xff]  }
  0x94   : > { %2080 = vmatprep.subr.bf16.mxu0 %v3094_v21  ;;  %2295 = vmatprep.subr.bf16.mxu1 %v3097_v22  ;;  %v3185_v21 = vld [vmem:[%s4246_s1 + $0x660] ss:$16 sps:$4 sm:$0xff]   ;;  %v3188_v22 = vld [vmem:[%s4246_s1 + $0x668] ss:$16 sps:$4 sm:$0xff]  }
  0x97   : > { %2081 = vmatpush1.bf16.msra.mxu0 %v3092_v23  ;;  %2296 = vmatpush1.bf16.msra.mxu1 %v3095_v24  ;;  %v3193_v23 = vld [vmem:[%s4246_s1 + $0x684] ss:$16 sps:$4 sm:$0xff]   ;;  %v3196_v24 = vld [vmem:[%s4246_s1 + $0x68c] ss:$16 sps:$4 sm:$0xff]  }
  0x98   : > { %2082 = vmatprep.subr.bf16.mxu0 %v3100_v25  ;;  %2297 = vmatprep.subr.bf16.mxu1 %v3103_v26  ;;  %v3191_v25 = vld [vmem:[%s4246_s1 + $0x680] ss:$16 sps:$4 sm:$0xff]   ;;  %v3194_v26 = vld [vmem:[%s4246_s1 + $0x688] ss:$16 sps:$4 sm:$0xff]  }
  0x9b   : > { %2083 = vmatpush1.bf16.msra.mxu0 %v3098_v27  ;;  %2298 = vmatpush1.bf16.msra.mxu1 %v3101_v28  ;;  %v3199_v27 = vld [vmem:[%s4246_s1 + $0x6a4] ss:$16 sps:$4 sm:$0xff]   ;;  %v3202_v28 = vld [vmem:[%s4246_s1 + $0x6ac] ss:$16 sps:$4 sm:$0xff]  }
  0x9c   : > { %2084 = vmatprep.subr.bf16.mxu0 %v3106_v29  ;;  %2299 = vmatprep.subr.bf16.mxu1 %v3109_v30  ;;  %v3197_v29 = vld [vmem:[%s4246_s1 + $0x6a0] ss:$16 sps:$4 sm:$0xff]   ;;  %v3200_v30 = vld [vmem:[%s4246_s1 + $0x6a8] ss:$16 sps:$4 sm:$0xff]  }
  0x9f   : > { %2085 = vmatpush1.bf16.msra.mxu0 %v3104_v31  ;;  %2300 = vmatpush1.bf16.msra.mxu1 %v3107_v32  ;;  %v3205_v31 = vld [vmem:[%s4246_s1 + $0x6c4] ss:$16 sps:$4 sm:$0xff]   ;;  %v3208_v32 = vld [vmem:[%s4246_s1 + $0x6cc] ss:$16 sps:$4 sm:$0xff]  }
  0xa0   : > { %2086 = vmatprep.subr.bf16.mxu0 %v3112_v33  ;;  %2301 = vmatprep.subr.bf16.mxu1 %v3115_v34  ;;  %v3203_v33 = vld [vmem:[%s4246_s1 + $0x6c0] ss:$16 sps:$4 sm:$0xff]   ;;  %v3206_v34 = vld [vmem:[%s4246_s1 + $0x6c8] ss:$16 sps:$4 sm:$0xff]  }
  0xa3   : > { %2087 = vmatpush1.bf16.msra.mxu0 %v3110_v35  ;;  %2302 = vmatpush1.bf16.msra.mxu1 %v3113_v36  ;;  %v3211_v35 = vld [vmem:[%s4246_s1 + $0x6e4] ss:$16 sps:$4 sm:$0xff]   ;;  %v3214_v36 = vld [vmem:[%s4246_s1 + $0x6ec] ss:$16 sps:$4 sm:$0xff]  }
  0xa4   : > { %2088 = vmatprep.subr.bf16.mxu0 %v3118_v37  ;;  %2303 = vmatprep.subr.bf16.mxu1 %v3121_v38  ;;  %v3209_v37 = vld [vmem:[%s4246_s1 + $0x6e0] ss:$16 sps:$4 sm:$0xff]   ;;  %v3212_v38 = vld [vmem:[%s4246_s1 + $0x6e8] ss:$16 sps:$4 sm:$0xff]  }
  0xa7   : > { %2089 = vmatpush1.bf16.msra.mxu0 %v3116_v39  ;;  %2304 = vmatpush1.bf16.msra.mxu1 %v3119_v40  ;;  %v3217_v39 = vld [vmem:[%s4246_s1 + $0x704] ss:$16 sps:$4 sm:$0xff]   ;;  %v3220_v40 = vld [vmem:[%s4246_s1 + $0x70c] ss:$16 sps:$4 sm:$0xff]  }
  0xa8   : > { %2090 = vmatprep.subr.bf16.mxu0 %v3124_v41  ;;  %2305 = vmatprep.subr.bf16.mxu1 %v3127_v42  ;;  %v3215_v41 = vld [vmem:[%s4246_s1 + $0x700] ss:$16 sps:$4 sm:$0xff]   ;;  %v3218_v42 = vld [vmem:[%s4246_s1 + $0x708] ss:$16 sps:$4 sm:$0xff]  }
  0xab   : > { %2091 = vmatpush1.bf16.msra.mxu0 %v3122_v43  ;;  %2306 = vmatpush1.bf16.msra.mxu1 %v3125_v44  ;;  %v3223_v43 = vld [vmem:[%s4246_s1 + $0x724] ss:$16 sps:$4 sm:$0xff]   ;;  %v3226_v44 = vld [vmem:[%s4246_s1 + $0x72c] ss:$16 sps:$4 sm:$0xff]  }
  0xac   : > { %2092 = vmatprep.subr.bf16.mxu0 %v3130_v45  ;;  %2307 = vmatprep.subr.bf16.mxu1 %v3133_v46  ;;  %v3221_v45 = vld [vmem:[%s4246_s1 + $0x720] ss:$16 sps:$4 sm:$0xff]   ;;  %v3224_v46 = vld [vmem:[%s4246_s1 + $0x728] ss:$16 sps:$4 sm:$0xff]  }
  0xaf   : > { %2093 = vmatpush1.bf16.msra.mxu0 %v3128_v47  ;;  %2308 = vmatpush1.bf16.msra.mxu1 %v3131_v48  ;;  %v3229_v47 = vld [vmem:[%s4246_s1 + $0x744] ss:$16 sps:$4 sm:$0xff]   ;;  %v3232_v48 = vld [vmem:[%s4246_s1 + $0x74c] ss:$16 sps:$4 sm:$0xff]  }
  0xb0   : > { %2094 = vmatprep.subr.bf16.mxu0 %v3136_v49  ;;  %2309 = vmatprep.subr.bf16.mxu1 %v3139_v50  ;;  %v3227_v49 = vld [vmem:[%s4246_s1 + $0x740] ss:$16 sps:$4 sm:$0xff]   ;;  %v3230_v50 = vld [vmem:[%s4246_s1 + $0x748] ss:$16 sps:$4 sm:$0xff]  }
  0xb3   : > { %2095 = vmatpush1.bf16.msra.mxu0 %v3134_v51  ;;  %2310 = vmatpush1.bf16.msra.mxu1 %v3137_v52  ;;  %v3235_v51 = vld [vmem:[%s4246_s1 + $0x764] ss:$16 sps:$4 sm:$0xff]   ;;  %v3238_v52 = vld [vmem:[%s4246_s1 + $0x76c] ss:$16 sps:$4 sm:$0xff]  }
  0xb4   : > { %2096 = vmatprep.subr.bf16.mxu0 %v3142_v53  ;;  %2311 = vmatprep.subr.bf16.mxu1 %v3145_v54  ;;  %v3233_v53 = vld [vmem:[%s4246_s1 + $0x760] ss:$16 sps:$4 sm:$0xff]   ;;  %v3236_v54 = vld [vmem:[%s4246_s1 + $0x768] ss:$16 sps:$4 sm:$0xff]  }
  0xb7   : > { %2097 = vmatpush1.bf16.msra.mxu0 %v3140_v55  ;;  %2312 = vmatpush1.bf16.msra.mxu1 %v3143_v56  ;;  %v3241_v55 = vld [vmem:[%s4246_s1 + $0x784] ss:$16 sps:$4 sm:$0xff]   ;;  %v3244_v56 = vld [vmem:[%s4246_s1 + $0x78c] ss:$16 sps:$4 sm:$0xff]  }
  0xb8   : > { %2098 = vmatprep.subr.bf16.mxu0 %v3148_v57  ;;  %2313 = vmatprep.subr.bf16.mxu1 %v3151_v58  ;;  %v3239_v57 = vld [vmem:[%s4246_s1 + $0x780] ss:$16 sps:$4 sm:$0xff]   ;;  %v3242_v58 = vld [vmem:[%s4246_s1 + $0x788] ss:$16 sps:$4 sm:$0xff]  }
  0xbb   : > { %2099 = vmatpush1.bf16.msra.mxu0 %v3146_v59  ;;  %2314 = vmatpush1.bf16.msra.mxu1 %v3149_v60  ;;  %v3247_v59 = vld [vmem:[%s4246_s1 + $0x7a4] ss:$16 sps:$4 sm:$0xff]   ;;  %v3250_v60 = vld [vmem:[%s4246_s1 + $0x7ac] ss:$16 sps:$4 sm:$0xff]  }
  0xbc   : > { %2100 = vmatprep.subr.bf16.mxu0 %v3154_v61  ;;  %2315 = vmatprep.subr.bf16.mxu1 %v3157_v62  ;;  %v3245_v61 = vld [vmem:[%s4246_s1 + $0x7a0] ss:$16 sps:$4 sm:$0xff]   ;;  %v3248_v62 = vld [vmem:[%s4246_s1 + $0x7a8] ss:$16 sps:$4 sm:$0xff]  }
  0xbf   : > { %2101 = vmatpush1.bf16.msra.mxu0 %v3152_v63  ;;  %2316 = vmatpush1.bf16.msra.mxu1 %v3155_v0  ;;  %v3253_v63 = vld [vmem:[%s4246_s1 + $0x7c4] ss:$16 sps:$4 sm:$0xff]   ;;  %v3256_v0 = vld [vmem:[%s4246_s1 + $0x7cc] ss:$16 sps:$4 sm:$0xff]  }
  0xc0   : > { %2102 = vmatprep.subr.bf16.mxu0 %v3160_v1  ;;  %2317 = vmatprep.subr.bf16.mxu1 %v3163_v2  ;;  %v3251_v1 = vld [vmem:[%s4246_s1 + $0x7c0] ss:$16 sps:$4 sm:$0xff]   ;;  %v3254_v2 = vld [vmem:[%s4246_s1 + $0x7c8] ss:$16 sps:$4 sm:$0xff]  }
  0xc3   : > { %2103 = vmatpush1.bf16.msra.mxu0 %v3158_v3  ;;  %2318 = vmatpush1.bf16.msra.mxu1 %v3161_v4  ;;  %v3259_v3 = vld [vmem:[%s4246_s1 + $0x7e4] ss:$16 sps:$4 sm:$0xff]   ;;  %v3262_v4 = vld [vmem:[%s4246_s1 + $0x7ec] ss:$16 sps:$4 sm:$0xff]  }
  0xc4   : > { %2115 = vmatprep.subr.bf16.mxu0 %v3169_v5  ;;  %2330 = vmatprep.subr.bf16.mxu1 %v3172_v6  ;;  %v3257_v5 = vld [vmem:[%s4246_s1 + $0x7e0] ss:$16 sps:$4 sm:$0xff]   ;;  %v3260_v6 = vld [vmem:[%s4246_s1 + $0x7e8] ss:$16 sps:$4 sm:$0xff]  }
  0xc6   : > { %2105 = vmatmul.mubr.bf16.vlgmr.msra.gmra.mrb[0].mxu0 %v3164_v7  ;;  %2320 = vmatmul.mubr.bf16.vlgmr.msra.gmra.mrb[0].mxu1 %v3164_v7  ;;  %v3268_v7 = vld [vmem:[%s4246_s1 + $0x804] ss:$16 sps:$4 sm:$0xff]  }
  0xc7   : > { %2116 = vmatpush1.bf16.msra.mxu0 %v3167_v8  ;;  %2331 = vmatpush1.bf16.msra.mxu1 %v3170_v9  ;;  %v3271_v8 = vld [vmem:[%s4246_s1 + $0x80c] ss:$16 sps:$4 sm:$0xff]  }
  0xc8   : > { %2117 = vmatprep.subr.bf16.mxu0 %v3175_v10  ;;  %2332 = vmatprep.subr.bf16.mxu1 %v3178_v11  ;;  %v3263_v9 = vld [vmem:[%s3495_s13 + $0x18] ss:$36 sps:$4 sm:$0xff]   ;;  %v3266_v10 = vld [vmem:[%s4246_s1 + $0x800] ss:$16 sps:$4 sm:$0xff]  }
  0xc9   : > { %2147 = vmatprep.mubr.bf16.mxu0 %v3265_v12  ;;  %2362 = vmatprep.mubr.bf16.mxu1 %v3265_v12  ;;  %v3269_v11 = vld [vmem:[%s4246_s1 + $0x808] ss:$16 sps:$4 sm:$0xff]   ;;  %v3274_v12 = vld [vmem:[%s4246_s1 + $0x824] ss:$16 sps:$4 sm:$0xff]  }
  0xcb   : > { %2118 = vmatpush1.bf16.msra.mxu0 %v3173_v13  ;;  %2333 = vmatpush1.bf16.msra.mxu1 %v3176_v14  ;;  %v3277_v13 = vld [vmem:[%s4246_s1 + $0x82c] ss:$16 sps:$4 sm:$0xff]   ;;  %v3272_v14 = vld [vmem:[%s4246_s1 + $0x820] ss:$16 sps:$4 sm:$0xff]  }
  0xcc   : > { %2119 = vmatprep.subr.bf16.mxu0 %v3181_v15  ;;  %2334 = vmatprep.subr.bf16.mxu1 %v3184_v16  ;;  %v3275_v15 = vld [vmem:[%s4246_s1 + $0x828] ss:$16 sps:$4 sm:$0xff]   ;;  %v3280_v16 = vld [vmem:[%s4246_s1 + $0x844] ss:$16 sps:$4 sm:$0xff]  }
  0xcf   : > { %2120 = vmatpush1.bf16.msra.mxu0 %v3179_v17  ;;  %2335 = vmatpush1.bf16.msra.mxu1 %v3182_v18  ;;  %v3283_v17 = vld [vmem:[%s4246_s1 + $0x84c] ss:$16 sps:$4 sm:$0xff]   ;;  %v3323_v18 = vmov 0  }
  0xd0   : > { %2121 = vmatprep.subr.bf16.mxu0 %v3187_v19  ;;  %2336 = vmatprep.subr.bf16.mxu1 %v3190_v20  ;;  %v3278_v19 = vld [vmem:[%s4246_s1 + $0x840] ss:$16 sps:$4 sm:$0xff]   ;;  %v3281_v20 = vld [vmem:[%s4246_s1 + $0x848] ss:$16 sps:$4 sm:$0xff]  }
  0xd3   : > { %2122 = vmatpush1.bf16.msra.mxu0 %v3185_v21  ;;  %2337 = vmatpush1.bf16.msra.mxu1 %v3188_v22  ;;  %v3286_v21 = vld [vmem:[%s4246_s1 + $0x864] ss:$16 sps:$4 sm:$0xff]   ;;  %v3289_v22 = vld [vmem:[%s4246_s1 + $0x86c] ss:$16 sps:$4 sm:$0xff]  }
  0xd4   : > { %2123 = vmatprep.subr.bf16.mxu0 %v3193_v23  ;;  %2338 = vmatprep.subr.bf16.mxu1 %v3196_v24  ;;  %v3284_v23 = vld [vmem:[%s4246_s1 + $0x860] ss:$16 sps:$4 sm:$0xff]   ;;  %v3287_v24 = vld [vmem:[%s4246_s1 + $0x868] ss:$16 sps:$4 sm:$0xff]  }
  0xd7   : > { %2124 = vmatpush1.bf16.msra.mxu0 %v3191_v25  ;;  %2339 = vmatpush1.bf16.msra.mxu1 %v3194_v26  ;;  %v3292_v25 = vld [vmem:[%s4246_s1 + $0x884] ss:$16 sps:$4 sm:$0xff]   ;;  %v3295_v26 = vld [vmem:[%s4246_s1 + $0x88c] ss:$16 sps:$4 sm:$0xff]  }
  0xd8   : > { %2125 = vmatprep.subr.bf16.mxu0 %v3199_v27  ;;  %2340 = vmatprep.subr.bf16.mxu1 %v3202_v28  ;;  %v3290_v27 = vld [vmem:[%s4246_s1 + $0x880] ss:$16 sps:$4 sm:$0xff]   ;;  %v3293_v28 = vld [vmem:[%s4246_s1 + $0x888] ss:$16 sps:$4 sm:$0xff]  }
  0xdb   : > { %2126 = vmatpush1.bf16.msra.mxu0 %v3197_v29  ;;  %2341 = vmatpush1.bf16.msra.mxu1 %v3200_v30  ;;  %v3298_v29 = vld [vmem:[%s4246_s1 + $0x8a4] ss:$16 sps:$4 sm:$0xff]   ;;  %v3301_v30 = vld [vmem:[%s4246_s1 + $0x8ac] ss:$16 sps:$4 sm:$0xff]  }
  0xdc   : > { %2127 = vmatprep.subr.bf16.mxu0 %v3205_v31  ;;  %2342 = vmatprep.subr.bf16.mxu1 %v3208_v32  ;;  %v3296_v31 = vld [vmem:[%s4246_s1 + $0x8a0] ss:$16 sps:$4 sm:$0xff]   ;;  %v3299_v32 = vld [vmem:[%s4246_s1 + $0x8a8] ss:$16 sps:$4 sm:$0xff]  }
  0xdf   : > { %2128 = vmatpush1.bf16.msra.mxu0 %v3203_v33  ;;  %2343 = vmatpush1.bf16.msra.mxu1 %v3206_v34  ;;  %v3304_v33 = vld [vmem:[%s4246_s1 + $0x8c4] ss:$16 sps:$4 sm:$0xff]   ;;  %v3307_v34 = vld [vmem:[%s4246_s1 + $0x8cc] ss:$16 sps:$4 sm:$0xff]  }
  0xe0   : > { %2129 = vmatprep.subr.bf16.mxu0 %v3211_v35  ;;  %2344 = vmatprep.subr.bf16.mxu1 %v3214_v36  ;;  %v3302_v35 = vld [vmem:[%s4246_s1 + $0x8c0] ss:$16 sps:$4 sm:$0xff]   ;;  %v3305_v36 = vld [vmem:[%s4246_s1 + $0x8c8] ss:$16 sps:$4 sm:$0xff]  }
  0xe3   : > { %2130 = vmatpush1.bf16.msra.mxu0 %v3209_v37  ;;  %2345 = vmatpush1.bf16.msra.mxu1 %v3212_v38  ;;  %v3310_v37 = vld [vmem:[%s4246_s1 + $0x8e4] ss:$16 sps:$4 sm:$0xff]   ;;  %v3313_v38 = vld [vmem:[%s4246_s1 + $0x8ec] ss:$16 sps:$4 sm:$0xff]  }
  0xe4   : > { %2131 = vmatprep.subr.bf16.mxu0 %v3217_v39  ;;  %2346 = vmatprep.subr.bf16.mxu1 %v3220_v40  ;;  %v3308_v39 = vld [vmem:[%s4246_s1 + $0x8e0] ss:$16 sps:$4 sm:$0xff]   ;;  %v3311_v40 = vld [vmem:[%s4246_s1 + $0x8e8] ss:$16 sps:$4 sm:$0xff]  }
  0xe7   : > { %2132 = vmatpush1.bf16.msra.mxu0 %v3215_v41  ;;  %2347 = vmatpush1.bf16.msra.mxu1 %v3218_v42  ;;  %v3314_v41 = vld [vmem:[%s3495_s13 + $0x20] ss:$36 sps:$4 sm:$0xff]   ;;  %v480_v42 = vlaneseq  ;;  %s2815_s13 = sshll.u32 %s4250_s24, 4 }
  0xe8   : > { %2133 = vmatprep.subr.bf16.mxu0 %v3223_v43  ;;  %2348 = vmatprep.subr.bf16.mxu1 %v3226_v44  ;;  %s177_s18 = scalar_lea.vmem %s4248_s3, %s2815_s13 }
  0xe9   : > { %v481_v43 = vshrl.u32 %v480_v42, 7 }
  0xeb   : > { %2134 = vmatpush1.bf16.msra.mxu0 %v3221_v45  ;;  %2349 = vmatpush1.bf16.msra.mxu1 %v3224_v46  ;;  %v482_v44 = vsub.s32 0, %v481_v43  ;;  %v490_v45 = vsub.s32 2, %v481_v43  ;;  %v478_v46 = vld [vmem:[%s4247_s2] sm:$0xf] }
  0xec   : > { %2135 = vmatprep.subr.bf16.mxu0 %v3229_v47  ;;  %2350 = vmatprep.subr.bf16.mxu1 %v3232_v48  ;;  %v486_v47 = vsub.s32 1, %v481_v43  ;;  %v494_v48 = vsub.s32 3, %v481_v43 }
  0xef   : > { %2136 = vmatpush1.bf16.msra.mxu0 %v3227_v49  ;;  %2351 = vmatpush1.bf16.msra.mxu1 %v3230_v50  ;;  %v483_v49 = vrot.slane %v478_v46, %v482_v44  ;;  %v491_v50 = vrot.slane %v478_v46, %v490_v45 }
  0xf0   : > { %2137 = vmatprep.subr.bf16.mxu0 %v3235_v51  ;;  %2352 = vmatprep.subr.bf16.mxu1 %v3238_v52  ;;  %v487_v51 = vrot.slane %v478_v46, %v486_v47  ;;  %v495_v52 = vrot.slane %v478_v46, %v494_v48 }
  0xf3   : > { %2138 = vmatpush1.bf16.msra.mxu0 %v3233_v53  ;;  %2353 = vmatpush1.bf16.msra.mxu1 %v3236_v54 }
  0xf4   : > { %2139 = vmatprep.subr.bf16.mxu0 %v3241_v55  ;;  %2354 = vmatprep.subr.bf16.mxu1 %v3244_v56 }
  0xf7   : > { %2140 = vmatpush1.bf16.msra.mxu0 %v3239_v57  ;;  %2355 = vmatpush1.bf16.msra.mxu1 %v3242_v58 }
  0xf8   : > { %2141 = vmatprep.subr.bf16.mxu0 %v3247_v59  ;;  %2356 = vmatprep.subr.bf16.mxu1 %v3250_v60 }
  0xfb   : > { %2142 = vmatpush1.bf16.msra.mxu0 %v3245_v61  ;;  %2357 = vmatpush1.bf16.msra.mxu1 %v3248_v62 }
  0xfc   : > { %2143 = vmatprep.subr.bf16.mxu0 %v3253_v63  ;;  %2358 = vmatprep.subr.bf16.mxu1 %v3256_v0 }
  0xff   : > { %2144 = vmatpush1.bf16.msra.mxu0 %v3251_v1  ;;  %2359 = vmatpush1.bf16.msra.mxu1 %v3254_v2 }
 0x100   : > { %2145 = vmatprep.subr.bf16.mxu0 %v3259_v3  ;;  %2360 = vmatprep.subr.bf16.mxu1 %v3262_v4 }
 0x103   : > { %2146 = vmatpush1.bf16.msra.mxu0 %v3257_v5  ;;  %2361 = vmatpush1.bf16.msra.mxu1 %v3260_v6 }
 0x104   : > { %2158 = vmatprep.subr.bf16.mxu0 %v3268_v7  ;;  %2373 = vmatprep.subr.bf16.mxu1 %v3271_v8 }
 0x106   : > { %2148 = vmatmul.mubr.bf16.vlgmr.msra.gmra.mrb[0].mxu0 %v3263_v9  ;;  %2363 = vmatmul.mubr.bf16.vlgmr.msra.gmra.mrb[0].mxu1 %v3263_v9 }
 0x107   : > { %2159 = vmatpush1.bf16.msra.mxu0 %v3266_v10  ;;  %2374 = vmatpush1.bf16.msra.mxu1 %v3269_v11 }
 0x108   : > { %2160 = vmatprep.subr.bf16.mxu0 %v3274_v12  ;;  %2375 = vmatprep.subr.bf16.mxu1 %v3277_v13 }
 0x109   : > { %2190 = vmatprep.mubr.bf16.mxu0 %v3323_v18  ;;  %2405 = vmatprep.mubr.bf16.mxu1 %v3323_v18 }
 0x10b   : > { %2161 = vmatpush1.bf16.msra.mxu0 %v3272_v14  ;;  %2376 = vmatpush1.bf16.msra.mxu1 %v3275_v15 }
 0x10c   : > { %2162 = vmatprep.subr.bf16.mxu0 %v3280_v16  ;;  %2377 = vmatprep.subr.bf16.mxu1 %v3283_v17 }
 0x10f   : > { %2163 = vmatpush1.bf16.msra.mxu0 %v3278_v19  ;;  %2378 = vmatpush1.bf16.msra.mxu1 %v3281_v20 }
 0x110   : > { %2164 = vmatprep.subr.bf16.mxu0 %v3286_v21  ;;  %2379 = vmatprep.subr.bf16.mxu1 %v3289_v22 }
 0x113   : > { %2165 = vmatpush1.bf16.msra.mxu0 %v3284_v23  ;;  %2380 = vmatpush1.bf16.msra.mxu1 %v3287_v24 }
 0x114   : > { %2166 = vmatprep.subr.bf16.mxu0 %v3292_v25  ;;  %2381 = vmatprep.subr.bf16.mxu1 %v3295_v26 }
 0x117   : > { %2167 = vmatpush1.bf16.msra.mxu0 %v3290_v27  ;;  %2382 = vmatpush1.bf16.msra.mxu1 %v3293_v28 }
 0x118   : > { %2168 = vmatprep.subr.bf16.mxu0 %v3298_v29  ;;  %2383 = vmatprep.subr.bf16.mxu1 %v3301_v30 }
 0x11b   : > { %2169 = vmatpush1.bf16.msra.mxu0 %v3296_v31  ;;  %2384 = vmatpush1.bf16.msra.mxu1 %v3299_v32 }
 0x11c   : > { %2170 = vmatprep.subr.bf16.mxu0 %v3304_v33  ;;  %2385 = vmatprep.subr.bf16.mxu1 %v3307_v34 }
 0x11f   : > { %2171 = vmatpush1.bf16.msra.mxu0 %v3302_v35  ;;  %2386 = vmatpush1.bf16.msra.mxu1 %v3305_v36 }
 0x120   : > { %2172 = vmatprep.subr.bf16.mxu0 %v3310_v37  ;;  %2387 = vmatprep.subr.bf16.mxu1 %v3313_v38 }
 0x123   : > { %2173 = vmatpush1.bf16.msra.mxu0 %v3308_v39  ;;  %2388 = vmatpush1.bf16.msra.mxu1 %v3311_v40 }
 0x126   : > { %2191 = vmatmul.mubr.bf16.vlgmr.msra.gmra.mrb[0].mxu0 %v3314_v41  ;;  %2406 = vmatmul.mubr.bf16.vlgmr.msra.gmra.mrb[0].mxu1 %v3314_v41 }
 0x1f9   : > { %v2192_v53 = vpop.f32.mrb[0].mxu0  ;;  %v2407_v54 = vpop.f32.mrb[0].mxu1 }
 0x1fa   : > { %v2820_v55 = vadd.f32 %v2192_v53, %v483_v49  ;;  %v2824_v56 = vadd.f32 %v2407_v54, %v491_v50  ;;  %v2194_v57 = vpop.f32.mrb[1].mxu0  ;;  %v2409_v58 = vpop.f32.mrb[1].mxu1 }
 0x1fb   : > { %v2821_v59 = vadd.f32 %v2194_v57, %v487_v51  ;;  %v2825_v60 = vadd.f32 %v2409_v58, %v495_v52  ;;  %v2196_v61 = vpop.f32.mrb[2].mxu0  ;;  %v2411_v62 = vpop.f32.mrb[2].mxu1 }
 0x1fc   : > { %v2822_v63 = vadd.f32 %v2196_v61, %v483_v49  ;;  %v2826_v0 = vadd.f32 %v2411_v62, %v491_v50  ;;  %v2198_v1 = vpop.f32.mrb[3].mxu0  ;;  %v2413_v2 = vpop.f32.mrb[3].mxu1 }
 0x1fd   : > { %v2816_v3 = vpack.c.bf16 %v2821_v59, %v2820_v55  ;;  %v2817_v4 = vpack.c.bf16 %v2825_v60, %v2824_v56  ;;  %v2823_v5 = vadd.f32 %v2198_v1, %v487_v51  ;;  %v2827_v6 = vadd.f32 %v2413_v2, %v495_v52 }
 0x1ff   : > { %2440 = vst [vmem:[%s177_s18] sm:$0xff] %v2816_v3  ;;  %2441 = vst [vmem:[%s177_s18 + $0x8] sm:$0xff] %v2817_v4  ;;  %v2818_v7 = vpack.c.bf16 %v2823_v5, %v2822_v63  ;;  %v2819_v8 = vpack.c.bf16 %v2827_v6, %v2826_v0 }
 0x201   : > { %2442 = vst [vmem:[%s177_s18 + $0x10] sm:$0xff] %v2818_v7  ;;  %2443 = vst [vmem:[%s177_s18 + $0x18] sm:$0xff] %v2819_v8 }
 0x202 PF: > { %s13_s12 = sadd.s32 1, %s3321_s12  }
 0x203   : > { %p10_p4 = scmp.ge.s32.totalorder %s13_s12, 4  }
 0x205   :  { %12 = sbr.rel (!%p10_p4) target bundleno = 1 (0x1), region = 62 }

// kernel: multi_target_adversarial_network.9
= control target key start
LH: loop header
LB: loop body
LE: loop exit
PB: predicated region body
PF: predicated region fallthrough
CT: control target
= control target key end

     0   :  { %s3994_s12 = smov 0   ;;  %s4996_s0 = inlined_call_operand.vmem [shape: bf16[128,1152], index: 0, kind: input, shape index: {}]   ;;  %s4997_s1 = inlined_call_operand.vmem [shape: bf16[1152,512], index: 1, kind: input, shape index: {}]   ;;  %s4998_s2 = inlined_call_operand.vmem [shape: f32[1,512], index: 2, kind: input, shape index: {}]   ;;  %s4999_s3 = inlined_call_operand.vmem [shape: f32[128,512], index: 3, kind: output, shape index: {}]  }
   0x1 LB: > { %s2974_s13 = sadd.s32 4294967295, %s3971_s12   ;;  %p2978_p0 = scmp.ge.s32.totalorder %s3971_s12, 1  ;;  %s3971_s12 = sphi %s3994_s12, %s13_s12  }
   0x2   : > { %p139_p1 = scmp.lt.s32.totalorder %s3971_s12, 3 }
   0x4   : > { %p140_p2 = pnand %p2978_p0, %p139_p1 }
   0x5   : > { %v3481_v0 = vld [vmem:[%s4997_s1 + $0x4] ss:$16 sps:$4 sm:$0xff] (!%p140_p2)   ;;  %v3483_v1 = vld [vmem:[%s4997_s1 + $0xc] ss:$16 sps:$4 sm:$0xff] (!%p140_p2)   ;;  %v3485_v2 = vld [vmem:[%s4997_s1] ss:$16 sps:$4 sm:$0xff] (!%p140_p2)  }
   0x6   : > { %143 = sbr.rel (%p140_p2) target bundleno = 536 (0x218), region = 32  ;;  %2154 = vmatprep.subr.bf16.mxu0 (!%p140_p2), %v3481_v0  ;;  %v3486_v3 = vld [vmem:[%s4997_s1 + $0x8] ss:$16 sps:$4 sm:$0xff] (!%p140_p2)   ;;  %2519 = vmatprep.subr.bf16.mxu1 (!%p140_p2), %v3483_v1  ;;  %v3487_v4 = vld [vmem:[%s4997_s1 + $0x24] ss:$16 sps:$4 sm:$0xff] (!%p140_p2)   ;;  %s2979_s24 = sshll.u32 (!%p140_p2), %s2974_s13, 3 }
   0x7   : > { %2155 = vmatpush1.bf16.msra.mxu0 (!%p140_p2), %v3485_v2  ;;  %2520 = vmatpush1.bf16.msra.mxu1 (!%p140_p2), %v3486_v3  ;;  %v3489_v5 = vld [vmem:[%s4997_s1 + $0x2c] ss:$16 sps:$4 sm:$0xff] (!%p140_p2)   ;;  %v3491_v6 = vld [vmem:[%s4997_s1 + $0x20] ss:$16 sps:$4 sm:$0xff] (!%p140_p2)   ;;  %v3492_v7 = vld [vmem:[%s4997_s1 + $0x28] ss:$16 sps:$4 sm:$0xff] (!%p140_p2)  }
   0x8   : > { %2156 = vmatprep.subr.bf16.mxu0 (!%p140_p2), %v3487_v4  ;;  %2521 = vmatprep.subr.bf16.mxu1 (!%p140_p2), %v3489_v5  ;;  %v3493_v8 = vld [vmem:[%s4997_s1 + $0x44] ss:$16 sps:$4 sm:$0xff] (!%p140_p2)   ;;  %v3495_v9 = vld [vmem:[%s4997_s1 + $0x4c] ss:$16 sps:$4 sm:$0xff] (!%p140_p2)   ;;  %v3497_v10 = vld [vmem:[%s4997_s1 + $0x40] ss:$16 sps:$4 sm:$0xff] (!%p140_p2)  }
   0x9   : > { %v3498_v11 = vld [vmem:[%s4997_s1 + $0x48] ss:$16 sps:$4 sm:$0xff] (!%p140_p2)   ;;  %v3499_v12 = vld [vmem:[%s4997_s1 + $0x64] ss:$16 sps:$4 sm:$0xff] (!%p140_p2)   ;;  %v3501_v13 = vld [vmem:[%s4997_s1 + $0x6c] ss:$16 sps:$4 sm:$0xff] (!%p140_p2)  }
   0xa   : > { %v3503_v14 = vld [vmem:[%s4997_s1 + $0x60] ss:$16 sps:$4 sm:$0xff] (!%p140_p2)   ;;  %v3504_v15 = vld [vmem:[%s4997_s1 + $0x68] ss:$16 sps:$4 sm:$0xff] (!%p140_p2)   ;;  %v3505_v16 = vld [vmem:[%s4997_s1 + $0x84] ss:$16 sps:$4 sm:$0xff] (!%p140_p2)  }
   0xb   : > { %2157 = vmatpush1.bf16.msra.mxu0 (!%p140_p2), %v3491_v6  ;;  %2522 = vmatpush1.bf16.msra.mxu1 (!%p140_p2), %v3492_v7  ;;  %v3507_v17 = vld [vmem:[%s4997_s1 + $0x8c] ss:$16 sps:$4 sm:$0xff] (!%p140_p2)   ;;  %v3509_v18 = vld [vmem:[%s4997_s1 + $0x80] ss:$16 sps:$4 sm:$0xff] (!%p140_p2)   ;;  %v3510_v19 = vld [vmem:[%s4997_s1 + $0x88] ss:$16 sps:$4 sm:$0xff] (!%p140_p2)  }
   0xc   : > { %2158 = vmatprep.subr.bf16.mxu0 (!%p140_p2), %v3493_v8  ;;  %2523 = vmatprep.subr.bf16.mxu1 (!%p140_p2), %v3495_v9  ;;  %v3511_v20 = vld [vmem:[%s4997_s1 + $0xa4] ss:$16 sps:$4 sm:$0xff] (!%p140_p2)   ;;  %v3513_v21 = vld [vmem:[%s4997_s1 + $0xac] ss:$16 sps:$4 sm:$0xff] (!%p140_p2)   ;;  %v3515_v22 = vld [vmem:[%s4997_s1 + $0xa0] ss:$16 sps:$4 sm:$0xff] (!%p140_p2)  }
   0xd   : > { %v3516_v23 = vld [vmem:[%s4997_s1 + $0xa8] ss:$16 sps:$4 sm:$0xff]   ;;  %v3517_v24 = vld [vmem:[%s4997_s1 + $0xc4] ss:$16 sps:$4 sm:$0xff]   ;;  %v3519_v25 = vld [vmem:[%s4997_s1 + $0xcc] ss:$16 sps:$4 sm:$0xff]  }
   0xe   : > { %v3521_v26 = vld [vmem:[%s4997_s1 + $0xc0] ss:$16 sps:$4 sm:$0xff]   ;;  %v3522_v27 = vld [vmem:[%s4997_s1 + $0xc8] ss:$16 sps:$4 sm:$0xff]   ;;  %v3523_v28 = vld [vmem:[%s4997_s1 + $0xe4] ss:$16 sps:$4 sm:$0xff]  }
   0xf   : > { %2159 = vmatpush1.bf16.msra.mxu0 %v3497_v10  ;;  %2524 = vmatpush1.bf16.msra.mxu1 %v3498_v11  ;;  %v3525_v29 = vld [vmem:[%s4997_s1 + $0xec] ss:$16 sps:$4 sm:$0xff]   ;;  %v3527_v30 = vld [vmem:[%s4997_s1 + $0xe0] ss:$16 sps:$4 sm:$0xff]   ;;  %v3528_v31 = vld [vmem:[%s4997_s1 + $0xe8] ss:$16 sps:$4 sm:$0xff]  }
  0x10   : > { %2160 = vmatprep.subr.bf16.mxu0 %v3499_v12  ;;  %2525 = vmatprep.subr.bf16.mxu1 %v3501_v13  ;;  %v3529_v32 = vld [vmem:[%s4997_s1 + $0x104] ss:$16 sps:$4 sm:$0xff]   ;;  %p166_p3 = scmp.lt.s32.totalorder %s2979_s24, 15  ;;  %v3531_v33 = vld [vmem:[%s4997_s1 + $0x10c] ss:$16 sps:$4 sm:$0xff]  }
  0x11   : > { %v3533_v34 = vld [vmem:[%s4997_s1 + $0x100] ss:$16 sps:$4 sm:$0xff]   ;;  %v3534_v35 = vld [vmem:[%s4997_s1 + $0x108] ss:$16 sps:$4 sm:$0xff]   ;;  %v3535_v36 = vld [vmem:[%s4997_s1 + $0x124] ss:$16 sps:$4 sm:$0xff]  }
  0x12   : > { %s5001_s24 = smov (!%p166_p3, %s2979_s24), 15  ;;  %v3537_v37 = vld [vmem:[%s4997_s1 + $0x12c] ss:$16 sps:$4 sm:$0xff]   ;;  %v3539_v38 = vld [vmem:[%s4997_s1 + $0x120] ss:$16 sps:$4 sm:$0xff]  }
  0x13   : > { %2161 = vmatpush1.bf16.msra.mxu0 %v3503_v14  ;;  %2526 = vmatpush1.bf16.msra.mxu1 %v3504_v15  ;;  %v3540_v39 = vld [vmem:[%s4997_s1 + $0x128] ss:$16 sps:$4 sm:$0xff]   ;;  %v3541_v40 = vld [vmem:[%s4997_s1 + $0x144] ss:$16 sps:$4 sm:$0xff]   ;;  %s3471_s21 = smul.u32 36, %s5001_s24  ;;  %s3310_s16 = sshll.u32 %s5001_s24, 5 }
  0x14   : > { %2162 = vmatprep.subr.bf16.mxu0 %v3505_v16  ;;  %2527 = vmatprep.subr.bf16.mxu1 %v3507_v17  ;;  %v3543_v41 = vld [vmem:[%s4997_s1 + $0x14c] ss:$16 sps:$4 sm:$0xff]   ;;  %v3545_v42 = vld [vmem:[%s4997_s1 + $0x140] ss:$16 sps:$4 sm:$0xff]   ;;  %v3546_v43 = vld [vmem:[%s4997_s1 + $0x148] ss:$16 sps:$4 sm:$0xff]   ;;  %s4927_s18 = scalar_lea.vmem %s4999_s3, %s3310_s16 }
  0x15   : > { %v3547_v44 = vld [vmem:[%s4997_s1 + $0x164] ss:$16 sps:$4 sm:$0xff]   ;;  %s4145_s13 = scalar_lea.vmem %s4996_s0, %s3471_s21  ;;  %v3549_v45 = vld [vmem:[%s4997_s1 + $0x16c] ss:$16 sps:$4 sm:$0xff]   ;;  %v3551_v46 = vld [vmem:[%s4997_s1 + $0x160] ss:$16 sps:$4 sm:$0xff]  }
  0x16   : > { %v3552_v47 = vld [vmem:[%s4997_s1 + $0x168] ss:$16 sps:$4 sm:$0xff]   ;;  %v3553_v49 = vld [vmem:[%s4997_s1 + $0x184] ss:$16 sps:$4 sm:$0xff]   ;;  %v3555_v50 = vld [vmem:[%s4997_s1 + $0x18c] ss:$16 sps:$4 sm:$0xff]  }
  0x17   : > { %2163 = vmatpush1.bf16.msra.mxu0 %v3509_v18  ;;  %2528 = vmatpush1.bf16.msra.mxu1 %v3510_v19  ;;  %v3579_v48 = vld [vmem:[%s4145_s13 + $0x4] ss:$36 sps:$4 sm:$0xff]   ;;  %v3557_v51 = vld [vmem:[%s4997_s1 + $0x180] ss:$16 sps:$4 sm:$0xff]   ;;  %v3561_v54 = vld [vmem:[%s4997_s1 + $0x1ac] ss:$16 sps:$4 sm:$0xff]  }
  0x18   : > { %2164 = vmatprep.subr.bf16.mxu0 %v3511_v20  ;;  %2529 = vmatprep.subr.bf16.mxu1 %v3513_v21  ;;  %v3558_v52 = vld [vmem:[%s4997_s1 + $0x188] ss:$16 sps:$4 sm:$0xff]   ;;  %v3559_v53 = vld [vmem:[%s4997_s1 + $0x1a4] ss:$16 sps:$4 sm:$0xff]   ;;  %v3563_v55 = vld [vmem:[%s4997_s1 + $0x1a0] ss:$16 sps:$4 sm:$0xff]  }
  0x19   : > { %2186 = vmatprep.mubr.bf16.mxu0 %v3579_v48  ;;  %2551 = vmatprep.mubr.bf16.mxu1 %v3579_v48  ;;  %v3564_v56 = vld [vmem:[%s4997_s1 + $0x1a8] ss:$16 sps:$4 sm:$0xff]   ;;  %v3565_v57 = vld [vmem:[%s4997_s1 + $0x1c4] ss:$16 sps:$4 sm:$0xff]   ;;  %v3567_v58 = vld [vmem:[%s4997_s1 + $0x1cc] ss:$16 sps:$4 sm:$0xff]  }
  0x1a   : > { %v3569_v59 = vld [vmem:[%s4997_s1 + $0x1c0] ss:$16 sps:$4 sm:$0xff]   ;;  %v3570_v60 = vld [vmem:[%s4997_s1 + $0x1c8] ss:$16 sps:$4 sm:$0xff]   ;;  %v3571_v61 = vld [vmem:[%s4997_s1 + $0x1e4] ss:$16 sps:$4 sm:$0xff]  }
  0x1b   : > { %2165 = vmatpush1.bf16.msra.mxu0 %v3515_v22  ;;  %2530 = vmatpush1.bf16.msra.mxu1 %v3516_v23  ;;  %v3573_v62 = vld [vmem:[%s4997_s1 + $0x1ec] ss:$16 sps:$4 sm:$0xff]   ;;  %v3575_v63 = vld [vmem:[%s4997_s1 + $0x1e0] ss:$16 sps:$4 sm:$0xff]   ;;  %v3576_v0 = vld [vmem:[%s4997_s1 + $0x1e8] ss:$16 sps:$4 sm:$0xff]  }
  0x1c   : > { %2166 = vmatprep.subr.bf16.mxu0 %v3517_v24  ;;  %2531 = vmatprep.subr.bf16.mxu1 %v3519_v25  ;;  %v3582_v1 = vld [vmem:[%s4997_s1 + $0x204] ss:$16 sps:$4 sm:$0xff]   ;;  %v3585_v2 = vld [vmem:[%s4997_s1 + $0x20c] ss:$16 sps:$4 sm:$0xff]   ;;  %v3580_v4 = vld [vmem:[%s4997_s1 + $0x200] ss:$16 sps:$4 sm:$0xff]  }
  0x1d   : > { %v3577_v3 = vld [vmem:[%s4145_s13] ss:$36 sps:$4 sm:$0xff]   ;;  %v3583_v5 = vld [vmem:[%s4997_s1 + $0x208] ss:$16 sps:$4 sm:$0xff]   ;;  %v3591_v7 = vld [vmem:[%s4997_s1 + $0x22c] ss:$16 sps:$4 sm:$0xff]  }
  0x1e   : > { %v3588_v6 = vld [vmem:[%s4997_s1 + $0x224] ss:$16 sps:$4 sm:$0xff]   ;;  %v3586_v8 = vld [vmem:[%s4997_s1 + $0x220] ss:$16 sps:$4 sm:$0xff]   ;;  %v3589_v9 = vld [vmem:[%s4997_s1 + $0x228] ss:$16 sps:$4 sm:$0xff]  }
  0x1f   : > { %2167 = vmatpush1.bf16.msra.mxu0 %v3521_v26  ;;  %2532 = vmatpush1.bf16.msra.mxu1 %v3522_v27  ;;  %v3594_v10 = vld [vmem:[%s4997_s1 + $0x244] ss:$16 sps:$4 sm:$0xff]   ;;  %v3597_v11 = vld [vmem:[%s4997_s1 + $0x24c] ss:$16 sps:$4 sm:$0xff]   ;;  %v3592_v12 = vld [vmem:[%s4997_s1 + $0x240] ss:$16 sps:$4 sm:$0xff]  }
  0x20   : > { %2168 = vmatprep.subr.bf16.mxu0 %v3523_v28  ;;  %2533 = vmatprep.subr.bf16.mxu1 %v3525_v29  ;;  %v3640_v13 = vld [vmem:[%s4145_s13 + $0x4c] ss:$36 sps:$4 sm:$0xff]   ;;  %v3595_v14 = vld [vmem:[%s4997_s1 + $0x248] ss:$16 sps:$4 sm:$0xff]   ;;  %v3600_v15 = vld [vmem:[%s4997_s1 + $0x264] ss:$16 sps:$4 sm:$0xff]  }
  0x21   : > { %v3603_v16 = vld [vmem:[%s4997_s1 + $0x26c] ss:$16 sps:$4 sm:$0xff]   ;;  %v3598_v18 = vld [vmem:[%s4997_s1 + $0x260] ss:$16 sps:$4 sm:$0xff]   ;;  %v3601_v19 = vld [vmem:[%s4997_s1 + $0x268] ss:$16 sps:$4 sm:$0xff]  }
  0x22   : > { %v3648_v17 = vld [vmem:[%s4145_s13 + $0x48] ss:$36 sps:$4 sm:$0xff]   ;;  %v3606_v20 = vld [vmem:[%s4997_s1 + $0x284] ss:$16 sps:$4 sm:$0xff]   ;;  %v3604_v23 = vld [vmem:[%s4997_s1 + $0x280] ss:$16 sps:$4 sm:$0xff]  }
  0x23   : > { %2169 = vmatpush1.bf16.msra.mxu0 %v3527_v30  ;;  %2534 = vmatpush1.bf16.msra.mxu1 %v3528_v31  ;;  %v3609_v21 = vld [vmem:[%s4997_s1 + $0x28c] ss:$16 sps:$4 sm:$0xff]   ;;  %v3655_v22 = vld [vmem:[%s4145_s13 + $0x94] ss:$36 sps:$4 sm:$0xff]   ;;  %v3610_v27 = vld [vmem:[%s4997_s1 + $0x2a0] ss:$16 sps:$4 sm:$0xff]  }
  0x24   : > { %2170 = vmatprep.subr.bf16.mxu0 %v3529_v32  ;;  %2535 = vmatprep.subr.bf16.mxu1 %v3531_v33  ;;  %v3607_v24 = vld [vmem:[%s4997_s1 + $0x288] ss:$16 sps:$4 sm:$0xff]   ;;  %v3612_v25 = vld [vmem:[%s4997_s1 + $0x2a4] ss:$16 sps:$4 sm:$0xff]   ;;  %v3615_v26 = vld [vmem:[%s4997_s1 + $0x2ac] ss:$16 sps:$4 sm:$0xff]  }
  0x25   : > { %v3663_v28 = vld [vmem:[%s4145_s13 + $0x90] ss:$36 sps:$4 sm:$0xff]   ;;  %v3613_v29 = vld [vmem:[%s4997_s1 + $0x2a8] ss:$16 sps:$4 sm:$0xff]   ;;  %v3670_v31 = vld [vmem:[%s4145_s13 + $0xdc] ss:$36 sps:$4 sm:$0xff]  }
  0x26   : > { %v3618_v30 = vld [vmem:[%s4997_s1 + $0x2c4] ss:$16 sps:$4 sm:$0xff]   ;;  %v3621_v32 = vld [vmem:[%s4997_s1 + $0x2cc] ss:$16 sps:$4 sm:$0xff]   ;;  %v3616_v33 = vld [vmem:[%s4997_s1 + $0x2c0] ss:$16 sps:$4 sm:$0xff]  }
  0x27   : > { %2171 = vmatpush1.bf16.msra.mxu0 %v3533_v34  ;;  %2536 = vmatpush1.bf16.msra.mxu1 %v3534_v35  ;;  %v3619_v34 = vld [vmem:[%s4997_s1 + $0x2c8] ss:$16 sps:$4 sm:$0xff]   ;;  %v3624_v35 = vld [vmem:[%s4997_s1 + $0x2e4] ss:$16 sps:$4 sm:$0xff]  }
  0x28   : > { %2172 = vmatprep.subr.bf16.mxu0 %v3535_v36  ;;  %2537 = vmatprep.subr.bf16.mxu1 %v3537_v37  ;;  %v3627_v36 = vld [vmem:[%s4997_s1 + $0x2ec] ss:$16 sps:$4 sm:$0xff]   ;;  %v3622_v37 = vld [vmem:[%s4997_s1 + $0x2e0] ss:$16 sps:$4 sm:$0xff]   ;;  %v3637_v48 = vld [vmem:[%s4997_s1 + $0x328] ss:$16 sps:$4 sm:$0xff]  }
  0x2b   : > { %2173 = vmatpush1.bf16.msra.mxu0 %v3539_v38  ;;  %2538 = vmatpush1.bf16.msra.mxu1 %v3540_v39  ;;  %v3678_v38 = vld [vmem:[%s4145_s13 + $0xd8] ss:$36 sps:$4 sm:$0xff]  }
  0x2c   : > { %2174 = vmatprep.subr.bf16.mxu0 %v3541_v40  ;;  %2539 = vmatprep.subr.bf16.mxu1 %v3543_v41  ;;  %v3625_v39 = vld [vmem:[%s4997_s1 + $0x2e8] ss:$16 sps:$4 sm:$0xff]   ;;  %v3687_v40 = vld [vmem:[%s4145_s13 + $0xc] ss:$36 sps:$4 sm:$0xff]   ;;  %v3630_v41 = vld [vmem:[%s4997_s1 + $0x304] ss:$16 sps:$4 sm:$0xff]  }
  0x2f   : > { %2175 = vmatpush1.bf16.msra.mxu0 %v3545_v42  ;;  %2540 = vmatpush1.bf16.msra.mxu1 %v3546_v43  ;;  %v3633_v42 = vld [vmem:[%s4997_s1 + $0x30c] ss:$16 sps:$4 sm:$0xff]   ;;  %v3628_v43 = vld [vmem:[%s4997_s1 + $0x300] ss:$16 sps:$4 sm:$0xff]  }
  0x30   : > { %2176 = vmatprep.subr.bf16.mxu0 %v3547_v44  ;;  %2541 = vmatprep.subr.bf16.mxu1 %v3549_v45  ;;  %v3631_v44 = vld [vmem:[%s4997_s1 + $0x308] ss:$16 sps:$4 sm:$0xff]   ;;  %v3636_v45 = vld [vmem:[%s4997_s1 + $0x324] ss:$16 sps:$4 sm:$0xff]  }
  0x33   : > { %2177 = vmatpush1.bf16.msra.mxu0 %v3551_v46  ;;  %2542 = vmatpush1.bf16.msra.mxu1 %v3552_v47  ;;  %v3639_v46 = vld [vmem:[%s4997_s1 + $0x32c] ss:$16 sps:$4 sm:$0xff]   ;;  %v3634_v47 = vld [vmem:[%s4997_s1 + $0x320] ss:$16 sps:$4 sm:$0xff]  }
  0x34   : > { %2178 = vmatprep.subr.bf16.mxu0 %v3553_v49  ;;  %2543 = vmatprep.subr.bf16.mxu1 %v3555_v50  ;;  %v3644_v49 = vld [vmem:[%s4997_s1 + $0x344] ss:$16 sps:$4 sm:$0xff]   ;;  %v3647_v50 = vld [vmem:[%s4997_s1 + $0x34c] ss:$16 sps:$4 sm:$0xff]  }
  0x37   : > { %2179 = vmatpush1.bf16.msra.mxu0 %v3557_v51  ;;  %2544 = vmatpush1.bf16.msra.mxu1 %v3558_v52  ;;  %v3642_v51 = vld [vmem:[%s4997_s1 + $0x340] ss:$16 sps:$4 sm:$0xff]   ;;  %v3645_v52 = vld [vmem:[%s4997_s1 + $0x348] ss:$16 sps:$4 sm:$0xff]  }
  0x38   : > { %2180 = vmatprep.subr.bf16.mxu0 %v3559_v53  ;;  %2545 = vmatprep.subr.bf16.mxu1 %v3561_v54  ;;  %v3651_v53 = vld [vmem:[%s4997_s1 + $0x364] ss:$16 sps:$4 sm:$0xff]   ;;  %v3654_v54 = vld [vmem:[%s4997_s1 + $0x36c] ss:$16 sps:$4 sm:$0xff]  }
  0x3b   : > { %2181 = vmatpush1.bf16.msra.mxu0 %v3563_v55  ;;  %2546 = vmatpush1.bf16.msra.mxu1 %v3564_v56  ;;  %v3649_v55 = vld [vmem:[%s4997_s1 + $0x360] ss:$16 sps:$4 sm:$0xff]   ;;  %v3652_v56 = vld [vmem:[%s4997_s1 + $0x368] ss:$16 sps:$4 sm:$0xff]  }
  0x3c   : > { %2182 = vmatprep.subr.bf16.mxu0 %v3565_v57  ;;  %2547 = vmatprep.subr.bf16.mxu1 %v3567_v58  ;;  %v3659_v57 = vld [vmem:[%s4997_s1 + $0x384] ss:$16 sps:$4 sm:$0xff]   ;;  %v3662_v58 = vld [vmem:[%s4997_s1 + $0x38c] ss:$16 sps:$4 sm:$0xff]  }
  0x3f   : > { %2183 = vmatpush1.bf16.msra.mxu0 %v3569_v59  ;;  %2548 = vmatpush1.bf16.msra.mxu1 %v3570_v60  ;;  %v3657_v59 = vld [vmem:[%s4997_s1 + $0x380] ss:$16 sps:$4 sm:$0xff]   ;;  %v3660_v60 = vld [vmem:[%s4997_s1 + $0x388] ss:$16 sps:$4 sm:$0xff]  }
  0x40   : > { %2184 = vmatprep.subr.bf16.mxu0 %v3571_v61  ;;  %2549 = vmatprep.subr.bf16.mxu1 %v3573_v62  ;;  %v3666_v61 = vld [vmem:[%s4997_s1 + $0x3a4] ss:$16 sps:$4 sm:$0xff]   ;;  %v3669_v62 = vld [vmem:[%s4997_s1 + $0x3ac] ss:$16 sps:$4 sm:$0xff]  }
  0x43   : > { %2185 = vmatpush1.bf16.msra.mxu0 %v3575_v63  ;;  %2550 = vmatpush1.bf16.msra.mxu1 %v3576_v0  ;;  %v3664_v63 = vld [vmem:[%s4997_s1 + $0x3a0] ss:$16 sps:$4 sm:$0xff]   ;;  %v3667_v0 = vld [vmem:[%s4997_s1 + $0x3a8] ss:$16 sps:$4 sm:$0xff]  }
  0x44   : > { %2227 = vmatprep.subr.bf16.mxu0 %v3582_v1  ;;  %2592 = vmatprep.subr.bf16.mxu1 %v3585_v2  ;;  %v3674_v1 = vld [vmem:[%s4997_s1 + $0x3c4] ss:$16 sps:$4 sm:$0xff]   ;;  %v3677_v2 = vld [vmem:[%s4997_s1 + $0x3cc] ss:$16 sps:$4 sm:$0xff]  }
  0x46   : > { %2187 = vmatmul.mubr.bf16.vlgmr.msra.gmra.mrb[0].mxu0 %v3577_v3  ;;  %2552 = vmatmul.mubr.bf16.vlgmr.msra.gmra.mrb[0].mxu1 %v3577_v3  ;;  %v3672_v3 = vld [vmem:[%s4997_s1 + $0x3c0] ss:$16 sps:$4 sm:$0xff]  }
  0x47   : > { %2228 = vmatpush1.bf16.msra.mxu0 %v3580_v4  ;;  %2593 = vmatpush1.bf16.msra.mxu1 %v3583_v5  ;;  %v3675_v4 = vld [vmem:[%s4997_s1 + $0x3c8] ss:$16 sps:$4 sm:$0xff]   ;;  %v3681_v5 = vld [vmem:[%s4997_s1 + $0x3e4] ss:$16 sps:$4 sm:$0xff]  }
  0x48   : > { %2229 = vmatprep.subr.bf16.mxu0 %v3588_v6  ;;  %2594 = vmatprep.subr.bf16.mxu1 %v3591_v7  ;;  %v3684_v6 = vld [vmem:[%s4997_s1 + $0x3ec] ss:$16 sps:$4 sm:$0xff]   ;;  %v3679_v7 = vld [vmem:[%s4997_s1 + $0x3e0] ss:$16 sps:$4 sm:$0xff]  }
  0x49   : > { %2196 = vmatprep.mubr.bf16.mxu0 %v3640_v13  ;;  %2561 = vmatprep.mubr.bf16.mxu1 %v3640_v13  ;;  %v3691_v13 = vld [vmem:[%s4997_s1 + $0x408] ss:$16 sps:$4 sm:$0xff]  }
  0x4b   : > { %2230 = vmatpush1.bf16.msra.mxu0 %v3586_v8  ;;  %2595 = vmatpush1.bf16.msra.mxu1 %v3589_v9  ;;  %v3682_v8 = vld [vmem:[%s4997_s1 + $0x3e8] ss:$16 sps:$4 sm:$0xff]   ;;  %v3690_v9 = vld [vmem:[%s4997_s1 + $0x404] ss:$16 sps:$4 sm:$0xff]  }
  0x4c   : > { %2231 = vmatprep.subr.bf16.mxu0 %v3594_v10  ;;  %2596 = vmatprep.subr.bf16.mxu1 %v3597_v11  ;;  %v3693_v10 = vld [vmem:[%s4997_s1 + $0x40c] ss:$16 sps:$4 sm:$0xff]  }
  0x4d   : > { %v3685_v11 = vld [vmem:[%s4145_s13 + $0x8] ss:$36 sps:$4 sm:$0xff]  }
  0x4e   : > { %2197 = vmatmul.mubr.bf16.gmra.mrb[4].mxu0 %v3648_v17  ;;  %2562 = vmatmul.mubr.bf16.gmra.mrb[4].mxu1 %v3648_v17  ;;  %v3694_v17 = vld [vmem:[%s4997_s1 + $0x420] ss:$16 sps:$4 sm:$0xff]  }
  0x4f   : > { %2232 = vmatpush1.bf16.msra.mxu0 %v3592_v12  ;;  %2597 = vmatpush1.bf16.msra.mxu1 %v3595_v14  ;;  %v3688_v12 = vld [vmem:[%s4997_s1 + $0x400] ss:$16 sps:$4 sm:$0xff]   ;;  %v3696_v14 = vld [vmem:[%s4997_s1 + $0x424] ss:$16 sps:$4 sm:$0xff]  }
  0x50   : > { %2233 = vmatprep.subr.bf16.mxu0 %v3600_v15  ;;  %2598 = vmatprep.subr.bf16.mxu1 %v3603_v16  ;;  %v3699_v15 = vld [vmem:[%s4997_s1 + $0x42c] ss:$16 sps:$4 sm:$0xff]   ;;  %v3748_v16 = vld [vmem:[%s4145_s13 + $0x54] ss:$36 sps:$4 sm:$0xff]  }
  0x51   : > { %2206 = vmatprep.mubr.bf16.mxu0 %v3655_v22  ;;  %2571 = vmatprep.mubr.bf16.mxu1 %v3655_v22  ;;  %v3703_v22 = vld [vmem:[%s4997_s1 + $0x448] ss:$16 sps:$4 sm:$0xff]  }
  0x53   : > { %2234 = vmatpush1.bf16.msra.mxu0 %v3598_v18  ;;  %2599 = vmatpush1.bf16.msra.mxu1 %v3601_v19  ;;  %v3697_v18 = vld [vmem:[%s4997_s1 + $0x428] ss:$16 sps:$4 sm:$0xff]   ;;  %v3702_v19 = vld [vmem:[%s4997_s1 + $0x444] ss:$16 sps:$4 sm:$0xff]  }
  0x54   : > { %2235 = vmatprep.subr.bf16.mxu0 %v3606_v20  ;;  %2600 = vmatprep.subr.bf16.mxu1 %v3609_v21  ;;  %v3705_v20 = vld [vmem:[%s4997_s1 + $0x44c] ss:$16 sps:$4 sm:$0xff]   ;;  %v3700_v21 = vld [vmem:[%s4997_s1 + $0x440] ss:$16 sps:$4 sm:$0xff]  }
  0x56   : > { %2207 = vmatmul.mubr.bf16.gmra.mrb[8].mxu0 %v3663_v28  ;;  %2572 = vmatmul.mubr.bf16.gmra.mrb[8].mxu1 %v3663_v28  ;;  %v3709_v28 = vld [vmem:[%s4997_s1 + $0x468] ss:$16 sps:$4 sm:$0xff]  }
  0x57   : > { %2236 = vmatpush1.bf16.msra.mxu0 %v3604_v23  ;;  %2601 = vmatpush1.bf16.msra.mxu1 %v3607_v24  ;;  %v3756_v23 = vld [vmem:[%s4145_s13 + $0x50] ss:$36 sps:$4 sm:$0xff]  }
  0x58   : > { %2237 = vmatprep.subr.bf16.mxu0 %v3612_v25  ;;  %2602 = vmatprep.subr.bf16.mxu1 %v3615_v26  ;;  %v3708_v24 = vld [vmem:[%s4997_s1 + $0x464] ss:$16 sps:$4 sm:$0xff]   ;;  %v3711_v25 = vld [vmem:[%s4997_s1 + $0x46c] ss:$16 sps:$4 sm:$0xff]  }
  0x59   : > { %2216 = vmatprep.mubr.bf16.mxu0 %v3670_v31  ;;  %2581 = vmatprep.mubr.bf16.mxu1 %v3670_v31  ;;  %v3763_v26 = vld [vmem:[%s4145_s13 + $0x9c] ss:$36 sps:$4 sm:$0xff]  }
  0x5a   : > { %v3712_v31 = vld [vmem:[%s4997_s1 + $0x480] ss:$16 sps:$4 sm:$0xff]  }
  0x5b   : > { %2238 = vmatpush1.bf16.msra.mxu0 %v3610_v27  ;;  %2603 = vmatpush1.bf16.msra.mxu1 %v3613_v29  ;;  %v3706_v27 = vld [vmem:[%s4997_s1 + $0x460] ss:$16 sps:$4 sm:$0xff]   ;;  %v3714_v29 = vld [vmem:[%s4997_s1 + $0x484] ss:$16 sps:$4 sm:$0xff]  }
  0x5c   : > { %2239 = vmatprep.subr.bf16.mxu0 %v3618_v30  ;;  %2604 = vmatprep.subr.bf16.mxu1 %v3621_v32  ;;  %v3717_v30 = vld [vmem:[%s4997_s1 + $0x48c] ss:$16 sps:$4 sm:$0xff]   ;;  %v3715_v32 = vld [vmem:[%s4997_s1 + $0x488] ss:$16 sps:$4 sm:$0xff]  }
  0x5e   : > { %2217 = vmatmul.mubr.bf16.gmra.mrb[12].mxu0 %v3678_v38  ;;  %2582 = vmatmul.mubr.bf16.gmra.mrb[12].mxu1 %v3678_v38  ;;  %v3721_v38 = vld [vmem:[%s4997_s1 + $0x4a8] ss:$16 sps:$4 sm:$0xff]  }
  0x5f   : > { %2240 = vmatpush1.bf16.msra.mxu0 %v3616_v33  ;;  %2605 = vmatpush1.bf16.msra.mxu1 %v3619_v34  ;;  %v3771_v33 = vld [vmem:[%s4145_s13 + $0x98] ss:$36 sps:$4 sm:$0xff]   ;;  %v3720_v34 = vld [vmem:[%s4997_s1 + $0x4a4] ss:$16 sps:$4 sm:$0xff]  }
  0x60   : > { %2241 = vmatprep.subr.bf16.mxu0 %v3624_v35  ;;  %2606 = vmatprep.subr.bf16.mxu1 %v3627_v36  ;;  %v3723_v35 = vld [vmem:[%s4997_s1 + $0x4ac] ss:$16 sps:$4 sm:$0xff]   ;;  %v3778_v36 = vld [vmem:[%s4145_s13 + $0xe4] ss:$36 sps:$4 sm:$0xff]  }
  0x61   : > { %2259 = vmatprep.mubr.bf16.mxu0 %v3687_v40  ;;  %2624 = vmatprep.mubr.bf16.mxu1 %v3687_v40  ;;  %v3729_v40 = vld [vmem:[%s4997_s1 + $0x4cc] ss:$16 sps:$4 sm:$0xff]  }
  0x63   : > { %2242 = vmatpush1.bf16.msra.mxu0 %v3622_v37  ;;  %2607 = vmatpush1.bf16.msra.mxu1 %v3625_v39  ;;  %v3718_v37 = vld [vmem:[%s4997_s1 + $0x4a0] ss:$16 sps:$4 sm:$0xff]   ;;  %v3726_v39 = vld [vmem:[%s4997_s1 + $0x4c4] ss:$16 sps:$4 sm:$0xff]  }
  0x64   : > { %2243 = vmatprep.subr.bf16.mxu0 %v3630_v41  ;;  %2608 = vmatprep.subr.bf16.mxu1 %v3633_v42  ;;  %v3724_v41 = vld [vmem:[%s4997_s1 + $0x4c0] ss:$16 sps:$4 sm:$0xff]   ;;  %v3727_v42 = vld [vmem:[%s4997_s1 + $0x4c8] ss:$16 sps:$4 sm:$0xff]  }
  0x67   : > { %2244 = vmatpush1.bf16.msra.mxu0 %v3628_v43  ;;  %2609 = vmatpush1.bf16.msra.mxu1 %v3631_v44  ;;  %v3786_v43 = vld [vmem:[%s4145_s13 + $0xe0] ss:$36 sps:$4 sm:$0xff]  }
  0x68   : > { %2245 = vmatprep.subr.bf16.mxu0 %v3636_v45  ;;  %2610 = vmatprep.subr.bf16.mxu1 %v3639_v46  ;;  %v3732_v44 = vld [vmem:[%s4997_s1 + $0x4e4] ss:$16 sps:$4 sm:$0xff]   ;;  %v3735_v45 = vld [vmem:[%s4997_s1 + $0x4ec] ss:$16 sps:$4 sm:$0xff]  }
  0x69   : > { %v3795_v46 = vld [vmem:[%s4145_s13 + $0x14] ss:$36 sps:$4 sm:$0xff]  }
  0x6b   : > { %2246 = vmatpush1.bf16.msra.mxu0 %v3634_v47  ;;  %2611 = vmatpush1.bf16.msra.mxu1 %v3637_v48  ;;  %v3730_v47 = vld [vmem:[%s4997_s1 + $0x4e0] ss:$16 sps:$4 sm:$0xff]   ;;  %v3733_v48 = vld [vmem:[%s4997_s1 + $0x4e8] ss:$16 sps:$4 sm:$0xff]  }
  0x6c   : > { %2247 = vmatprep.subr.bf16.mxu0 %v3644_v49  ;;  %2612 = vmatprep.subr.bf16.mxu1 %v3647_v50  ;;  %v3738_v49 = vld [vmem:[%s4997_s1 + $0x504] ss:$16 sps:$4 sm:$0xff]   ;;  %v3741_v50 = vld [vmem:[%s4997_s1 + $0x50c] ss:$16 sps:$4 sm:$0xff]  }
  0x6f   : > { %2248 = vmatpush1.bf16.msra.mxu0 %v3642_v51  ;;  %2613 = vmatpush1.bf16.msra.mxu1 %v3645_v52  ;;  %v3736_v51 = vld [vmem:[%s4997_s1 + $0x500] ss:$16 sps:$4 sm:$0xff]   ;;  %v3739_v52 = vld [vmem:[%s4997_s1 + $0x508] ss:$16 sps:$4 sm:$0xff]  }
  0x70   : > { %2249 = vmatprep.subr.bf16.mxu0 %v3651_v53  ;;  %2614 = vmatprep.subr.bf16.mxu1 %v3654_v54  ;;  %v3744_v53 = vld [vmem:[%s4997_s1 + $0x524] ss:$16 sps:$4 sm:$0xff]   ;;  %v3747_v54 = vld [vmem:[%s4997_s1 + $0x52c] ss:$16 sps:$4 sm:$0xff]  }
  0x73   : > { %2250 = vmatpush1.bf16.msra.mxu0 %v3649_v55  ;;  %2615 = vmatpush1.bf16.msra.mxu1 %v3652_v56  ;;  %v3742_v55 = vld [vmem:[%s4997_s1 + $0x520] ss:$16 sps:$4 sm:$0xff]   ;;  %v3745_v56 = vld [vmem:[%s4997_s1 + $0x528] ss:$16 sps:$4 sm:$0xff]  }
  0x74   : > { %2251 = vmatprep.subr.bf16.mxu0 %v3659_v57  ;;  %2616 = vmatprep.subr.bf16.mxu1 %v3662_v58  ;;  %v3752_v57 = vld [vmem:[%s4997_s1 + $0x544] ss:$16 sps:$4 sm:$0xff]   ;;  %v3755_v58 = vld [vmem:[%s4997_s1 + $0x54c] ss:$16 sps:$4 sm:$0xff]  }
  0x77   : > { %2252 = vmatpush1.bf16.msra.mxu0 %v3657_v59  ;;  %2617 = vmatpush1.bf16.msra.mxu1 %v3660_v60  ;;  %v3750_v59 = vld [vmem:[%s4997_s1 + $0x540] ss:$16 sps:$4 sm:$0xff]   ;;  %v3753_v60 = vld [vmem:[%s4997_s1 + $0x548] ss:$16 sps:$4 sm:$0xff]  }
  0x78   : > { %2253 = vmatprep.subr.bf16.mxu0 %v3666_v61  ;;  %2618 = vmatprep.subr.bf16.mxu1 %v3669_v62  ;;  %v3759_v61 = vld [vmem:[%s4997_s1 + $0x564] ss:$16 sps:$4 sm:$0xff]   ;;  %v3762_v62 = vld [vmem:[%s4997_s1 + $0x56c] ss:$16 sps:$4 sm:$0xff]  }
  0x7b   : > { %2254 = vmatpush1.bf16.msra.mxu0 %v3664_v63  ;;  %2619 = vmatpush1.bf16.msra.mxu1 %v3667_v0  ;;  %v3757_v63 = vld [vmem:[%s4997_s1 + $0x560] ss:$16 sps:$4 sm:$0xff]   ;;  %v3760_v0 = vld [vmem:[%s4997_s1 + $0x568] ss:$16 sps:$4 sm:$0xff]  }
  0x7c   : > { %2255 = vmatprep.subr.bf16.mxu0 %v3674_v1  ;;  %2620 = vmatprep.subr.bf16.mxu1 %v3677_v2  ;;  %v3767_v1 = vld [vmem:[%s4997_s1 + $0x584] ss:$16 sps:$4 sm:$0xff]   ;;  %v3770_v2 = vld [vmem:[%s4997_s1 + $0x58c] ss:$16 sps:$4 sm:$0xff]  }
  0x7f   : > { %2256 = vmatpush1.bf16.msra.mxu0 %v3672_v3  ;;  %2621 = vmatpush1.bf16.msra.mxu1 %v3675_v4  ;;  %v3765_v3 = vld [vmem:[%s4997_s1 + $0x580] ss:$16 sps:$4 sm:$0xff]   ;;  %v3768_v4 = vld [vmem:[%s4997_s1 + $0x588] ss:$16 sps:$4 sm:$0xff]  }
  0x80   : > { %2257 = vmatprep.subr.bf16.mxu0 %v3681_v5  ;;  %2622 = vmatprep.subr.bf16.mxu1 %v3684_v6  ;;  %v3774_v5 = vld [vmem:[%s4997_s1 + $0x5a4] ss:$16 sps:$4 sm:$0xff]   ;;  %v3777_v6 = vld [vmem:[%s4997_s1 + $0x5ac] ss:$16 sps:$4 sm:$0xff]  }
  0x83   : > { %2258 = vmatpush1.bf16.msra.mxu0 %v3679_v7  ;;  %2623 = vmatpush1.bf16.msra.mxu1 %v3682_v8  ;;  %v3772_v7 = vld [vmem:[%s4997_s1 + $0x5a0] ss:$16 sps:$4 sm:$0xff]   ;;  %v3775_v8 = vld [vmem:[%s4997_s1 + $0x5a8] ss:$16 sps:$4 sm:$0xff]  }
  0x84   : > { %2300 = vmatprep.subr.bf16.mxu0 %v3690_v9  ;;  %2665 = vmatprep.subr.bf16.mxu1 %v3693_v10  ;;  %v3782_v9 = vld [vmem:[%s4997_s1 + $0x5c4] ss:$16 sps:$4 sm:$0xff]   ;;  %v3785_v10 = vld [vmem:[%s4997_s1 + $0x5cc] ss:$16 sps:$4 sm:$0xff]  }
  0x86   : > { %2260 = vmatmul.mubr.bf16.vlgmr.msra.gmra.mrb[0].mxu0 %v3685_v11  ;;  %2625 = vmatmul.mubr.bf16.vlgmr.msra.gmra.mrb[0].mxu1 %v3685_v11  ;;  %v3780_v11 = vld [vmem:[%s4997_s1 + $0x5c0] ss:$16 sps:$4 sm:$0xff]  }
  0x87   : > { %2301 = vmatpush1.bf16.msra.mxu0 %v3688_v12  ;;  %2666 = vmatpush1.bf16.msra.mxu1 %v3691_v13  ;;  %v3783_v12 = vld [vmem:[%s4997_s1 + $0x5c8] ss:$16 sps:$4 sm:$0xff]   ;;  %v3789_v13 = vld [vmem:[%s4997_s1 + $0x5e4] ss:$16 sps:$4 sm:$0xff]  }
  0x88   : > { %2302 = vmatprep.subr.bf16.mxu0 %v3696_v14  ;;  %2667 = vmatprep.subr.bf16.mxu1 %v3699_v15  ;;  %v3792_v14 = vld [vmem:[%s4997_s1 + $0x5ec] ss:$16 sps:$4 sm:$0xff]   ;;  %v3787_v15 = vld [vmem:[%s4997_s1 + $0x5e0] ss:$16 sps:$4 sm:$0xff]  }
  0x89   : > { %2269 = vmatprep.mubr.bf16.mxu0 %v3748_v16  ;;  %2634 = vmatprep.mubr.bf16.mxu1 %v3748_v16  ;;  %v3790_v16 = vld [vmem:[%s4997_s1 + $0x5e8] ss:$16 sps:$4 sm:$0xff]  }
  0x8b   : > { %2303 = vmatpush1.bf16.msra.mxu0 %v3694_v17  ;;  %2668 = vmatpush1.bf16.msra.mxu1 %v3697_v18  ;;  %v3798_v17 = vld [vmem:[%s4997_s1 + $0x604] ss:$16 sps:$4 sm:$0xff]   ;;  %v3801_v18 = vld [vmem:[%s4997_s1 + $0x60c] ss:$16 sps:$4 sm:$0xff]  }
  0x8c   : > { %2304 = vmatprep.subr.bf16.mxu0 %v3702_v19  ;;  %2669 = vmatprep.subr.bf16.mxu1 %v3705_v20  ;;  %v3793_v19 = vld [vmem:[%s4145_s13 + $0x10] ss:$36 sps:$4 sm:$0xff]  }
  0x8d   : > { %v3796_v20 = vld [vmem:[%s4997_s1 + $0x600] ss:$16 sps:$4 sm:$0xff]  }
  0x8e   : > { %2270 = vmatmul.mubr.bf16.gmra.mrb[4].mxu0 %v3756_v23  ;;  %2635 = vmatmul.mubr.bf16.gmra.mrb[4].mxu1 %v3756_v23  ;;  %v3807_v23 = vld [vmem:[%s4997_s1 + $0x62c] ss:$16 sps:$4 sm:$0xff]  }
  0x8f   : > { %2305 = vmatpush1.bf16.msra.mxu0 %v3700_v21  ;;  %2670 = vmatpush1.bf16.msra.mxu1 %v3703_v22  ;;  %v3799_v21 = vld [vmem:[%s4997_s1 + $0x608] ss:$16 sps:$4 sm:$0xff]   ;;  %v3804_v22 = vld [vmem:[%s4997_s1 + $0x624] ss:$16 sps:$4 sm:$0xff]  }
  0x90   : > { %2306 = vmatprep.subr.bf16.mxu0 %v3708_v24  ;;  %2671 = vmatprep.subr.bf16.mxu1 %v3711_v25  ;;  %v3856_v24 = vld [vmem:[%s4145_s13 + $0x5c] ss:$36 sps:$4 sm:$0xff]  }
  0x91   : > { %2279 = vmatprep.mubr.bf16.mxu0 %v3763_v26  ;;  %2644 = vmatprep.mubr.bf16.mxu1 %v3763_v26  ;;  %v3802_v25 = vld [vmem:[%s4997_s1 + $0x620] ss:$16 sps:$4 sm:$0xff]   ;;  %v3805_v26 = vld [vmem:[%s4997_s1 + $0x628] ss:$16 sps:$4 sm:$0xff]  }
  0x93   : > { %2307 = vmatpush1.bf16.msra.mxu0 %v3706_v27  ;;  %2672 = vmatpush1.bf16.msra.mxu1 %v3709_v28  ;;  %v3810_v27 = vld [vmem:[%s4997_s1 + $0x644] ss:$16 sps:$4 sm:$0xff]   ;;  %v3813_v28 = vld [vmem:[%s4997_s1 + $0x64c] ss:$16 sps:$4 sm:$0xff]  }
  0x94   : > { %2308 = vmatprep.subr.bf16.mxu0 %v3714_v29  ;;  %2673 = vmatprep.subr.bf16.mxu1 %v3717_v30  ;;  %v3808_v29 = vld [vmem:[%s4997_s1 + $0x640] ss:$16 sps:$4 sm:$0xff]   ;;  %v3811_v30 = vld [vmem:[%s4997_s1 + $0x648] ss:$16 sps:$4 sm:$0xff]  }
  0x96   : > { %2280 = vmatmul.mubr.bf16.gmra.mrb[8].mxu0 %v3771_v33  ;;  %2645 = vmatmul.mubr.bf16.gmra.mrb[8].mxu1 %v3771_v33  ;;  %v3819_v33 = vld [vmem:[%s4997_s1 + $0x66c] ss:$16 sps:$4 sm:$0xff]  }
  0x97   : > { %2309 = vmatpush1.bf16.msra.mxu0 %v3712_v31  ;;  %2674 = vmatpush1.bf16.msra.mxu1 %v3715_v32  ;;  %v3858_v31 = vld [vmem:[%s4145_s13 + $0x58] ss:$36 sps:$4 sm:$0xff]   ;;  %v3816_v32 = vld [vmem:[%s4997_s1 + $0x664] ss:$16 sps:$4 sm:$0xff]  }
  0x98   : > { %2310 = vmatprep.subr.bf16.mxu0 %v3720_v34  ;;  %2675 = vmatprep.subr.bf16.mxu1 %v3723_v35  ;;  %v3871_v34 = vld [vmem:[%s4145_s13 + $0xa4] ss:$36 sps:$4 sm:$0xff]   ;;  %v3814_v35 = vld [vmem:[%s4997_s1 + $0x660] ss:$16 sps:$4 sm:$0xff]  }
  0x99   : > { %2289 = vmatprep.mubr.bf16.mxu0 %v3778_v36  ;;  %2654 = vmatprep.mubr.bf16.mxu1 %v3778_v36  ;;  %v3817_v36 = vld [vmem:[%s4997_s1 + $0x668] ss:$16 sps:$4 sm:$0xff]  }
  0x9b   : > { %2311 = vmatpush1.bf16.msra.mxu0 %v3718_v37  ;;  %2676 = vmatpush1.bf16.msra.mxu1 %v3721_v38  ;;  %v3822_v37 = vld [vmem:[%s4997_s1 + $0x684] ss:$16 sps:$4 sm:$0xff]   ;;  %v3825_v38 = vld [vmem:[%s4997_s1 + $0x68c] ss:$16 sps:$4 sm:$0xff]  }
  0x9c   : > { %2312 = vmatprep.subr.bf16.mxu0 %v3726_v39  ;;  %2677 = vmatprep.subr.bf16.mxu1 %v3729_v40  ;;  %v3820_v39 = vld [vmem:[%s4997_s1 + $0x680] ss:$16 sps:$4 sm:$0xff]   ;;  %v3823_v40 = vld [vmem:[%s4997_s1 + $0x688] ss:$16 sps:$4 sm:$0xff]  }
  0x9e   : > { %2290 = vmatmul.mubr.bf16.gmra.mrb[12].mxu0 %v3786_v43  ;;  %2655 = vmatmul.mubr.bf16.gmra.mrb[12].mxu1 %v3786_v43  ;;  %v3831_v43 = vld [vmem:[%s4997_s1 + $0x6ac] ss:$16 sps:$4 sm:$0xff]  }
  0x9f   : > { %2313 = vmatpush1.bf16.msra.mxu0 %v3724_v41  ;;  %2678 = vmatpush1.bf16.msra.mxu1 %v3727_v42  ;;  %v3873_v41 = vld [vmem:[%s4145_s13 + $0xa0] ss:$36 sps:$4 sm:$0xff]  }
  0xa0   : > { %2314 = vmatprep.subr.bf16.mxu0 %v3732_v44  ;;  %2679 = vmatprep.subr.bf16.mxu1 %v3735_v45  ;;  %v3828_v42 = vld [vmem:[%s4997_s1 + $0x6a4] ss:$16 sps:$4 sm:$0xff]   ;;  %v3886_v44 = vld [vmem:[%s4145_s13 + $0xec] ss:$36 sps:$4 sm:$0xff]  }
  0xa1   : > { %2332 = vmatprep.mubr.bf16.mxu0 %v3795_v46  ;;  %2697 = vmatprep.mubr.bf16.mxu1 %v3795_v46  ;;  %v3826_v45 = vld [vmem:[%s4997_s1 + $0x6a0] ss:$16 sps:$4 sm:$0xff]   ;;  %v3829_v46 = vld [vmem:[%s4997_s1 + $0x6a8] ss:$16 sps:$4 sm:$0xff]  }
  0xa3   : > { %2315 = vmatpush1.bf16.msra.mxu0 %v3730_v47  ;;  %2680 = vmatpush1.bf16.msra.mxu1 %v3733_v48  ;;  %v3834_v47 = vld [vmem:[%s4997_s1 + $0x6c4] ss:$16 sps:$4 sm:$0xff]   ;;  %v3837_v48 = vld [vmem:[%s4997_s1 + $0x6cc] ss:$16 sps:$4 sm:$0xff]  }
  0xa4   : > { %2316 = vmatprep.subr.bf16.mxu0 %v3738_v49  ;;  %2681 = vmatprep.subr.bf16.mxu1 %v3741_v50  ;;  %v3832_v49 = vld [vmem:[%s4997_s1 + $0x6c0] ss:$16 sps:$4 sm:$0xff]   ;;  %v3888_v50 = vld [vmem:[%s4145_s13 + $0xe8] ss:$36 sps:$4 sm:$0xff]  }
  0xa7   : > { %2317 = vmatpush1.bf16.msra.mxu0 %v3736_v51  ;;  %2682 = vmatpush1.bf16.msra.mxu1 %v3739_v52  ;;  %v3835_v51 = vld [vmem:[%s4997_s1 + $0x6c8] ss:$16 sps:$4 sm:$0xff]   ;;  %v3840_v52 = vld [vmem:[%s4997_s1 + $0x6e4] ss:$16 sps:$4 sm:$0xff]  }
  0xa8   : > { %2318 = vmatprep.subr.bf16.mxu0 %v3744_v53  ;;  %2683 = vmatprep.subr.bf16.mxu1 %v3747_v54  ;;  %v3843_v53 = vld [vmem:[%s4997_s1 + $0x6ec] ss:$16 sps:$4 sm:$0xff]  }
  0xa9   : > { %v3903_v54 = vld [vmem:[%s4145_s13 + $0x1c] ss:$36 sps:$4 sm:$0xff]  }
  0xab   : > { %2319 = vmatpush1.bf16.msra.mxu0 %v3742_v55  ;;  %2684 = vmatpush1.bf16.msra.mxu1 %v3745_v56  ;;  %v3838_v55 = vld [vmem:[%s4997_s1 + $0x6e0] ss:$16 sps:$4 sm:$0xff]   ;;  %v3841_v56 = vld [vmem:[%s4997_s1 + $0x6e8] ss:$16 sps:$4 sm:$0xff]  }
  0xac   : > { %2320 = vmatprep.subr.bf16.mxu0 %v3752_v57  ;;  %2685 = vmatprep.subr.bf16.mxu1 %v3755_v58  ;;  %v3846_v57 = vld [vmem:[%s4997_s1 + $0x704] ss:$16 sps:$4 sm:$0xff]   ;;  %v3849_v58 = vld [vmem:[%s4997_s1 + $0x70c] ss:$16 sps:$4 sm:$0xff]  }
  0xaf   : > { %2321 = vmatpush1.bf16.msra.mxu0 %v3750_v59  ;;  %2686 = vmatpush1.bf16.msra.mxu1 %v3753_v60  ;;  %v3844_v59 = vld [vmem:[%s4997_s1 + $0x700] ss:$16 sps:$4 sm:$0xff]   ;;  %v3847_v60 = vld [vmem:[%s4997_s1 + $0x708] ss:$16 sps:$4 sm:$0xff]  }
  0xb0   : > { %2322 = vmatprep.subr.bf16.mxu0 %v3759_v61  ;;  %2687 = vmatprep.subr.bf16.mxu1 %v3762_v62  ;;  %v3852_v61 = vld [vmem:[%s4997_s1 + $0x724] ss:$16 sps:$4 sm:$0xff]   ;;  %v3855_v62 = vld [vmem:[%s4997_s1 + $0x72c] ss:$16 sps:$4 sm:$0xff]  }
  0xb3   : > { %2323 = vmatpush1.bf16.msra.mxu0 %v3757_v63  ;;  %2688 = vmatpush1.bf16.msra.mxu1 %v3760_v0  ;;  %v3850_v63 = vld [vmem:[%s4997_s1 + $0x720] ss:$16 sps:$4 sm:$0xff]   ;;  %v3853_v0 = vld [vmem:[%s4997_s1 + $0x728] ss:$16 sps:$4 sm:$0xff]  }
  0xb4   : > { %2324 = vmatprep.subr.bf16.mxu0 %v3767_v1  ;;  %2689 = vmatprep.subr.bf16.mxu1 %v3770_v2  ;;  %v3861_v1 = vld [vmem:[%s4997_s1 + $0x744] ss:$16 sps:$4 sm:$0xff]   ;;  %v3864_v2 = vld [vmem:[%s4997_s1 + $0x74c] ss:$16 sps:$4 sm:$0xff]  }
  0xb7   : > { %2325 = vmatpush1.bf16.msra.mxu0 %v3765_v3  ;;  %2690 = vmatpush1.bf16.msra.mxu1 %v3768_v4  ;;  %v3859_v3 = vld [vmem:[%s4997_s1 + $0x740] ss:$16 sps:$4 sm:$0xff]   ;;  %v3862_v4 = vld [vmem:[%s4997_s1 + $0x748] ss:$16 sps:$4 sm:$0xff]  }
  0xb8   : > { %2326 = vmatprep.subr.bf16.mxu0 %v3774_v5  ;;  %2691 = vmatprep.subr.bf16.mxu1 %v3777_v6  ;;  %v3867_v5 = vld [vmem:[%s4997_s1 + $0x764] ss:$16 sps:$4 sm:$0xff]   ;;  %v3870_v6 = vld [vmem:[%s4997_s1 + $0x76c] ss:$16 sps:$4 sm:$0xff]  }
  0xbb   : > { %2327 = vmatpush1.bf16.msra.mxu0 %v3772_v7  ;;  %2692 = vmatpush1.bf16.msra.mxu1 %v3775_v8  ;;  %v3865_v7 = vld [vmem:[%s4997_s1 + $0x760] ss:$16 sps:$4 sm:$0xff]   ;;  %v3868_v8 = vld [vmem:[%s4997_s1 + $0x768] ss:$16 sps:$4 sm:$0xff]  }
  0xbc   : > { %2328 = vmatprep.subr.bf16.mxu0 %v3782_v9  ;;  %2693 = vmatprep.subr.bf16.mxu1 %v3785_v10  ;;  %v3876_v9 = vld [vmem:[%s4997_s1 + $0x784] ss:$16 sps:$4 sm:$0xff]   ;;  %v3879_v10 = vld [vmem:[%s4997_s1 + $0x78c] ss:$16 sps:$4 sm:$0xff]  }
  0xbf   : > { %2329 = vmatpush1.bf16.msra.mxu0 %v3780_v11  ;;  %2694 = vmatpush1.bf16.msra.mxu1 %v3783_v12  ;;  %v3874_v11 = vld [vmem:[%s4997_s1 + $0x780] ss:$16 sps:$4 sm:$0xff]   ;;  %v3877_v12 = vld [vmem:[%s4997_s1 + $0x788] ss:$16 sps:$4 sm:$0xff]  }
  0xc0   : > { %2330 = vmatprep.subr.bf16.mxu0 %v3789_v13  ;;  %2695 = vmatprep.subr.bf16.mxu1 %v3792_v14  ;;  %v3882_v13 = vld [vmem:[%s4997_s1 + $0x7a4] ss:$16 sps:$4 sm:$0xff]   ;;  %v3885_v14 = vld [vmem:[%s4997_s1 + $0x7ac] ss:$16 sps:$4 sm:$0xff]  }
  0xc3   : > { %2331 = vmatpush1.bf16.msra.mxu0 %v3787_v15  ;;  %2696 = vmatpush1.bf16.msra.mxu1 %v3790_v16  ;;  %v3880_v15 = vld [vmem:[%s4997_s1 + $0x7a0] ss:$16 sps:$4 sm:$0xff]   ;;  %v3883_v16 = vld [vmem:[%s4997_s1 + $0x7a8] ss:$16 sps:$4 sm:$0xff]  }
  0xc4   : > { %2373 = vmatprep.subr.bf16.mxu0 %v3798_v17  ;;  %2738 = vmatprep.subr.bf16.mxu1 %v3801_v18  ;;  %v3891_v17 = vld [vmem:[%s4997_s1 + $0x7c4] ss:$16 sps:$4 sm:$0xff]   ;;  %v3894_v18 = vld [vmem:[%s4997_s1 + $0x7cc] ss:$16 sps:$4 sm:$0xff]  }
  0xc6   : > { %2333 = vmatmul.mubr.bf16.vlgmr.msra.gmra.mrb[0].mxu0 %v3793_v19  ;;  %2698 = vmatmul.mubr.bf16.vlgmr.msra.gmra.mrb[0].mxu1 %v3793_v19  ;;  %v3889_v19 = vld [vmem:[%s4997_s1 + $0x7c0] ss:$16 sps:$4 sm:$0xff]  }
  0xc7   : > { %2374 = vmatpush1.bf16.msra.mxu0 %v3796_v20  ;;  %2739 = vmatpush1.bf16.msra.mxu1 %v3799_v21  ;;  %v3892_v20 = vld [vmem:[%s4997_s1 + $0x7c8] ss:$16 sps:$4 sm:$0xff]   ;;  %v3897_v21 = vld [vmem:[%s4997_s1 + $0x7e4] ss:$16 sps:$4 sm:$0xff]  }
  0xc8   : > { %2375 = vmatprep.subr.bf16.mxu0 %v3804_v22  ;;  %2740 = vmatprep.subr.bf16.mxu1 %v3807_v23  ;;  %v3900_v22 = vld [vmem:[%s4997_s1 + $0x7ec] ss:$16 sps:$4 sm:$0xff]   ;;  %v3895_v23 = vld [vmem:[%s4997_s1 + $0x7e0] ss:$16 sps:$4 sm:$0xff]  }
  0xc9   : > { %2342 = vmatprep.mubr.bf16.mxu0 %v3856_v24  ;;  %2707 = vmatprep.mubr.bf16.mxu1 %v3856_v24  ;;  %v3898_v24 = vld [vmem:[%s4997_s1 + $0x7e8] ss:$16 sps:$4 sm:$0xff]  }
  0xcb   : > { %2376 = vmatpush1.bf16.msra.mxu0 %v3802_v25  ;;  %2741 = vmatpush1.bf16.msra.mxu1 %v3805_v26  ;;  %v3906_v25 = vld [vmem:[%s4997_s1 + $0x804] ss:$16 sps:$4 sm:$0xff]   ;;  %v3909_v26 = vld [vmem:[%s4997_s1 + $0x80c] ss:$16 sps:$4 sm:$0xff]  }
  0xcc   : > { %2377 = vmatprep.subr.bf16.mxu0 %v3810_v27  ;;  %2742 = vmatprep.subr.bf16.mxu1 %v3813_v28  ;;  %v3901_v27 = vld [vmem:[%s4145_s13 + $0x18] ss:$36 sps:$4 sm:$0xff]   ;;  %v3904_v28 = vld [vmem:[%s4997_s1 + $0x800] ss:$16 sps:$4 sm:$0xff]  }
  0xce   : > { %2343 = vmatmul.mubr.bf16.gmra.mrb[4].mxu0 %v3858_v31  ;;  %2708 = vmatmul.mubr.bf16.gmra.mrb[4].mxu1 %v3858_v31  ;;  %v3915_v31 = vld [vmem:[%s4997_s1 + $0x82c] ss:$16 sps:$4 sm:$0xff]  }
  0xcf   : > { %2378 = vmatpush1.bf16.msra.mxu0 %v3808_v29  ;;  %2743 = vmatpush1.bf16.msra.mxu1 %v3811_v30  ;;  %v3907_v29 = vld [vmem:[%s4997_s1 + $0x808] ss:$16 sps:$4 sm:$0xff]   ;;  %v3912_v30 = vld [vmem:[%s4997_s1 + $0x824] ss:$16 sps:$4 sm:$0xff]  }
  0xd0   : > { %2379 = vmatprep.subr.bf16.mxu0 %v3816_v32  ;;  %2744 = vmatprep.subr.bf16.mxu1 %v3819_v33  ;;  %v3916_v32 = vld [vmem:[%s4145_s13 + $0x64] ss:$36 sps:$4 sm:$0xff]   ;;  %v3910_v33 = vld [vmem:[%s4997_s1 + $0x820] ss:$16 sps:$4 sm:$0xff]  }
  0xd1   : > { %2352 = vmatprep.mubr.bf16.mxu0 %v3871_v34  ;;  %2717 = vmatprep.mubr.bf16.mxu1 %v3871_v34  ;;  %v3913_v34 = vld [vmem:[%s4997_s1 + $0x828] ss:$16 sps:$4 sm:$0xff]  }
  0xd3   : > { %2380 = vmatpush1.bf16.msra.mxu0 %v3814_v35  ;;  %2745 = vmatpush1.bf16.msra.mxu1 %v3817_v36  ;;  %v3921_v35 = vld [vmem:[%s4997_s1 + $0x844] ss:$16 sps:$4 sm:$0xff]   ;;  %v3924_v36 = vld [vmem:[%s4997_s1 + $0x84c] ss:$16 sps:$4 sm:$0xff]  }
  0xd4   : > { %2381 = vmatprep.subr.bf16.mxu0 %v3822_v37  ;;  %2746 = vmatprep.subr.bf16.mxu1 %v3825_v38  ;;  %v3918_v37 = vld [vmem:[%s4145_s13 + $0x60] ss:$36 sps:$4 sm:$0xff]  }
  0xd5   : > { %v3919_v38 = vld [vmem:[%s4997_s1 + $0x840] ss:$16 sps:$4 sm:$0xff]  }
  0xd6   : > { %2353 = vmatmul.mubr.bf16.gmra.mrb[8].mxu0 %v3873_v41  ;;  %2718 = vmatmul.mubr.bf16.gmra.mrb[8].mxu1 %v3873_v41  ;;  %v3930_v41 = vld [vmem:[%s4997_s1 + $0x86c] ss:$16 sps:$4 sm:$0xff]  }
  0xd7   : > { %2382 = vmatpush1.bf16.msra.mxu0 %v3820_v39  ;;  %2747 = vmatpush1.bf16.msra.mxu1 %v3823_v40  ;;  %v3922_v39 = vld [vmem:[%s4997_s1 + $0x848] ss:$16 sps:$4 sm:$0xff]   ;;  %v3927_v40 = vld [vmem:[%s4997_s1 + $0x864] ss:$16 sps:$4 sm:$0xff]  }
  0xd8   : > { %2383 = vmatprep.subr.bf16.mxu0 %v3828_v42  ;;  %2748 = vmatprep.subr.bf16.mxu1 %v3831_v43  ;;  %v3931_v42 = vld [vmem:[%s4145_s13 + $0xac] ss:$36 sps:$4 sm:$0xff]  }
  0xd9   : > { %2362 = vmatprep.mubr.bf16.mxu0 %v3886_v44  ;;  %2727 = vmatprep.mubr.bf16.mxu1 %v3886_v44  ;;  %v3925_v43 = vld [vmem:[%s4997_s1 + $0x860] ss:$16 sps:$4 sm:$0xff]   ;;  %v3928_v44 = vld [vmem:[%s4997_s1 + $0x868] ss:$16 sps:$4 sm:$0xff]  }
  0xdb   : > { %2384 = vmatpush1.bf16.msra.mxu0 %v3826_v45  ;;  %2749 = vmatpush1.bf16.msra.mxu1 %v3829_v46  ;;  %v3936_v45 = vld [vmem:[%s4997_s1 + $0x884] ss:$16 sps:$4 sm:$0xff]   ;;  %v3939_v46 = vld [vmem:[%s4997_s1 + $0x88c] ss:$16 sps:$4 sm:$0xff]  }
  0xdc   : > { %2385 = vmatprep.subr.bf16.mxu0 %v3834_v47  ;;  %2750 = vmatprep.subr.bf16.mxu1 %v3837_v48  ;;  %v3933_v47 = vld [vmem:[%s4145_s13 + $0xa8] ss:$36 sps:$4 sm:$0xff]   ;;  %v3934_v48 = vld [vmem:[%s4997_s1 + $0x880] ss:$16 sps:$4 sm:$0xff]  }
  0xde   : > { %2363 = vmatmul.mubr.bf16.gmra.mrb[12].mxu0 %v3888_v50  ;;  %2728 = vmatmul.mubr.bf16.gmra.mrb[12].mxu1 %v3888_v50  ;;  %v3942_v50 = vld [vmem:[%s4997_s1 + $0x8a4] ss:$16 sps:$4 sm:$0xff]  }
  0xdf   : > { %2386 = vmatpush1.bf16.msra.mxu0 %v3832_v49  ;;  %2751 = vmatpush1.bf16.msra.mxu1 %v3835_v51  ;;  %v3937_v49 = vld [vmem:[%s4997_s1 + $0x888] ss:$16 sps:$4 sm:$0xff]   ;;  %v3945_v51 = vld [vmem:[%s4997_s1 + $0x8ac] ss:$16 sps:$4 sm:$0xff]  }
  0xe0   : > { %2387 = vmatprep.subr.bf16.mxu0 %v3840_v52  ;;  %2752 = vmatprep.subr.bf16.mxu1 %v3843_v53  ;;  %v3946_v52 = vld [vmem:[%s4145_s13 + $0xf4] ss:$36 sps:$4 sm:$0xff]   ;;  %v3940_v53 = vld [vmem:[%s4997_s1 + $0x8a0] ss:$16 sps:$4 sm:$0xff]  }
  0xe1   : > { %2405 = vmatprep.mubr.bf16.mxu0 %v3903_v54  ;;  %2770 = vmatprep.mubr.bf16.mxu1 %v3903_v54  ;;  %v3943_v54 = vld [vmem:[%s4997_s1 + $0x8a8] ss:$16 sps:$4 sm:$0xff]  }
  0xe3   : > { %2388 = vmatpush1.bf16.msra.mxu0 %v3838_v55  ;;  %2753 = vmatpush1.bf16.msra.mxu1 %v3841_v56  ;;  %v3951_v55 = vld [vmem:[%s4997_s1 + $0x8c4] ss:$16 sps:$4 sm:$0xff]   ;;  %v3954_v56 = vld [vmem:[%s4997_s1 + $0x8cc] ss:$16 sps:$4 sm:$0xff]  }
  0xe4   : > { %2389 = vmatprep.subr.bf16.mxu0 %v3846_v57  ;;  %2754 = vmatprep.subr.bf16.mxu1 %v3849_v58  ;;  %v3948_v57 = vld [vmem:[%s4145_s13 + $0xf0] ss:$36 sps:$4 sm:$0xff]  }
  0xe5   : > { %v3949_v58 = vld [vmem:[%s4997_s1 + $0x8c0] ss:$16 sps:$4 sm:$0xff]  }
  0xe7   : > { %2390 = vmatpush1.bf16.msra.mxu0 %v3844_v59  ;;  %2755 = vmatpush1.bf16.msra.mxu1 %v3847_v60  ;;  %v3952_v59 = vld [vmem:[%s4997_s1 + $0x8c8] ss:$16 sps:$4 sm:$0xff]   ;;  %v3957_v60 = vld [vmem:[%s4997_s1 + $0x8e4] ss:$16 sps:$4 sm:$0xff]  }
  0xe8   : > { %2391 = vmatprep.subr.bf16.mxu0 %v3852_v61  ;;  %2756 = vmatprep.subr.bf16.mxu1 %v3855_v62  ;;  %v3960_v61 = vld [vmem:[%s4997_s1 + $0x8ec] ss:$16 sps:$4 sm:$0xff]   ;;  %v3955_v62 = vld [vmem:[%s4997_s1 + $0x8e0] ss:$16 sps:$4 sm:$0xff]  }
  0xeb   : > { %2392 = vmatpush1.bf16.msra.mxu0 %v3850_v63  ;;  %2757 = vmatpush1.bf16.msra.mxu1 %v3853_v0  ;;  %v3958_v63 = vld [vmem:[%s4997_s1 + $0x8e8] ss:$16 sps:$4 sm:$0xff]   ;;  %v3973_v0 = vmov 0  }
  0xec   : > { %2393 = vmatprep.subr.bf16.mxu0 %v3861_v1  ;;  %2758 = vmatprep.subr.bf16.mxu1 %v3864_v2  ;;  %v3961_v1 = vld [vmem:[%s4145_s13 + $0x20] ss:$36 sps:$4 sm:$0xff]   ;;  %v3962_v2 = vld [vmem:[%s4145_s13 + $0x68] ss:$36 sps:$4 sm:$0xff]  }
  0xef   : > { %2394 = vmatpush1.bf16.msra.mxu0 %v3859_v3  ;;  %2759 = vmatpush1.bf16.msra.mxu1 %v3862_v4  ;;  %v3963_v3 = vld [vmem:[%s4145_s13 + $0xb0] ss:$36 sps:$4 sm:$0xff]   ;;  %v3964_v4 = vld [vmem:[%s4145_s13 + $0xf8] ss:$36 sps:$4 sm:$0xff]  }
  0xf0   : > { %2395 = vmatprep.subr.bf16.mxu0 %v3867_v5  ;;  %2760 = vmatprep.subr.bf16.mxu1 %v3870_v6  ;;  %v510_v5 = vlaneseq }
  0xf2   : > { %v511_v6 = vshrl.u32 %v510_v5, 7 }
  0xf3   : > { %2396 = vmatpush1.bf16.msra.mxu0 %v3865_v7  ;;  %2761 = vmatpush1.bf16.msra.mxu1 %v3868_v8 }
  0xf4   : > { %2397 = vmatprep.subr.bf16.mxu0 %v3876_v9  ;;  %2762 = vmatprep.subr.bf16.mxu1 %v3879_v10  ;;  %v512_v7 = vsub.s32 0, %v511_v6  ;;  %v520_v8 = vsub.s32 2, %v511_v6  ;;  %v508_v9 = vld [vmem:[%s4998_s2] sm:$0xf]  ;;  %v516_v10 = vsub.s32 1, %v511_v6 }
  0xf7   : > { %2398 = vmatpush1.bf16.msra.mxu0 %v3874_v11  ;;  %2763 = vmatpush1.bf16.msra.mxu1 %v3877_v12  ;;  %v524_v11 = vsub.s32 3, %v511_v6  ;;  %v4916_v12 = vrot.slane %v508_v9, %v512_v7 }
  0xf8   : > { %2399 = vmatprep.subr.bf16.mxu0 %v3882_v13  ;;  %2764 = vmatprep.subr.bf16.mxu1 %v3885_v14  ;;  %v4918_v13 = vrot.slane %v508_v9, %v520_v8  ;;  %v4920_v14 = vrot.slane %v508_v9, %v516_v10 }
  0xfb   : > { %2400 = vmatpush1.bf16.msra.mxu0 %v3880_v15  ;;  %2765 = vmatpush1.bf16.msra.mxu1 %v3883_v16  ;;  %v4922_v15 = vrot.slane %v508_v9, %v524_v11 }
  0xfc   : > { %2401 = vmatprep.subr.bf16.mxu0 %v3891_v17  ;;  %2766 = vmatprep.subr.bf16.mxu1 %v3894_v18 }
  0xff   : > { %2402 = vmatpush1.bf16.msra.mxu0 %v3889_v19  ;;  %2767 = vmatpush1.bf16.msra.mxu1 %v3892_v20 }
 0x100   : > { %2403 = vmatprep.subr.bf16.mxu0 %v3897_v21  ;;  %2768 = vmatprep.subr.bf16.mxu1 %v3900_v22 }
 0x103   : > { %2404 = vmatpush1.bf16.msra.mxu0 %v3895_v23  ;;  %2769 = vmatpush1.bf16.msra.mxu1 %v3898_v24 }
 0x104   : > { %2446 = vmatprep.subr.bf16.mxu0 %v3906_v25  ;;  %2811 = vmatprep.subr.bf16.mxu1 %v3909_v26 }
 0x106   : > { %2406 = vmatmul.mubr.bf16.vlgmr.msra.gmra.mrb[0].mxu0 %v3901_v27  ;;  %2771 = vmatmul.mubr.bf16.vlgmr.msra.gmra.mrb[0].mxu1 %v3901_v27 }
 0x107   : > { %2447 = vmatpush1.bf16.msra.mxu0 %v3904_v28  ;;  %2812 = vmatpush1.bf16.msra.mxu1 %v3907_v29 }
 0x108   : > { %2448 = vmatprep.subr.bf16.mxu0 %v3912_v30  ;;  %2813 = vmatprep.subr.bf16.mxu1 %v3915_v31 }
 0x109   : > { %2415 = vmatprep.mubr.bf16.mxu0 %v3916_v32  ;;  %2780 = vmatprep.mubr.bf16.mxu1 %v3916_v32 }
 0x10b   : > { %2449 = vmatpush1.bf16.msra.mxu0 %v3910_v33  ;;  %2814 = vmatpush1.bf16.msra.mxu1 %v3913_v34 }
 0x10c   : > { %2450 = vmatprep.subr.bf16.mxu0 %v3921_v35  ;;  %2815 = vmatprep.subr.bf16.mxu1 %v3924_v36 }
 0x10e   : > { %2416 = vmatmul.mubr.bf16.gmra.mrb[4].mxu0 %v3918_v37  ;;  %2781 = vmatmul.mubr.bf16.gmra.mrb[4].mxu1 %v3918_v37 }
 0x10f   : > { %2451 = vmatpush1.bf16.msra.mxu0 %v3919_v38  ;;  %2816 = vmatpush1.bf16.msra.mxu1 %v3922_v39 }
 0x110   : > { %2452 = vmatprep.subr.bf16.mxu0 %v3927_v40  ;;  %2817 = vmatprep.subr.bf16.mxu1 %v3930_v41 }
 0x111   : > { %2425 = vmatprep.mubr.bf16.mxu0 %v3931_v42  ;;  %2790 = vmatprep.mubr.bf16.mxu1 %v3931_v42 }
 0x113   : > { %2453 = vmatpush1.bf16.msra.mxu0 %v3925_v43  ;;  %2818 = vmatpush1.bf16.msra.mxu1 %v3928_v44 }
 0x114   : > { %2454 = vmatprep.subr.bf16.mxu0 %v3936_v45  ;;  %2819 = vmatprep.subr.bf16.mxu1 %v3939_v46 }
 0x116   : > { %2426 = vmatmul.mubr.bf16.gmra.mrb[8].mxu0 %v3933_v47  ;;  %2791 = vmatmul.mubr.bf16.gmra.mrb[8].mxu1 %v3933_v47 }
 0x117   : > { %2455 = vmatpush1.bf16.msra.mxu0 %v3934_v48  ;;  %2820 = vmatpush1.bf16.msra.mxu1 %v3937_v49 }
 0x118   : > { %2456 = vmatprep.subr.bf16.mxu0 %v3942_v50  ;;  %2821 = vmatprep.subr.bf16.mxu1 %v3945_v51 }
 0x119   : > { %2435 = vmatprep.mubr.bf16.mxu0 %v3946_v52  ;;  %2800 = vmatprep.mubr.bf16.mxu1 %v3946_v52 }
 0x11b   : > { %2457 = vmatpush1.bf16.msra.mxu0 %v3940_v53  ;;  %2822 = vmatpush1.bf16.msra.mxu1 %v3943_v54 }
 0x11c   : > { %2458 = vmatprep.subr.bf16.mxu0 %v3951_v55  ;;  %2823 = vmatprep.subr.bf16.mxu1 %v3954_v56 }
 0x11e   : > { %2436 = vmatmul.mubr.bf16.gmra.mrb[12].mxu0 %v3948_v57  ;;  %2801 = vmatmul.mubr.bf16.gmra.mrb[12].mxu1 %v3948_v57 }
 0x11f   : > { %2459 = vmatpush1.bf16.msra.mxu0 %v3949_v58  ;;  %2824 = vmatpush1.bf16.msra.mxu1 %v3952_v59 }
 0x120   : > { %2460 = vmatprep.subr.bf16.mxu0 %v3957_v60  ;;  %2825 = vmatprep.subr.bf16.mxu1 %v3960_v61 }
 0x121   : > { %2478 = vmatprep.mubr.bf16.mxu0 %v3973_v0  ;;  %2843 = vmatprep.mubr.bf16.mxu1 %v3973_v0 }
 0x123   : > { %2461 = vmatpush1.bf16.msra.mxu0 %v3955_v62  ;;  %2826 = vmatpush1.bf16.msra.mxu1 %v3958_v63 }
 0x126   : > { %2479 = vmatmul.mubr.bf16.vlgmr.msra.gmra.mrb[0].mxu0 %v3961_v1  ;;  %2844 = vmatmul.mubr.bf16.vlgmr.msra.gmra.mrb[0].mxu1 %v3961_v1 }
 0x127   : > { %2488 = vmatprep.mubr.bf16.mxu0 %v3973_v0  ;;  %2853 = vmatprep.mubr.bf16.mxu1 %v3973_v0 }
 0x12e   : > { %2489 = vmatmul.mubr.bf16.gmra.mrb[4].mxu0 %v3962_v2  ;;  %2854 = vmatmul.mubr.bf16.gmra.mrb[4].mxu1 %v3962_v2 }
 0x12f   : > { %2498 = vmatprep.mubr.bf16.mxu0 %v3973_v0  ;;  %2863 = vmatprep.mubr.bf16.mxu1 %v3973_v0 }
 0x136   : > { %2499 = vmatmul.mubr.bf16.gmra.mrb[8].mxu0 %v3963_v3  ;;  %2864 = vmatmul.mubr.bf16.gmra.mrb[8].mxu1 %v3963_v3 }
 0x137   : > { %2508 = vmatprep.mubr.bf16.mxu0 %v3973_v0  ;;  %2873 = vmatprep.mubr.bf16.mxu1 %v3973_v0 }
 0x13e   : > { %2509 = vmatmul.mubr.bf16.gmra.mrb[12].mxu0 %v3964_v4  ;;  %2874 = vmatmul.mubr.bf16.gmra.mrb[12].mxu1 %v3964_v4 }
 0x1f9   : > { %v2480_v16 = vpop.f32.mrb[0].mxu0  ;;  %v2845_v17 = vpop.f32.mrb[0].mxu1 }
 0x1fa   : > { %v3311_v18 = vadd.f32 %v2480_v16, %v4916_v12  ;;  %v3327_v19 = vadd.f32 %v2845_v17, %v4918_v13  ;;  %v2482_v20 = vpop.f32.mrb[1].mxu0  ;;  %v2847_v21 = vpop.f32.mrb[1].mxu1 }
 0x1fb   : > { %v3312_v22 = vadd.f32 %v2482_v20, %v4920_v14  ;;  %v3328_v23 = vadd.f32 %v2847_v21, %v4922_v15  ;;  %v2484_v24 = vpop.f32.mrb[2].mxu0  ;;  %v2849_v25 = vpop.f32.mrb[2].mxu1 }
 0x1fc   : > { %2884 = vst [vmem:[%s4927_s18] sm:$0xff] %v3311_v18  ;;  %2886 = vst [vmem:[%s4927_s18 + $0x10] sm:$0xff] %v3327_v19  ;;  %v3313_v26 = vadd.f32 %v2484_v24, %v4916_v12  ;;  %v3329_v27 = vadd.f32 %v2849_v25, %v4918_v13  ;;  %v2486_v28 = vpop.f32.mrb[3].mxu0  ;;  %v2851_v29 = vpop.f32.mrb[3].mxu1 }
 0x1fd   : > { %2885 = vst [vmem:[%s4927_s18 + $0x8] sm:$0xff] %v3312_v22  ;;  %2887 = vst [vmem:[%s4927_s18 + $0x18] sm:$0xff] %v3328_v23  ;;  %v3314_v30 = vadd.f32 %v2486_v28, %v4920_v14  ;;  %v3330_v31 = vadd.f32 %v2851_v29, %v4922_v15 }
 0x1fe   : > { %2888 = vst [vmem:[%s4927_s18 + $0x20] sm:$0xff] %v3313_v26  ;;  %2890 = vst [vmem:[%s4927_s18 + $0x30] sm:$0xff] %v3329_v27 }
 0x1ff   : > { %2889 = vst [vmem:[%s4927_s18 + $0x28] sm:$0xff] %v3314_v30  ;;  %2891 = vst [vmem:[%s4927_s18 + $0x38] sm:$0xff] %v3330_v31 }
 0x201   : > { %v2490_v32 = vpop.f32.mrb[4].mxu0  ;;  %v2855_v33 = vpop.f32.mrb[4].mxu1 }
 0x202   : > { %v3315_v34 = vadd.f32 %v2490_v32, %v4916_v12  ;;  %v3331_v35 = vadd.f32 %v2855_v33, %v4918_v13  ;;  %v2492_v36 = vpop.f32.mrb[5].mxu0  ;;  %v2857_v37 = vpop.f32.mrb[5].mxu1 }
 0x203   : > { %v3316_v38 = vadd.f32 %v2492_v36, %v4920_v14  ;;  %v3332_v39 = vadd.f32 %v2857_v37, %v4922_v15  ;;  %v2494_v40 = vpop.f32.mrb[6].mxu0  ;;  %v2859_v41 = vpop.f32.mrb[6].mxu1 }
 0x204   : > { %2892 = vst [vmem:[%s4927_s18 + $0x40] sm:$0xff] %v3315_v34  ;;  %2894 = vst [vmem:[%s4927_s18 + $0x50] sm:$0xff] %v3331_v35  ;;  %v3317_v42 = vadd.f32 %v2494_v40, %v4916_v12  ;;  %v3333_v43 = vadd.f32 %v2859_v41, %v4918_v13  ;;  %v2496_v44 = vpop.f32.mrb[7].mxu0  ;;  %v2861_v45 = vpop.f32.mrb[7].mxu1 }
 0x205   : > { %2893 = vst [vmem:[%s4927_s18 + $0x48] sm:$0xff] %v3316_v38  ;;  %2895 = vst [vmem:[%s4927_s18 + $0x58] sm:$0xff] %v3332_v39  ;;  %v3318_v46 = vadd.f32 %v2496_v44, %v4920_v14  ;;  %v3334_v47 = vadd.f32 %v2861_v45, %v4922_v15 }
 0x206   : > { %2896 = vst [vmem:[%s4927_s18 + $0x60] sm:$0xff] %v3317_v42  ;;  %2898 = vst [vmem:[%s4927_s18 + $0x70] sm:$0xff] %v3333_v43 }
 0x207   : > { %2897 = vst [vmem:[%s4927_s18 + $0x68] sm:$0xff] %v3318_v46  ;;  %2899 = vst [vmem:[%s4927_s18 + $0x78] sm:$0xff] %v3334_v47 }
 0x209   : > { %v2500_v48 = vpop.f32.mrb[8].mxu0  ;;  %v2865_v49 = vpop.f32.mrb[8].mxu1 }
 0x20a   : > { %v3319_v50 = vadd.f32 %v2500_v48, %v4916_v12  ;;  %v3335_v51 = vadd.f32 %v2865_v49, %v4918_v13  ;;  %v2502_v52 = vpop.f32.mrb[9].mxu0  ;;  %v2867_v53 = vpop.f32.mrb[9].mxu1 }
 0x20b   : > { %v3320_v54 = vadd.f32 %v2502_v52, %v4920_v14  ;;  %v3336_v55 = vadd.f32 %v2867_v53, %v4922_v15  ;;  %v2504_v56 = vpop.f32.mrb[10].mxu0  ;;  %v2869_v57 = vpop.f32.mrb[10].mxu1 }
 0x20c   : > { %2900 = vst [vmem:[%s4927_s18 + $0x80] sm:$0xff] %v3319_v50  ;;  %2902 = vst [vmem:[%s4927_s18 + $0x90] sm:$0xff] %v3335_v51  ;;  %v3321_v58 = vadd.f32 %v2504_v56, %v4916_v12  ;;  %v3337_v59 = vadd.f32 %v2869_v57, %v4918_v13  ;;  %v2506_v60 = vpop.f32.mrb[11].mxu0  ;;  %v2871_v61 = vpop.f32.mrb[11].mxu1 }
 0x20d   : > { %2901 = vst [vmem:[%s4927_s18 + $0x88] sm:$0xff] %v3320_v54  ;;  %2903 = vst [vmem:[%s4927_s18 + $0x98] sm:$0xff] %v3336_v55  ;;  %v3322_v62 = vadd.f32 %v2506_v60, %v4920_v14  ;;  %v3338_v63 = vadd.f32 %v2871_v61, %v4922_v15 }
 0x20e   : > { %2904 = vst [vmem:[%s4927_s18 + $0xa0] sm:$0xff] %v3321_v58  ;;  %2906 = vst [vmem:[%s4927_s18 + $0xb0] sm:$0xff] %v3337_v59 }
 0x20f   : > { %2905 = vst [vmem:[%s4927_s18 + $0xa8] sm:$0xff] %v3322_v62  ;;  %2907 = vst [vmem:[%s4927_s18 + $0xb8] sm:$0xff] %v3338_v63 }
 0x211   : > { %v2510_v0 = vpop.f32.mrb[12].mxu0  ;;  %v2875_v1 = vpop.f32.mrb[12].mxu1 }
 0x212   : > { %v3323_v2 = vadd.f32 %v2510_v0, %v4916_v12  ;;  %v3339_v3 = vadd.f32 %v2875_v1, %v4918_v13  ;;  %v2512_v4 = vpop.f32.mrb[13].mxu0  ;;  %v2877_v5 = vpop.f32.mrb[13].mxu1 }
 0x213   : > { %v3324_v6 = vadd.f32 %v2512_v4, %v4920_v14  ;;  %v3340_v7 = vadd.f32 %v2877_v5, %v4922_v15  ;;  %v2514_v8 = vpop.f32.mrb[14].mxu0  ;;  %v2879_v9 = vpop.f32.mrb[14].mxu1 }
 0x214   : > { %2908 = vst [vmem:[%s4927_s18 + $0xc0] sm:$0xff] %v3323_v2  ;;  %2910 = vst [vmem:[%s4927_s18 + $0xd0] sm:$0xff] %v3339_v3  ;;  %v3325_v10 = vadd.f32 %v2514_v8, %v4916_v12  ;;  %v3341_v11 = vadd.f32 %v2879_v9, %v4918_v13  ;;  %v2516_v16 = vpop.f32.mrb[15].mxu0  ;;  %v2881_v17 = vpop.f32.mrb[15].mxu1 }
 0x215   : > { %2909 = vst [vmem:[%s4927_s18 + $0xc8] sm:$0xff] %v3324_v6  ;;  %2911 = vst [vmem:[%s4927_s18 + $0xd8] sm:$0xff] %v3340_v7  ;;  %v3326_v18 = vadd.f32 %v2516_v16, %v4920_v14  ;;  %v3342_v19 = vadd.f32 %v2881_v17, %v4922_v15 }
 0x216   : > { %2912 = vst [vmem:[%s4927_s18 + $0xe0] sm:$0xff] %v3325_v10  ;;  %2914 = vst [vmem:[%s4927_s18 + $0xf0] sm:$0xff] %v3341_v11 }
 0x217   : > { %2913 = vst [vmem:[%s4927_s18 + $0xe8] sm:$0xff] %v3326_v18  ;;  %2915 = vst [vmem:[%s4927_s18 + $0xf8] sm:$0xff] %v3342_v19 }
 0x218 PF: > { %s13_s12 = sadd.s32 1, %s3971_s12  }
 0x219   : > { %p10_p4 = scmp.ge.s32.totalorder %s13_s12, 4  }
 0x21b   :  { %12 = sbr.rel (!%p10_p4) target bundleno = 1 (0x1), region = 62 }

</bundles_post_ra>
